<compile_context>
chip_gen: v7x
topology: tpu7x:2x2x1
jax: 0.10.0
libtpu: 0.0.40
codegen_flags: <defaults>
</compile_context>

<pallas_src>
import jax
import jax.numpy as jnp
from jax import lax
from jax.experimental import pallas as pl
from jax.experimental.pallas import tpu as pltpu

OUT_PAD = 128      # lane-dense classifier width; only lanes 0..2 are valid
NEG_BIG = -1e30    # bias for dead lanes -> exp underflows to 0 in the log_softmax
                   # (valid logits are O(1..100), never anywhere near -1e30, so this is exact)
LEN_BUCKET = 8     # sequence lengths are padded up to a multiple of this (compile bucketing)


def lstm_kernel(len_ref, tok_ref, emb_ref, whh_ref, wout_ref, bout_ref, out_ref):
    """Fused gather + LSTM recurrence + classifier, single invocation.

    len_ref : (1,)        i32 SMEM   true sequence length (<= T_pad)
    tok_ref : (T_pad,)    i32 SMEM   token ids (zero-padded past the true length)
    emb_ref : (V, 1, 4H)  f32 VMEM   per-token precomputed x @ W_ih^T + (b_ih + b_hh),
                                     gate order permuted to i, f, o, g
    whh_ref : (H, 4H)     bf16 VMEM  recurrent weight (transposed), gate order i, f, o, g
    wout_ref: (H, 128)    f32 VMEM   hidden2tag weight^T, zero-padded past column 3
    bout_ref: (1, 128)    f32 VMEM   hidden2tag bias, NEG_BIG past column 3
    out_ref : (1, 128)    f32        log-softmax scores (valid lanes 0..2)
    """
    T_pad = tok_ref.shape[0]
    H = whh_ref.shape[0]
    n_valid = len_ref[0]

    def step(t, carry):
        h, c = carry
        tok = tok_ref[t]                      # SMEM scalar read
        wx_t = emb_ref[tok]                   # fused gather: leading-dim dynamic index -> (1, 4H)
        gates = wx_t + jnp.dot(h.astype(jnp.bfloat16), whh_ref[...],
                               preferred_element_type=jnp.float32)        # (1, 4H) f32
        # gate order is (i, f, o, g): 2 EUP launches total per step
        ifo = jax.nn.sigmoid(gates[:, 0:3 * H])
        i_g = ifo[:, 0:H]
        f_g = ifo[:, H:2 * H]
        o_g = ifo[:, 2 * H:3 * H]
        g_g = jnp.tanh(gates[:, 3 * H:4 * H])
        c_new = f_g * c + i_g * g_g
        h_new = o_g * jnp.tanh(c_new)
        # bucketed-length guard: padded steps leave the carry untouched
        active = t < n_valid
        return (jnp.where(active, h_new, h), jnp.where(active, c_new, c))

    # PyTorch init_hidden() -> zeros for both h and c
    h0 = jnp.zeros((1, H), jnp.float32)
    c0 = jnp.zeros((1, H), jnp.float32)
    h_fin, _ = lax.fori_loop(0, T_pad, step, (h0, c0), unroll=True)

    # hidden2tag + log_softmax (padded lanes carry NEG_BIG -> exactly zero probability)
    logits = (jnp.dot(h_fin, wout_ref[...], preferred_element_type=jnp.float32)
              + bout_ref[...])                                            # (1, 128)
    m = jnp.max(logits, axis=-1, keepdims=True)
    shifted = logits - m
    lse = jnp.log(jnp.sum(jnp.exp(shifted), axis=-1, keepdims=True))
    out_ref[...] = shifted - lse


def lstm_forward(sentence, params):
    """sentence: int32 (T,) token ids. Returns (1, 3) log-probabilities."""
    emb_proj = params["emb_proj"]      # (V, 1, 4H) f32
    whh = params["w_hh_t"]             # (H, 4H) bf16
    wout = params["w_out_t_pad"]       # (H, OUT_PAD) f32
    bout = params["b_out_pad"]         # (1, OUT_PAD) f32

    T = sentence.shape[0]
    T_pad = int(pl.cdiv(T, LEN_BUCKET)) * LEN_BUCKET      # compile bucket
    tokens = jnp.zeros((T_pad,), jnp.int32).at[:T].set(sentence.astype(jnp.int32))
    seq_len = jnp.array([T], jnp.int32)

    V, _, G4 = emb_proj.shape
    H = whh.shape[0]

    grid_spec = pltpu.PrefetchScalarGridSpec(
        num_scalar_prefetch=2,                  # (seq_len, tokens) land in SMEM
        grid=(1,),                              # single step; recurrence lives in-kernel
        in_specs=[
            pl.BlockSpec((V, 1, G4), lambda i, *_: (0, 0, 0)),   # emb_proj (resident)
            pl.BlockSpec((H, G4), lambda i, *_: (0, 0)),         # W_hh^T (resident)
            pl.BlockSpec((H, OUT_PAD), lambda i, *_: (0, 0)),    # W_out^T padded
            pl.BlockSpec((1, OUT_PAD), lambda i, *_: (0, 0)),    # b_out padded
        ],
        out_specs=pl.BlockSpec((1, OUT_PAD), lambda i, *_: (0, 0)),
    )

    out_pad = pl.pallas_call(
        lstm_kernel,
        out_shape=jax.ShapeDtypeStruct((1, OUT_PAD), jnp.float32),
        grid_spec=grid_spec,
        compiler_params=pltpu.CompilerParams(
            dimension_semantics=("arbitrary",)),
    )(seq_len, tokens, emb_proj, whh, wout, bout)

    return out_pad[:, :3]                          # (1, 3) log-probabilities


def init_params(key, vocab_size, embedding_dim, hidden_dim):
    ks = jax.random.split(key, 7)
    E, H, V = embedding_dim, hidden_dim, vocab_size
    bound = 1.0 / jnp.sqrt(H)
    u = lambda k, shape: jax.random.uniform(k, shape, jnp.float32, -bound, bound)

    embedding = jax.random.normal(ks[0], (V, E), jnp.float32)   # nn.Embedding ~ N(0,1)
    # PyTorch weight_ih_l0 is (4H, E), weight_hh_l0 is (4H, H), gate order (i, f, g, o).
    w_ih_t = u(ks[1], (E, 4 * H))
    w_hh_t = u(ks[2], (H, 4 * H))
    b_gates = u(ks[3], (1, 4 * H)) + u(ks[4], (1, 4 * H))       # b_ih + b_hh
    w_out_t = u(ks[5], (H, 3))                                  # hidden2tag weight^T
    b_out = u(ks[6], (1, 3))

    # Permute gate columns (i,f,g,o) -> (i,f,o,g) so the kernel does one sigmoid over [0:3H)
    # and one tanh over [3H:4H). Applied consistently to every gate-dim tensor.
    def perm_gates(a):
        return jnp.concatenate(
            [a[:, 0:2 * H], a[:, 3 * H:4 * H], a[:, 2 * H:3 * H]], axis=1)

    w_ih_t = perm_gates(w_ih_t)
    w_hh_t = perm_gates(w_hh_t)
    b_gates = perm_gates(b_gates)

    # Model-time precompute: fold embedding -> input projection -> gate bias into one
    # (V, 4H) table; stored as (V, 1, 4H) so the kernel gathers rows with a cheap
    # leading-dim dynamic index.
    emb_proj = (embedding @ w_ih_t + b_gates).reshape(V, 1, 4 * H)

    # Lane-dense classifier: pad 3 -> OUT_PAD. Dead lanes get zero weight and NEG_BIG
    # bias so the in-kernel log_softmax over the padded row is exact for lanes 0..2.
    w_out_t_pad = jnp.zeros((H, OUT_PAD), jnp.float32).at[:, :3].set(w_out_t)
    b_out_pad = jnp.full((1, OUT_PAD), NEG_BIG, jnp.float32).at[:, :3].set(b_out)

    return {
        "emb_proj": emb_proj.astype(jnp.float32),
        "w_hh_t": w_hh_t.astype(jnp.bfloat16),    # MXU-native weight width (f32 accumulate)
        "w_out_t_pad": w_out_t_pad,
        "b_out_pad": b_out_pad,
    }


if __name__ == "__main__":
    # shapes from the PyTorch spec (embedding_dim=512, hidden_dim=256, batch=1)
    vocab_size = 32
    embedding_dim = 512
    hidden_dim = 256
    seq_len = 8

    key = jax.random.PRNGKey(0)
    pkey, skey = jax.random.split(key)
    params = init_params(pkey, vocab_size, embedding_dim, hidden_dim)
    sentence = jax.random.randint(skey, (seq_len,), 0, vocab_size, dtype=jnp.int32)

    out = lstm_forward(sentence, params)
    jax.block_until_ready(out)
    assert out.shape == (1, 3)
    # log_softmax sanity: class probabilities must sum to ~1
    s = float(jnp.exp(out).sum())
    assert abs(s - 1.0) < 1e-3, s
    print("KERNEL_OK")
</pallas_src>

<mosaic_0001>
module attributes {stable_mosaic.version = 11 : i64} {
  func.func @lstm_kernel(%arg0: i32, %arg1: memref<1xi32, #tpu.memory_space<smem>>, %arg2: memref<8xi32, #tpu.memory_space<smem>>, %arg3: memref<32x1x1024xf32, #tpu.memory_space<vmem>>, %arg4: memref<256x1024xbf16, #tpu.memory_space<vmem>>, %arg5: memref<256x128xf32, #tpu.memory_space<vmem>>, %arg6: memref<1x128xf32, #tpu.memory_space<vmem>>, %arg7: memref<1x128xf32, #tpu.memory_space<vmem>>) attributes {dimension_semantics = [#tpu.dimension_semantics<arbitrary>], iteration_bounds = array<i64: 1>, scalar_prefetch = 2 : i64, scratch_operands = 0 : i64, tpu.core_type = #tpu.core_type<tc>, window_params = [{pipeline_mode = #tpu.pipeline_mode<synchronous>, transform_indices = @transform_0, window_bounds = array<i64: 32, 1, 1024>}, {pipeline_mode = #tpu.pipeline_mode<synchronous>, transform_indices = @transform_1, window_bounds = array<i64: 256, 1024>}, {pipeline_mode = #tpu.pipeline_mode<synchronous>, transform_indices = @transform_2, window_bounds = array<i64: 256, 128>}, {pipeline_mode = #tpu.pipeline_mode<synchronous>, transform_indices = @transform_3, window_bounds = array<i64: 1, 128>}, {pipeline_mode = #tpu.pipeline_mode<synchronous>, transform_indices = @transform_4, window_bounds = array<i64: 1, 128>}]} {
    %c0 = arith.constant 0 : index
    %0 = memref.load %arg1[%c0] : memref<1xi32, #tpu.memory_space<smem>>
    %cst = arith.constant 0.000000e+00 : f32
    %1 = vector.broadcast %cst : f32 to vector<1x256xf32>
    %cst_0 = arith.constant 0.000000e+00 : f32
    %2 = vector.broadcast %cst_0 : f32 to vector<1x256xf32>
    %c0_i32 = arith.constant 0 : i32
    %3 = arith.index_cast %c0_i32 : i32 to index
    %4 = memref.load %arg2[%3] : memref<8xi32, #tpu.memory_space<smem>>
    %5 = arith.index_cast %4 : i32 to index
    %c0_1 = arith.constant 0 : index
    %c0_2 = arith.constant 0 : index
    %6 = vector.load %arg3[%5, %c0_1, %c0_2] : memref<32x1x1024xf32, #tpu.memory_space<vmem>>, vector<1x1x1024xf32>
    %7 = vector.shape_cast %6 : vector<1x1x1024xf32> to vector<1x1024xf32>
    %8 = arith.truncf %1 : vector<1x256xf32> to vector<1x256xbf16>
    %c0_3 = arith.constant 0 : index
    %c0_4 = arith.constant 0 : index
    %9 = vector.load %arg4[%c0_3, %c0_4] : memref<256x1024xbf16, #tpu.memory_space<vmem>>, vector<256x1024xbf16>
    %cst_5 = arith.constant dense<0.000000e+00> : vector<1x1024xf32>
    %10 = tpu.matmul %8, %9, %cst_5 {dimension_numbers = #tpu.dot_dimension_numbers<[1], [0], [0], [1], [0, 0, 1, 1], [], []>} : vector<1x256xbf16>, vector<256x1024xbf16>, vector<1x1024xf32> -> vector<1x1024xf32>
    %11 = arith.addf %7, %10 : vector<1x1024xf32>
    %12 = vector.extract_strided_slice %11 {offsets = [0, 0], sizes = [1, 768], strides = [1, 1]} : vector<1x1024xf32> to vector<1x768xf32>
    %13 = arith.negf %12 : vector<1x768xf32>
    %14 = math.exp %13 : vector<1x768xf32>
    %cst_6 = arith.constant 1.000000e+00 : f32
    %15 = vector.broadcast %cst_6 : f32 to vector<1x768xf32>
    %16 = arith.addf %15, %14 : vector<1x768xf32>
    %17 = arith.divf %15, %16 : vector<1x768xf32>
    %18 = vector.extract_strided_slice %17 {offsets = [0, 0], sizes = [1, 256], strides = [1, 1]} : vector<1x768xf32> to vector<1x256xf32>
    %19 = vector.extract_strided_slice %17 {offsets = [0, 256], sizes = [1, 256], strides = [1, 1]} : vector<1x768xf32> to vector<1x256xf32>
    %20 = vector.extract_strided_slice %17 {offsets = [0, 512], sizes = [1, 256], strides = [1, 1]} : vector<1x768xf32> to vector<1x256xf32>
    %21 = vector.extract_strided_slice %11 {offsets = [0, 768], sizes = [1, 256], strides = [1, 1]} : vector<1x1024xf32> to vector<1x256xf32>
    %22 = math.tanh %21 : vector<1x256xf32>
    %23 = arith.mulf %19, %2 : vector<1x256xf32>
    %24 = arith.mulf %18, %22 : vector<1x256xf32>
    %25 = arith.addf %23, %24 : vector<1x256xf32>
    %26 = math.tanh %25 : vector<1x256xf32>
    %27 = arith.mulf %20, %26 : vector<1x256xf32>
    %28 = arith.cmpi slt, %c0_i32, %0 : i32
    %29 = arith.select %28, %27, %1 : vector<1x256xf32>
    %30 = arith.select %28, %25, %2 : vector<1x256xf32>
    %c1_i32 = arith.constant 1 : i32
    %31 = arith.index_cast %c1_i32 : i32 to index
    %32 = memref.load %arg2[%31] : memref<8xi32, #tpu.memory_space<smem>>
    %33 = arith.index_cast %32 : i32 to index
    %c0_7 = arith.constant 0 : index
    %c0_8 = arith.constant 0 : index
    %34 = vector.load %arg3[%33, %c0_7, %c0_8] : memref<32x1x1024xf32, #tpu.memory_space<vmem>>, vector<1x1x1024xf32>
    %35 = vector.shape_cast %34 : vector<1x1x1024xf32> to vector<1x1024xf32>
    %36 = arith.truncf %29 : vector<1x256xf32> to vector<1x256xbf16>
    %c0_9 = arith.constant 0 : index
    %c0_10 = arith.constant 0 : index
    %37 = vector.load %arg4[%c0_9, %c0_10] : memref<256x1024xbf16, #tpu.memory_space<vmem>>, vector<256x1024xbf16>
    %cst_11 = arith.constant dense<0.000000e+00> : vector<1x1024xf32>
    %38 = tpu.matmul %36, %37, %cst_11 {dimension_numbers = #tpu.dot_dimension_numbers<[1], [0], [0], [1], [0, 0, 1, 1], [], []>} : vector<1x256xbf16>, vector<256x1024xbf16>, vector<1x1024xf32> -> vector<1x1024xf32>
    %39 = arith.addf %35, %38 : vector<1x1024xf32>
    %40 = vector.extract_strided_slice %39 {offsets = [0, 0], sizes = [1, 768], strides = [1, 1]} : vector<1x1024xf32> to vector<1x768xf32>
    %41 = arith.negf %40 : vector<1x768xf32>
    %42 = math.exp %41 : vector<1x768xf32>
    %cst_12 = arith.constant 1.000000e+00 : f32
    %43 = vector.broadcast %cst_12 : f32 to vector<1x768xf32>
    %44 = arith.addf %43, %42 : vector<1x768xf32>
    %45 = arith.divf %43, %44 : vector<1x768xf32>
    %46 = vector.extract_strided_slice %45 {offsets = [0, 0], sizes = [1, 256], strides = [1, 1]} : vector<1x768xf32> to vector<1x256xf32>
    %47 = vector.extract_strided_slice %45 {offsets = [0, 256], sizes = [1, 256], strides = [1, 1]} : vector<1x768xf32> to vector<1x256xf32>
    %48 = vector.extract_strided_slice %45 {offsets = [0, 512], sizes = [1, 256], strides = [1, 1]} : vector<1x768xf32> to vector<1x256xf32>
    %49 = vector.extract_strided_slice %39 {offsets = [0, 768], sizes = [1, 256], strides = [1, 1]} : vector<1x1024xf32> to vector<1x256xf32>
    %50 = math.tanh %49 : vector<1x256xf32>
    %51 = arith.mulf %47, %30 : vector<1x256xf32>
    %52 = arith.mulf %46, %50 : vector<1x256xf32>
    %53 = arith.addf %51, %52 : vector<1x256xf32>
    %54 = math.tanh %53 : vector<1x256xf32>
    %55 = arith.mulf %48, %54 : vector<1x256xf32>
    %56 = arith.cmpi slt, %c1_i32, %0 : i32
    %57 = arith.select %56, %55, %29 : vector<1x256xf32>
    %58 = arith.select %56, %53, %30 : vector<1x256xf32>
    %c2_i32 = arith.constant 2 : i32
    %59 = arith.index_cast %c2_i32 : i32 to index
    %60 = memref.load %arg2[%59] : memref<8xi32, #tpu.memory_space<smem>>
    %61 = arith.index_cast %60 : i32 to index
    %c0_13 = arith.constant 0 : index
    %c0_14 = arith.constant 0 : index
    %62 = vector.load %arg3[%61, %c0_13, %c0_14] : memref<32x1x1024xf32, #tpu.memory_space<vmem>>, vector<1x1x1024xf32>
    %63 = vector.shape_cast %62 : vector<1x1x1024xf32> to vector<1x1024xf32>
    %64 = arith.truncf %57 : vector<1x256xf32> to vector<1x256xbf16>
    %c0_15 = arith.constant 0 : index
    %c0_16 = arith.constant 0 : index
    %65 = vector.load %arg4[%c0_15, %c0_16] : memref<256x1024xbf16, #tpu.memory_space<vmem>>, vector<256x1024xbf16>
    %cst_17 = arith.constant dense<0.000000e+00> : vector<1x1024xf32>
    %66 = tpu.matmul %64, %65, %cst_17 {dimension_numbers = #tpu.dot_dimension_numbers<[1], [0], [0], [1], [0, 0, 1, 1], [], []>} : vector<1x256xbf16>, vector<256x1024xbf16>, vector<1x1024xf32> -> vector<1x1024xf32>
    %67 = arith.addf %63, %66 : vector<1x1024xf32>
    %68 = vector.extract_strided_slice %67 {offsets = [0, 0], sizes = [1, 768], strides = [1, 1]} : vector<1x1024xf32> to vector<1x768xf32>
    %69 = arith.negf %68 : vector<1x768xf32>
    %70 = math.exp %69 : vector<1x768xf32>
    %cst_18 = arith.constant 1.000000e+00 : f32
    %71 = vector.broadcast %cst_18 : f32 to vector<1x768xf32>
    %72 = arith.addf %71, %70 : vector<1x768xf32>
    %73 = arith.divf %71, %72 : vector<1x768xf32>
    %74 = vector.extract_strided_slice %73 {offsets = [0, 0], sizes = [1, 256], strides = [1, 1]} : vector<1x768xf32> to vector<1x256xf32>
    %75 = vector.extract_strided_slice %73 {offsets = [0, 256], sizes = [1, 256], strides = [1, 1]} : vector<1x768xf32> to vector<1x256xf32>
    %76 = vector.extract_strided_slice %73 {offsets = [0, 512], sizes = [1, 256], strides = [1, 1]} : vector<1x768xf32> to vector<1x256xf32>
    %77 = vector.extract_strided_slice %67 {offsets = [0, 768], sizes = [1, 256], strides = [1, 1]} : vector<1x1024xf32> to vector<1x256xf32>
    %78 = math.tanh %77 : vector<1x256xf32>
    %79 = arith.mulf %75, %58 : vector<1x256xf32>
    %80 = arith.mulf %74, %78 : vector<1x256xf32>
    %81 = arith.addf %79, %80 : vector<1x256xf32>
    %82 = math.tanh %81 : vector<1x256xf32>
    %83 = arith.mulf %76, %82 : vector<1x256xf32>
    %84 = arith.cmpi slt, %c2_i32, %0 : i32
    %85 = arith.select %84, %83, %57 : vector<1x256xf32>
    %86 = arith.select %84, %81, %58 : vector<1x256xf32>
    %c3_i32 = arith.constant 3 : i32
    %87 = arith.index_cast %c3_i32 : i32 to index
    %88 = memref.load %arg2[%87] : memref<8xi32, #tpu.memory_space<smem>>
    %89 = arith.index_cast %88 : i32 to index
    %c0_19 = arith.constant 0 : index
    %c0_20 = arith.constant 0 : index
    %90 = vector.load %arg3[%89, %c0_19, %c0_20] : memref<32x1x1024xf32, #tpu.memory_space<vmem>>, vector<1x1x1024xf32>
    %91 = vector.shape_cast %90 : vector<1x1x1024xf32> to vector<1x1024xf32>
    %92 = arith.truncf %85 : vector<1x256xf32> to vector<1x256xbf16>
    %c0_21 = arith.constant 0 : index
    %c0_22 = arith.constant 0 : index
    %93 = vector.load %arg4[%c0_21, %c0_22] : memref<256x1024xbf16, #tpu.memory_space<vmem>>, vector<256x1024xbf16>
    %cst_23 = arith.constant dense<0.000000e+00> : vector<1x1024xf32>
    %94 = tpu.matmul %92, %93, %cst_23 {dimension_numbers = #tpu.dot_dimension_numbers<[1], [0], [0], [1], [0, 0, 1, 1], [], []>} : vector<1x256xbf16>, vector<256x1024xbf16>, vector<1x1024xf32> -> vector<1x1024xf32>
    %95 = arith.addf %91, %94 : vector<1x1024xf32>
    %96 = vector.extract_strided_slice %95 {offsets = [0, 0], sizes = [1, 768], strides = [1, 1]} : vector<1x1024xf32> to vector<1x768xf32>
    %97 = arith.negf %96 : vector<1x768xf32>
    %98 = math.exp %97 : vector<1x768xf32>
    %cst_24 = arith.constant 1.000000e+00 : f32
    %99 = vector.broadcast %cst_24 : f32 to vector<1x768xf32>
    %100 = arith.addf %99, %98 : vector<1x768xf32>
    %101 = arith.divf %99, %100 : vector<1x768xf32>
    %102 = vector.extract_strided_slice %101 {offsets = [0, 0], sizes = [1, 256], strides = [1, 1]} : vector<1x768xf32> to vector<1x256xf32>
    %103 = vector.extract_strided_slice %101 {offsets = [0, 256], sizes = [1, 256], strides = [1, 1]} : vector<1x768xf32> to vector<1x256xf32>
    %104 = vector.extract_strided_slice %101 {offsets = [0, 512], sizes = [1, 256], strides = [1, 1]} : vector<1x768xf32> to vector<1x256xf32>
    %105 = vector.extract_strided_slice %95 {offsets = [0, 768], sizes = [1, 256], strides = [1, 1]} : vector<1x1024xf32> to vector<1x256xf32>
    %106 = math.tanh %105 : vector<1x256xf32>
    %107 = arith.mulf %103, %86 : vector<1x256xf32>
    %108 = arith.mulf %102, %106 : vector<1x256xf32>
    %109 = arith.addf %107, %108 : vector<1x256xf32>
    %110 = math.tanh %109 : vector<1x256xf32>
    %111 = arith.mulf %104, %110 : vector<1x256xf32>
    %112 = arith.cmpi slt, %c3_i32, %0 : i32
    %113 = arith.select %112, %111, %85 : vector<1x256xf32>
    %114 = arith.select %112, %109, %86 : vector<1x256xf32>
    %c4_i32 = arith.constant 4 : i32
    %115 = arith.index_cast %c4_i32 : i32 to index
    %116 = memref.load %arg2[%115] : memref<8xi32, #tpu.memory_space<smem>>
    %117 = arith.index_cast %116 : i32 to index
    %c0_25 = arith.constant 0 : index
    %c0_26 = arith.constant 0 : index
    %118 = vector.load %arg3[%117, %c0_25, %c0_26] : memref<32x1x1024xf32, #tpu.memory_space<vmem>>, vector<1x1x1024xf32>
    %119 = vector.shape_cast %118 : vector<1x1x1024xf32> to vector<1x1024xf32>
    %120 = arith.truncf %113 : vector<1x256xf32> to vector<1x256xbf16>
    %c0_27 = arith.constant 0 : index
    %c0_28 = arith.constant 0 : index
    %121 = vector.load %arg4[%c0_27, %c0_28] : memref<256x1024xbf16, #tpu.memory_space<vmem>>, vector<256x1024xbf16>
    %cst_29 = arith.constant dense<0.000000e+00> : vector<1x1024xf32>
    %122 = tpu.matmul %120, %121, %cst_29 {dimension_numbers = #tpu.dot_dimension_numbers<[1], [0], [0], [1], [0, 0, 1, 1], [], []>} : vector<1x256xbf16>, vector<256x1024xbf16>, vector<1x1024xf32> -> vector<1x1024xf32>
    %123 = arith.addf %119, %122 : vector<1x1024xf32>
    %124 = vector.extract_strided_slice %123 {offsets = [0, 0], sizes = [1, 768], strides = [1, 1]} : vector<1x1024xf32> to vector<1x768xf32>
    %125 = arith.negf %124 : vector<1x768xf32>
    %126 = math.exp %125 : vector<1x768xf32>
    %cst_30 = arith.constant 1.000000e+00 : f32
    %127 = vector.broadcast %cst_30 : f32 to vector<1x768xf32>
    %128 = arith.addf %127, %126 : vector<1x768xf32>
    %129 = arith.divf %127, %128 : vector<1x768xf32>
    %130 = vector.extract_strided_slice %129 {offsets = [0, 0], sizes = [1, 256], strides = [1, 1]} : vector<1x768xf32> to vector<1x256xf32>
    %131 = vector.extract_strided_slice %129 {offsets = [0, 256], sizes = [1, 256], strides = [1, 1]} : vector<1x768xf32> to vector<1x256xf32>
    %132 = vector.extract_strided_slice %129 {offsets = [0, 512], sizes = [1, 256], strides = [1, 1]} : vector<1x768xf32> to vector<1x256xf32>
    %133 = vector.extract_strided_slice %123 {offsets = [0, 768], sizes = [1, 256], strides = [1, 1]} : vector<1x1024xf32> to vector<1x256xf32>
    %134 = math.tanh %133 : vector<1x256xf32>
    %135 = arith.mulf %131, %114 : vector<1x256xf32>
    %136 = arith.mulf %130, %134 : vector<1x256xf32>
    %137 = arith.addf %135, %136 : vector<1x256xf32>
    %138 = math.tanh %137 : vector<1x256xf32>
    %139 = arith.mulf %132, %138 : vector<1x256xf32>
    %140 = arith.cmpi slt, %c4_i32, %0 : i32
    %141 = arith.select %140, %139, %113 : vector<1x256xf32>
    %142 = arith.select %140, %137, %114 : vector<1x256xf32>
    %c5_i32 = arith.constant 5 : i32
    %143 = arith.index_cast %c5_i32 : i32 to index
    %144 = memref.load %arg2[%143] : memref<8xi32, #tpu.memory_space<smem>>
    %145 = arith.index_cast %144 : i32 to index
    %c0_31 = arith.constant 0 : index
    %c0_32 = arith.constant 0 : index
    %146 = vector.load %arg3[%145, %c0_31, %c0_32] : memref<32x1x1024xf32, #tpu.memory_space<vmem>>, vector<1x1x1024xf32>
    %147 = vector.shape_cast %146 : vector<1x1x1024xf32> to vector<1x1024xf32>
    %148 = arith.truncf %141 : vector<1x256xf32> to vector<1x256xbf16>
    %c0_33 = arith.constant 0 : index
    %c0_34 = arith.constant 0 : index
    %149 = vector.load %arg4[%c0_33, %c0_34] : memref<256x1024xbf16, #tpu.memory_space<vmem>>, vector<256x1024xbf16>
    %cst_35 = arith.constant dense<0.000000e+00> : vector<1x1024xf32>
    %150 = tpu.matmul %148, %149, %cst_35 {dimension_numbers = #tpu.dot_dimension_numbers<[1], [0], [0], [1], [0, 0, 1, 1], [], []>} : vector<1x256xbf16>, vector<256x1024xbf16>, vector<1x1024xf32> -> vector<1x1024xf32>
    %151 = arith.addf %147, %150 : vector<1x1024xf32>
    %152 = vector.extract_strided_slice %151 {offsets = [0, 0], sizes = [1, 768], strides = [1, 1]} : vector<1x1024xf32> to vector<1x768xf32>
    %153 = arith.negf %152 : vector<1x768xf32>
    %154 = math.exp %153 : vector<1x768xf32>
    %cst_36 = arith.constant 1.000000e+00 : f32
    %155 = vector.broadcast %cst_36 : f32 to vector<1x768xf32>
    %156 = arith.addf %155, %154 : vector<1x768xf32>
    %157 = arith.divf %155, %156 : vector<1x768xf32>
    %158 = vector.extract_strided_slice %157 {offsets = [0, 0], sizes = [1, 256], strides = [1, 1]} : vector<1x768xf32> to vector<1x256xf32>
    %159 = vector.extract_strided_slice %157 {offsets = [0, 256], sizes = [1, 256], strides = [1, 1]} : vector<1x768xf32> to vector<1x256xf32>
    %160 = vector.extract_strided_slice %157 {offsets = [0, 512], sizes = [1, 256], strides = [1, 1]} : vector<1x768xf32> to vector<1x256xf32>
    %161 = vector.extract_strided_slice %151 {offsets = [0, 768], sizes = [1, 256], strides = [1, 1]} : vector<1x1024xf32> to vector<1x256xf32>
    %162 = math.tanh %161 : vector<1x256xf32>
    %163 = arith.mulf %159, %142 : vector<1x256xf32>
    %164 = arith.mulf %158, %162 : vector<1x256xf32>
    %165 = arith.addf %163, %164 : vector<1x256xf32>
    %166 = math.tanh %165 : vector<1x256xf32>
    %167 = arith.mulf %160, %166 : vector<1x256xf32>
    %168 = arith.cmpi slt, %c5_i32, %0 : i32
    %169 = arith.select %168, %167, %141 : vector<1x256xf32>
    %170 = arith.select %168, %165, %142 : vector<1x256xf32>
    %c6_i32 = arith.constant 6 : i32
    %171 = arith.index_cast %c6_i32 : i32 to index
    %172 = memref.load %arg2[%171] : memref<8xi32, #tpu.memory_space<smem>>
    %173 = arith.index_cast %172 : i32 to index
    %c0_37 = arith.constant 0 : index
    %c0_38 = arith.constant 0 : index
    %174 = vector.load %arg3[%173, %c0_37, %c0_38] : memref<32x1x1024xf32, #tpu.memory_space<vmem>>, vector<1x1x1024xf32>
    %175 = vector.shape_cast %174 : vector<1x1x1024xf32> to vector<1x1024xf32>
    %176 = arith.truncf %169 : vector<1x256xf32> to vector<1x256xbf16>
    %c0_39 = arith.constant 0 : index
    %c0_40 = arith.constant 0 : index
    %177 = vector.load %arg4[%c0_39, %c0_40] : memref<256x1024xbf16, #tpu.memory_space<vmem>>, vector<256x1024xbf16>
    %cst_41 = arith.constant dense<0.000000e+00> : vector<1x1024xf32>
    %178 = tpu.matmul %176, %177, %cst_41 {dimension_numbers = #tpu.dot_dimension_numbers<[1], [0], [0], [1], [0, 0, 1, 1], [], []>} : vector<1x256xbf16>, vector<256x1024xbf16>, vector<1x1024xf32> -> vector<1x1024xf32>
    %179 = arith.addf %175, %178 : vector<1x1024xf32>
    %180 = vector.extract_strided_slice %179 {offsets = [0, 0], sizes = [1, 768], strides = [1, 1]} : vector<1x1024xf32> to vector<1x768xf32>
    %181 = arith.negf %180 : vector<1x768xf32>
    %182 = math.exp %181 : vector<1x768xf32>
    %cst_42 = arith.constant 1.000000e+00 : f32
    %183 = vector.broadcast %cst_42 : f32 to vector<1x768xf32>
    %184 = arith.addf %183, %182 : vector<1x768xf32>
    %185 = arith.divf %183, %184 : vector<1x768xf32>
    %186 = vector.extract_strided_slice %185 {offsets = [0, 0], sizes = [1, 256], strides = [1, 1]} : vector<1x768xf32> to vector<1x256xf32>
    %187 = vector.extract_strided_slice %185 {offsets = [0, 256], sizes = [1, 256], strides = [1, 1]} : vector<1x768xf32> to vector<1x256xf32>
    %188 = vector.extract_strided_slice %185 {offsets = [0, 512], sizes = [1, 256], strides = [1, 1]} : vector<1x768xf32> to vector<1x256xf32>
    %189 = vector.extract_strided_slice %179 {offsets = [0, 768], sizes = [1, 256], strides = [1, 1]} : vector<1x1024xf32> to vector<1x256xf32>
    %190 = math.tanh %189 : vector<1x256xf32>
    %191 = arith.mulf %187, %170 : vector<1x256xf32>
    %192 = arith.mulf %186, %190 : vector<1x256xf32>
    %193 = arith.addf %191, %192 : vector<1x256xf32>
    %194 = math.tanh %193 : vector<1x256xf32>
    %195 = arith.mulf %188, %194 : vector<1x256xf32>
    %196 = arith.cmpi slt, %c6_i32, %0 : i32
    %197 = arith.select %196, %195, %169 : vector<1x256xf32>
    %198 = arith.select %196, %193, %170 : vector<1x256xf32>
    %c7_i32 = arith.constant 7 : i32
    %199 = arith.index_cast %c7_i32 : i32 to index
    %200 = memref.load %arg2[%199] : memref<8xi32, #tpu.memory_space<smem>>
    %201 = arith.index_cast %200 : i32 to index
    %c0_43 = arith.constant 0 : index
    %c0_44 = arith.constant 0 : index
    %202 = vector.load %arg3[%201, %c0_43, %c0_44] : memref<32x1x1024xf32, #tpu.memory_space<vmem>>, vector<1x1x1024xf32>
    %203 = vector.shape_cast %202 : vector<1x1x1024xf32> to vector<1x1024xf32>
    %204 = arith.truncf %197 : vector<1x256xf32> to vector<1x256xbf16>
    %c0_45 = arith.constant 0 : index
    %c0_46 = arith.constant 0 : index
    %205 = vector.load %arg4[%c0_45, %c0_46] : memref<256x1024xbf16, #tpu.memory_space<vmem>>, vector<256x1024xbf16>
    %cst_47 = arith.constant dense<0.000000e+00> : vector<1x1024xf32>
    %206 = tpu.matmul %204, %205, %cst_47 {dimension_numbers = #tpu.dot_dimension_numbers<[1], [0], [0], [1], [0, 0, 1, 1], [], []>} : vector<1x256xbf16>, vector<256x1024xbf16>, vector<1x1024xf32> -> vector<1x1024xf32>
    %207 = arith.addf %203, %206 : vector<1x1024xf32>
    %208 = vector.extract_strided_slice %207 {offsets = [0, 0], sizes = [1, 768], strides = [1, 1]} : vector<1x1024xf32> to vector<1x768xf32>
    %209 = arith.negf %208 : vector<1x768xf32>
    %210 = math.exp %209 : vector<1x768xf32>
    %cst_48 = arith.constant 1.000000e+00 : f32
    %211 = vector.broadcast %cst_48 : f32 to vector<1x768xf32>
    %212 = arith.addf %211, %210 : vector<1x768xf32>
    %213 = arith.divf %211, %212 : vector<1x768xf32>
    %214 = vector.extract_strided_slice %213 {offsets = [0, 0], sizes = [1, 256], strides = [1, 1]} : vector<1x768xf32> to vector<1x256xf32>
    %215 = vector.extract_strided_slice %213 {offsets = [0, 256], sizes = [1, 256], strides = [1, 1]} : vector<1x768xf32> to vector<1x256xf32>
    %216 = vector.extract_strided_slice %213 {offsets = [0, 512], sizes = [1, 256], strides = [1, 1]} : vector<1x768xf32> to vector<1x256xf32>
    %217 = vector.extract_strided_slice %207 {offsets = [0, 768], sizes = [1, 256], strides = [1, 1]} : vector<1x1024xf32> to vector<1x256xf32>
    %218 = math.tanh %217 : vector<1x256xf32>
    %219 = arith.mulf %215, %198 : vector<1x256xf32>
    %220 = arith.mulf %214, %218 : vector<1x256xf32>
    %221 = arith.addf %219, %220 : vector<1x256xf32>
    %222 = math.tanh %221 : vector<1x256xf32>
    %223 = arith.mulf %216, %222 : vector<1x256xf32>
    %224 = arith.cmpi slt, %c7_i32, %0 : i32
    %225 = arith.select %224, %223, %197 : vector<1x256xf32>
    %226 = arith.select %224, %221, %198 : vector<1x256xf32>
    %c8_i32 = arith.constant 8 : i32
    %c0_49 = arith.constant 0 : index
    %c0_50 = arith.constant 0 : index
    %227 = vector.load %arg5[%c0_49, %c0_50] : memref<256x128xf32, #tpu.memory_space<vmem>>, vector<256x128xf32>
    %cst_51 = arith.constant dense<0.000000e+00> : vector<1x128xf32>
    %228 = tpu.matmul %225, %227, %cst_51 {dimension_numbers = #tpu.dot_dimension_numbers<[1], [0], [0], [1], [0, 0, 1, 1], [], []>} : vector<1x256xf32>, vector<256x128xf32>, vector<1x128xf32> -> vector<1x128xf32>
    %c0_52 = arith.constant 0 : index
    %c0_53 = arith.constant 0 : index
    %229 = vector.load %arg6[%c0_52, %c0_53] : memref<1x128xf32, #tpu.memory_space<vmem>>, vector<1x128xf32>
    %230 = arith.addf %228, %229 : vector<1x128xf32>
    %cst_54 = arith.constant dense<0xFF800000> : vector<1xf32>
    %231 = vector.multi_reduction <maximumf>, %230, %cst_54 [1] : vector<1x128xf32> to vector<1xf32>
    %232 = vector.shape_cast %231 : vector<1xf32> to vector<1x1xf32>
    %233 = vector.broadcast %232 : vector<1x1xf32> to vector<1x128xf32>
    %234 = arith.subf %230, %233 : vector<1x128xf32>
    %235 = math.exp %234 : vector<1x128xf32>
    %cst_55 = arith.constant dense<0.000000e+00> : vector<1xf32>
    %236 = vector.multi_reduction <add>, %235, %cst_55 [1] : vector<1x128xf32> to vector<1xf32>
    %237 = vector.shape_cast %236 : vector<1xf32> to vector<1x1xf32>
    %238 = math.log %237 : vector<1x1xf32>
    %239 = vector.broadcast %238 : vector<1x1xf32> to vector<1x128xf32>
    %240 = arith.subf %234, %239 : vector<1x128xf32>
    %c0_56 = arith.constant 0 : index
    %c0_57 = arith.constant 0 : index
    %241 = vector.load %arg7[%c0_56, %c0_57] : memref<1x128xf32, #tpu.memory_space<vmem>>, vector<1x128xf32>
    tpu.vector_store %arg7[%c0_56, %c0_57], %240 {strides = array<i32>} : memref<1x128xf32, #tpu.memory_space<vmem>>, vector<1x128xf32>,
    return
  }
  func.func @transform_0(%arg0: i32, %arg1: memref<1xi32, #tpu.memory_space<smem>>, %arg2: memref<8xi32, #tpu.memory_space<smem>>) -> (i32, i32, i32) {
    %c0_i32 = arith.constant 0 : i32
    %c0_i32_0 = arith.constant 0 : i32
    %c0_i32_1 = arith.constant 0 : i32
    %c0_i32_2 = arith.constant 0 : i32
    return %c0_i32, %c0_i32_0, %c0_i32_1 : i32, i32, i32
  }
  func.func @transform_1(%arg0: i32, %arg1: memref<1xi32, #tpu.memory_space<smem>>, %arg2: memref<8xi32, #tpu.memory_space<smem>>) -> (i32, i32) {
    %c0_i32 = arith.constant 0 : i32
    %c0_i32_0 = arith.constant 0 : i32
    %c0_i32_1 = arith.constant 0 : i32
    return %c0_i32, %c0_i32_0 : i32, i32
  }
  func.func @transform_2(%arg0: i32, %arg1: memref<1xi32, #tpu.memory_space<smem>>, %arg2: memref<8xi32, #tpu.memory_space<smem>>) -> (i32, i32) {
    %c0_i32 = arith.constant 0 : i32
    %c0_i32_0 = arith.constant 0 : i32
    %c0_i32_1 = arith.constant 0 : i32
    return %c0_i32, %c0_i32_0 : i32, i32
  }
  func.func @transform_3(%arg0: i32, %arg1: memref<1xi32, #tpu.memory_space<smem>>, %arg2: memref<8xi32, #tpu.memory_space<smem>>) -> (i32, i32) {
    %c0_i32 = arith.constant 0 : i32
    %c0_i32_0 = arith.constant 0 : i32
    %c0_i32_1 = arith.constant 0 : i32
    return %c0_i32, %c0_i32_0 : i32, i32
  }
  func.func @transform_4(%arg0: i32, %arg1: memref<1xi32, #tpu.memory_space<smem>>, %arg2: memref<8xi32, #tpu.memory_space<smem>>) -> (i32, i32) {
    %c0_i32 = arith.constant 0 : i32
    %c0_i32_0 = arith.constant 0 : i32
    %c0_i32_1 = arith.constant 0 : i32
    return %c0_i32, %c0_i32_0 : i32, i32
  }
}

</mosaic_0001>

<bundles_post_ra>
// kernel: tpu_custom_call.1
= control target key start
LH: loop header
LB: loop body
LE: loop exit
PB: predicated region body
PF: predicated region fallthrough
CT: control target
= control target key end

     0   :  { %s5117_s0 = inlined_call_operand.<no memory space> [shape: s32[1], index: 0, kind: input, shape index: {}]   ;;  %s5118_s1 = inlined_call_operand.vmem [shape: s32[8], index: 1, kind: input, shape index: {}]   ;;  %s5119_s2 = inlined_call_operand.hbm [shape: f32[32,1,1024], index: 2, kind: input, shape index: {}]   ;;  %s5120_s3 = inlined_call_operand.hbm [shape: bf16[256,1024], index: 3, kind: input, shape index: {}]   ;;  %s5121_s4 = inlined_call_operand.hbm [shape: f32[256,128], index: 4, kind: input, shape index: {}]   ;;  %s5122_s5 = inlined_call_operand.vmem [shape: f32[1,128], index: 5, kind: input, shape index: {}]   ;;  %s5123_s6 = inlined_call_operand.hbm [shape: f32[1,128], index: 6, kind: output, shape index: {}]  }
   0x1   :  { %s12_s23 = sshll.u32 %s5118_s1, 4  ;;  %s13_s23 = int_to_ptr.vmem [resolvable:$true] %s12_s23 }
   0x2   :  { %s3409_s24 = scalar_lea.vmem %s13_s23, 16  ;;  %p3414_p1 = scmp.lt.s32.totalorder %s13_s23, %s13_s23 }
   0x3   :  { %p3410_p0 = scmp.ne.s32.totalorder %s13_s23, %s3409_s24  ;;  %p3415_p2 = scmp.lt.s32.totalorder %s3409_s24, %s3409_s24 }
   0x5   :  { %p3416_p3 = por %p3415_p2, %p3414_p1 }
   0x7   :  { %p3417_p4 = pnand %p3416_p3, %p3410_p0 }
   0x9   :  { %3420 = shalt.err (!%p3417_p4)  }
   0xa   :  { %s3517_s25 = smov [#allocation4]  }
   0xb   :  { %15 = dma.vmem_to_smem %s13_s23, 16, %s3517_s25, [#allocation2] }
   0xc   :  { %3509 = dma.done.wait [#allocation2], 16 }
   0xd   :  { %3510 = vsyncadd [#allocation2], 4294967280 }
   0xe   :  { %17 = sfence }
   0xf   :  { %18 = vsyncpa [#allocation6], 0 }
  0x10   :  { %19 = vsyncpa [#allocation9], 0 }
  0x11   :  { %20 = vsyncpa [#allocation7], 0  ;;  %s3518_s26 = smov [#allocation8]   ;;  %s3421_s29 = scalar_lea.hbm %s5120_s3, 16384 }
  0x12   :  { %s38_s27 = sshll.u32 %s3518_s26, 4  ;;  %p3422_p5 = scmp.ne.s32.totalorder %s5120_s3, %s3421_s29  ;;  %s39_s27 = int_to_ptr.vmem [resolvable:$true] %s38_s27 }
  0x13   :  { %p3425_p6 = scmp.lt.u32.totalorder %s3421_s29, %s5120_s3 }
  0x15   :  { %p3427_p7 = pnand %p3425_p6, %p3422_p5 }
  0x17   :  { %3430 = shalt.err (!%p3427_p7)
}
  0x18   :  { %s3431_s10 = scalar_lea.vmem %s39_s27, 16384  ;;  %p3436_p9 = scmp.lt.s32.totalorder %s39_s27, %s39_s27 }
  0x19   :  { %p3432_p8 = scmp.ne.s32.totalorder %s39_s27, %s3431_s10  ;;  %p3437_p10 = scmp.lt.s32.totalorder %s3431_s10, %s3431_s10 }
  0x1b   :  { %p3438_p11 = por %p3437_p10, %p3436_p9 }
  0x1d   :  { %p3439_p12 = pnand %p3438_p11, %p3432_p8 }
  0x1f   :  { %3442 = shalt.err (!%p3439_p12)
}
  0x20   :  { %s3519_s11 = smov 512   ;;  %s3520_s12 = smov 32  }
  0x21   :  { %44 = dma.hbm_to_vmem [thread:$0]  %s5120_s3, 16384, %s39_s27, [#allocation9], %s3519_s11, %s3519_s11, %s3520_s12  }
  0x22   :  { %s3521_s15 = smov [#allocation5]   ;;  %s3443_s19 = scalar_lea.hbm %s5119_s2, 4096 }
  0x23   :  { %s26_s16 = sshll.u32 %s3521_s15, 4  ;;  %p3444_p13 = scmp.ne.s32.totalorder %s5119_s2, %s3443_s19  ;;  %s27_s16 = int_to_ptr.vmem [resolvable:$true] %s26_s16 }
  0x24   :  { %p3447_p0 = scmp.lt.u32.totalorder %s3443_s19, %s5119_s2 }
  0x26   :  { %p3449_p1 = pnand %p3447_p0, %p3444_p13 }
  0x28   :  { %3452 = shalt.err (!%p3449_p1)
}
  0x29   :  { %s3453_s24 = scalar_lea.vmem %s27_s16, 4096  ;;  %p3458_p3 = scmp.lt.s32.totalorder %s27_s16, %s27_s16 }
  0x2a   :  { %p3454_p2 = scmp.ne.s32.totalorder %s27_s16, %s3453_s24  ;;  %p3459_p4 = scmp.lt.s32.totalorder %s3453_s24, %s3453_s24 }
  0x2c   :  { %p3460_p5 = por %p3459_p4, %p3458_p3 }
  0x2e   :  { %p3461_p6 = pnand %p3460_p5, %p3454_p2 }
  0x30   :  { %3464 = shalt.err (!%p3461_p6)
}
  0x31   :  { %s3522_s3 = smov 128   ;;  %s3523_s25 = smov 8  }
  0x32   :  { %32 = dma.hbm_to_vmem [thread:$0]  %s5119_s2, 4096, %s27_s16, [#allocation6], %s3522_s3, %s3522_s3, %s3523_s25  }
  0x33   :  { %s3524_s1 = smov [#allocation10]   ;;  %s3465_s7 = scalar_lea.hbm %s5121_s4, 4096 }
  0x34   :  { %s50_s28 = sshll.u32 %s3524_s1, 4  ;;  %p3466_p7 = scmp.ne.s32.totalorder %s5121_s4, %s3465_s7  ;;  %s51_s28 = int_to_ptr.vmem [resolvable:$true] %s50_s28 }
  0x35   :  { %p3469_p8 = scmp.lt.u32.totalorder %s3465_s7, %s5121_s4 }
  0x37   :  { %p3471_p9 = pnand %p3469_p8, %p3466_p7 }
  0x39   :  { %3474 = shalt.err (!%p3471_p9)
}
  0x3a   :  { %s3475_s12 = scalar_lea.vmem %s51_s28, 4096  ;;  %p3480_p11 = scmp.lt.s32.totalorder %s51_s28, %s51_s28 }
  0x3b   :  { %p3476_p10 = scmp.ne.s32.totalorder %s51_s28, %s3475_s12  ;;  %p3481_p12 = scmp.lt.s32.totalorder %s3475_s12, %s3475_s12 }
  0x3d   :  { %p3482_p13 = por %p3481_p12, %p3480_p11 }
  0x3f   :  { %p3483_p0 = pnand %p3482_p13, %p3476_p10 }
  0x41   :  { %3486 = shalt.err (!%p3483_p0)
}
  0x42   :  { %56 = dma.hbm_to_vmem [thread:$0]  %s5121_s4, 4096, %s51_s28, [#allocation9], %s3522_s3, %s3522_s3, %s3523_s25  }
  0x43   :  { %3511 = dma.done.wait [#allocation6], 4096  }
  0x44   :  { %3512 = vsyncadd [#allocation6], 4294963200 }
  0x45   :  { %3513 = dma.done.wait [#allocation9], 20480  }
  0x46   :  { %3514 = vsyncadd [#allocation9], 4294946816  ;;  %v5124_v0 = vmov 0   ;;  %v74_v1 = vld [vmem:[#allocation8] sm:$0xff]  ;;  %v75_v3 = vld [vmem:[#allocation8 + $0x8] sm:$0xff]  ;;  %s70_s4 = sld [smem:[#allocation4]] }
  0x47   :  { %874 = vmatprep.mubr.bf16.mxu0 %v5124_v0  ;;  %915 = vmatprep.mubr.bf16.mxu1 %v5124_v0  ;;  %v78_v2 = vld [vmem:[#allocation8 + $0x20] sm:$0xff]  ;;  %v79_v5 = vld [vmem:[#allocation8 + $0x28] sm:$0xff]  ;;  %p1085_p1 = scmp.gt.s32.totalorder %s5117_s0, 0  ;;  %s3242_s19 = sld [smem:[#allocation4 + $0x1]]  ;;  %vm3066_vm8 = vcmask 1040384  }
  0x48   :  { %v3604_v4 = vcombine.high %v74_v1, %v78_v2  ;;  %v3606_v6 = vcombine.low %v74_v1, %v78_v2  ;;  %v82_v7 = vld [vmem:[#allocation8 + $0x40] sm:$0xff]  ;;  %v3608_v9 = vcombine.high %v75_v3, %v79_v5  ;;  %v3610_v10 = vcombine.low %v75_v3, %v79_v5  ;;  %v83_v12 = vld [vmem:[#allocation8 + $0x48] sm:$0xff]  ;;  %p1351_p2 = scmp.gt.s32.totalorder %s5117_s0, 1  ;;  %s3245_s3 = sld [smem:[#allocation4 + $0x2]] }
  0x49   :  { %v86_v8 = vld [vmem:[#allocation8 + $0x60] sm:$0xff]  ;;  %v87_v13 = vld [vmem:[#allocation8 + $0x68] sm:$0xff]  ;;  %s1086_s18 = scalar_select %p1085_p1, 1, 0 }
  0x4a   :  { %5393 = vst [vmem:[#allocation16_spill] sm:$0xff] %v3604_v4  ;;  %5394 = vst [vmem:[#allocation17_spill] sm:$0xff] %v3606_v6  ;;  %v3612_v11 = vcombine.high %v82_v7, %v86_v8  ;;  %v90_v14 = vld [vmem:[#allocation8 + $0x80] sm:$0xff]  ;;  %842 = vmatprep.subr.bf16.mxu0 %v3604_v4  ;;  %v3615_v15 = vcombine.high %v83_v12, %v87_v13  ;;  %v91_v17 = vld [vmem:[#allocation8 + $0x88] sm:$0xff]  ;;  %883 = vmatprep.subr.bf16.mxu1 %v3608_v9  ;;  %s1352_s24 = scalar_select %p1351_p2, 1, 0 }
  0x4b   :  { %5395 = vst [vmem:[#allocation18_spill] sm:$0xff] %v3608_v9  ;;  %5396 = vst [vmem:[#allocation19_spill] sm:$0xff] %v3610_v10  ;;  %v94_v16 = vld [vmem:[#allocation8 + $0xa0] sm:$0xff]  ;;  %v95_v18 = vld [vmem:[#allocation8 + $0xa8] sm:$0xff]  ;;  %843 = vmatpush1.bf16.msra.mxu0 %v3606_v6  ;;  %v3619_v19 = vcombine.low %v82_v7, %v86_v8  ;;  %884 = vmatpush1.bf16.msra.mxu1 %v3610_v10  ;;  %v3623_v20 = vcombine.low %v83_v12, %v87_v13  ;;  %p1617_p3 = scmp.gt.s32.totalorder %s5117_s0, 2  ;;  %s3248_s29 = sld [smem:[#allocation4 + $0x3]] }
  0x4c   :  { %5397 = vst [vmem:[#allocation20_spill] sm:$0xff] %v3612_v11  ;;  %5398 = vst [vmem:[#allocation21_spill] sm:$0xff] %v3615_v15  ;;  %844 = vmatprep.subr.bf16.mxu0 %v3612_v11  ;;  %v3625_v21 = vcombine.high %v90_v14, %v94_v16  ;;  %885 = vmatprep.subr.bf16.mxu1 %v3615_v15  ;;  %v3628_v22 = vcombine.high %v91_v17, %v95_v18  ;;  %v98_v23 = vld [vmem:[#allocation8 + $0xc0] sm:$0xff]  ;;  %v99_v25 = vld [vmem:[#allocation8 + $0xc8] sm:$0xff]  ;;  %s3112_s14 = sshll.u32 %s70_s4, 3  ;;  %p1883_p4 = scmp.gt.s32.totalorder %s5117_s0, 3 }
  0x4d   :  { %5399 = vst [vmem:[#allocation22_spill] sm:$0xff] %v3619_v19  ;;  %5400 = vst [vmem:[#allocation23_spill] sm:$0xff] %v3623_v20  ;;  %v102_v24 = vld [vmem:[#allocation8 + $0xe0] sm:$0xff]  ;;  %v103_v26 = vld [vmem:[#allocation8 + $0xe8] sm:$0xff]  ;;  %v3631_v27 = vcombine.low %v90_v14, %v94_v16  ;;  %v3635_v28 = vcombine.low %v91_v17, %v95_v18  ;;  %s72_s15 = scalar_lea.vmem [#allocation5], %s3112_s14  ;;  %s3243_s20 = sshll.u32 %s3242_s19, 3 }
  0x4e   :  { %5401 = vst [vmem:[#allocation24_spill] sm:$0xff] %v3625_v21  ;;  %5402 = vst [vmem:[#allocation25_spill] sm:$0xff] %v3628_v22  ;;  %v3637_v29 = vcombine.high %v98_v23, %v102_v24  ;;  %v3640_v30 = vcombine.high %v99_v25, %v103_v26  ;;  %v106_v31 = vld [vmem:[#allocation8 + $0x100] sm:$0xff]  ;;  %v107_v33 = vld [vmem:[#allocation8 + $0x108] sm:$0xff]  ;;  %v3643_v35 = vcombine.low %v98_v23, %v102_v24  ;;  %s1093_s21 = scalar_lea.vmem [#allocation5], %s3243_s20  ;;  %s3246_s25 = sshll.u32 %s3245_s3, 3 }
  0x4f   :  { %845 = vmatpush1.bf16.msra.mxu0 %v3619_v19  ;;  %5403 = vst [vmem:[#allocation26_spill] sm:$0xff] %v3631_v27  ;;  %886 = vmatpush1.bf16.msra.mxu1 %v3623_v20  ;;  %5404 = vst [vmem:[#allocation27_spill] sm:$0xff] %v3635_v28  ;;  %v110_v32 = vld [vmem:[#allocation8 + $0x120] sm:$0xff]  ;;  %v111_v34 = vld [vmem:[#allocation8 + $0x128] sm:$0xff]  ;;  %v3647_v36 = vcombine.low %v99_v25, %v103_v26  ;;  %s1359_s26 = scalar_lea.vmem [#allocation5], %s3246_s25  ;;  %s3251_s11 = sld [smem:[#allocation4 + $0x4]] }
  0x50   :  { %846 = vmatprep.subr.bf16.mxu0 %v3625_v21  ;;  %5405 = vst [vmem:[#allocation28_spill] sm:$0xff] %v3637_v29  ;;  %887 = vmatprep.subr.bf16.mxu1 %v3628_v22  ;;  %5406 = vst [vmem:[#allocation29_spill] sm:$0xff] %v3640_v30  ;;  %v3649_v37 = vcombine.high %v106_v31, %v110_v32  ;;  %v3652_v38 = vcombine.high %v107_v33, %v111_v34  ;;  %v114_v39 = vld [vmem:[#allocation8 + $0x140] sm:$0xff]  ;;  %v115_v41 = vld [vmem:[#allocation8 + $0x148] sm:$0xff]  ;;  %s1618_s28 = scalar_select %p1617_p3, 1, 0 }
  0x51   :  { %5407 = vst [vmem:[#allocation30_spill] sm:$0xff] %v3643_v35  ;;  %5408 = vst [vmem:[#allocation31_spill] sm:$0xff] %v3647_v36  ;;  %v118_v40 = vld [vmem:[#allocation8 + $0x160] sm:$0xff]  ;;  %v119_v42 = vld [vmem:[#allocation8 + $0x168] sm:$0xff]  ;;  %v3655_v43 = vcombine.low %v106_v31, %v110_v32  ;;  %v3659_v44 = vcombine.low %v107_v33, %v111_v34  ;;  %s3249_s30 = sshll.u32 %s3248_s29, 3  ;;  %p2149_p5 = scmp.gt.s32.totalorder %s5117_s0, 4 }
  0x52   :  { %5409 = vst [vmem:[#allocation32_spill] sm:$0xff] %v3649_v37  ;;  %5410 = vst [vmem:[#allocation33_spill] sm:$0xff] %v3652_v38  ;;  %v3661_v45 = vcombine.high %v114_v39, %v118_v40  ;;  %v3664_v46 = vcombine.high %v115_v41, %v119_v42  ;;  %v122_v47 = vld [vmem:[#allocation8 + $0x180] sm:$0xff]  ;;  %v123_v49 = vld [vmem:[#allocation8 + $0x188] sm:$0xff]  ;;  %v3667_v51 = vcombine.low %v114_v39, %v118_v40  ;;  %s1625_s7 = scalar_lea.vmem [#allocation5], %s3249_s30  ;;  %p2415_p6 = scmp.gt.s32.totalorder %s5117_s0, 5 }
  0x53   :  { %847 = vmatpush1.bf16.msra.mxu0 %v3631_v27  ;;  %888 = vmatpush1.bf16.msra.mxu1 %v3635_v28  ;;  %5411 = vst [vmem:[#allocation34_spill] sm:$0xff] %v3655_v43  ;;  %5412 = vst [vmem:[#allocation35_spill] sm:$0xff] %v3659_v44  ;;  %v126_v48 = vld [vmem:[#allocation8 + $0x1a0] sm:$0xff]  ;;  %v127_v50 = vld [vmem:[#allocation8 + $0x1a8] sm:$0xff]  ;;  %v3671_v52 = vcombine.low %v115_v41, %v119_v42  ;;  %s1884_s10 = scalar_select %p1883_p4, 1, 0 }
  0x54   :  { %848 = vmatprep.subr.bf16.mxu0 %v3637_v29  ;;  %889 = vmatprep.subr.bf16.mxu1 %v3640_v30  ;;  %5413 = vst [vmem:[#allocation36_spill] sm:$0xff] %v3661_v45  ;;  %5414 = vst [vmem:[#allocation37_spill] sm:$0xff] %v3664_v46  ;;  %v3673_v53 = vcombine.high %v122_v47, %v126_v48  ;;  %v3676_v54 = vcombine.high %v123_v49, %v127_v50  ;;  %v130_v55 = vld [vmem:[#allocation8 + $0x1c0] sm:$0xff]  ;;  %v131_v57 = vld [vmem:[#allocation8 + $0x1c8] sm:$0xff]  ;;  %s2150_s14 = scalar_select %p2149_p5, 1, 0 }
  0x55   :  { %5415 = vst [vmem:[#allocation38_spill] sm:$0xff] %v3667_v51  ;;  %5416 = vst [vmem:[#allocation39_spill] sm:$0xff] %v3671_v52  ;;  %v134_v56 = vld [vmem:[#allocation8 + $0x1e0] sm:$0xff]  ;;  %v135_v58 = vld [vmem:[#allocation8 + $0x1e8] sm:$0xff]  ;;  %v3679_v59 = vcombine.low %v122_v47, %v126_v48  ;;  %v3683_v60 = vcombine.low %v123_v49, %v127_v50  ;;  %s3252_s12 = sshll.u32 %s3251_s11, 3  ;;  %p2681_p7 = scmp.gt.s32.totalorder %s5117_s0, 6 }
  0x56   :  { %5417 = vst [vmem:[#allocation40_spill] sm:$0xff] %v3673_v53  ;;  %5418 = vst [vmem:[#allocation41_spill] sm:$0xff] %v3676_v54  ;;  %v3685_v61 = vcombine.high %v130_v55, %v134_v56  ;;  %v3688_v62 = vcombine.high %v131_v57, %v135_v58  ;;  %v138_v63 = vld [vmem:[#allocation8 + $0x200] sm:$0xff]  ;;  %v139_v2 = vld [vmem:[#allocation8 + $0x208] sm:$0xff]  ;;  %v3691_v5 = vcombine.low %v130_v55, %v134_v56  ;;  %s1891_s2 = scalar_lea.vmem [#allocation5], %s3252_s12  ;;  %p2947_p8 = scmp.gt.s32.totalorder %s5117_s0, 7 }
  0x57   :  { %849 = vmatpush1.bf16.msra.mxu0 %v3643_v35  ;;  %890 = vmatpush1.bf16.msra.mxu1 %v3647_v36  ;;  %5419 = vst [vmem:[#allocation42_spill] sm:$0xff] %v3679_v59  ;;  %5420 = vst [vmem:[#allocation43_spill] sm:$0xff] %v3683_v60  ;;  %v142_v1 = vld [vmem:[#allocation8 + $0x220] sm:$0xff]  ;;  %v143_v3 = vld [vmem:[#allocation8 + $0x228] sm:$0xff]  ;;  %v3695_v7 = vcombine.low %v131_v57, %v135_v58  ;;  %s2416_s20 = scalar_select %p2415_p6, 1, 0 }
  0x58   :  { %850 = vmatprep.subr.bf16.mxu0 %v3649_v37  ;;  %891 = vmatprep.subr.bf16.mxu1 %v3652_v38  ;;  %5421 = vst [vmem:[#allocation44_spill] sm:$0xff] %v3685_v61  ;;  %5422 = vst [vmem:[#allocation45_spill] sm:$0xff] %v3688_v62  ;;  %v3697_v8 = vcombine.high %v138_v63, %v142_v1  ;;  %v3700_v12 = vcombine.high %v139_v2, %v143_v3  ;;  %v146_v13 = vld [vmem:[#allocation8 + $0x240] sm:$0xff]  ;;  %v147_v16 = vld [vmem:[#allocation8 + $0x248] sm:$0xff]  ;;  %s2682_s25 = scalar_select %p2681_p7, 1, 0 }
  0x59   :  { %5423 = vst [vmem:[#allocation46_spill] sm:$0xff] %v3691_v5  ;;  %5424 = vst [vmem:[#allocation47_spill] sm:$0xff] %v3695_v7  ;;  %v150_v14 = vld [vmem:[#allocation8 + $0x260] sm:$0xff]  ;;  %v151_v17 = vld [vmem:[#allocation8 + $0x268] sm:$0xff]  ;;  %v3703_v18 = vcombine.low %v138_v63, %v142_v1  ;;  %v3707_v23 = vcombine.low %v139_v2, %v143_v3  ;;  %s2948_s30 = scalar_select %p2947_p8, 1, 0 }
  0x5a   :  { %5425 = vst [vmem:[#allocation48_spill] sm:$0xff] %v3697_v8  ;;  %5426 = vst [vmem:[#allocation49_spill] sm:$0xff] %v3700_v12  ;;  %v3709_v24 = vcombine.high %v146_v13, %v150_v14  ;;  %v3712_v25 = vcombine.high %v147_v16, %v151_v17  ;;  %v154_v26 = vld [vmem:[#allocation8 + $0x280] sm:$0xff]  ;;  %v155_v32 = vld [vmem:[#allocation8 + $0x288] sm:$0xff]  ;;  %v3715_v34 = vcombine.low %v146_v13, %v150_v14  ;;  %s3527_s0 = smov [#allocation11]  }
  0x5b   :  { %851 = vmatpush1.bf16.msra.mxu0 %v3655_v43  ;;  %892 = vmatpush1.bf16.msra.mxu1 %v3659_v44  ;;  %5427 = vst [vmem:[#allocation50_spill] sm:$0xff] %v3703_v18  ;;  %5428 = vst [vmem:[#allocation51_spill] sm:$0xff] %v3707_v23  ;;  %v158_v31 = vld [vmem:[#allocation8 + $0x2a0] sm:$0xff]  ;;  %v159_v33 = vld [vmem:[#allocation8 + $0x2a8] sm:$0xff]  ;;  %v3719_v39 = vcombine.low %v147_v16, %v151_v17  ;;  %s3086_s9 = sshll.u32 %s3527_s0, 4  ;;  %s3087_s9 = int_to_ptr.vmem [resolvable:$true] %s3086_s9 }
  0x5c   :  { %852 = vmatprep.subr.bf16.mxu0 %v3661_v45  ;;  %893 = vmatprep.subr.bf16.mxu1 %v3664_v46  ;;  %5429 = vst [vmem:[#allocation52_spill] sm:$0xff] %v3709_v24  ;;  %5430 = vst [vmem:[#allocation53_spill] sm:$0xff] %v3712_v25  ;;  %v3721_v40 = vcombine.high %v154_v26, %v158_v31  ;;  %v3724_v41 = vcombine.high %v155_v32, %v159_v33  ;;  %v162_v42 = vld [vmem:[#allocation8 + $0x2c0] sm:$0xff]  ;;  %v163_v48 = vld [vmem:[#allocation8 + $0x2c8] sm:$0xff]  ;;  %p3492_p10 = scmp.lt.s32.totalorder %s3087_s9, %s3087_s9 }
  0x5d   :  { %5431 = vst [vmem:[#allocation54_spill] sm:$0xff] %v3715_v34  ;;  %5432 = vst [vmem:[#allocation55_spill] sm:$0xff] %v3719_v39  ;;  %v166_v47 = vld [vmem:[#allocation8 + $0x2e0] sm:$0xff]  ;;  %v167_v49 = vld [vmem:[#allocation8 + $0x2e8] sm:$0xff]  ;;  %v3727_v50 = vcombine.low %v154_v26, %v158_v31  ;;  %v3731_v55 = vcombine.low %v155_v32, %v159_v33 }
  0x5e   :  { %5433 = vst [vmem:[#allocation56_spill] sm:$0xff] %v3721_v40  ;;  %5434 = vst [vmem:[#allocation57_spill] sm:$0xff] %v3724_v41  ;;  %v3733_v56 = vcombine.high %v162_v42, %v166_v47  ;;  %v3736_v57 = vcombine.high %v163_v48, %v167_v49  ;;  %v170_v58 = vld [vmem:[#allocation8 + $0x300] sm:$0xff]  ;;  %v171_v1 = vld [vmem:[#allocation8 + $0x308] sm:$0xff]  ;;  %v3739_v3 = vcombine.low %v162_v42, %v166_v47 }
  0x5f   :  { %853 = vmatpush1.bf16.msra.mxu0 %v3667_v51  ;;  %894 = vmatpush1.bf16.msra.mxu1 %v3671_v52  ;;  %5435 = vst [vmem:[#allocation58_spill] sm:$0xff] %v3727_v50  ;;  %5436 = vst [vmem:[#allocation59_spill] sm:$0xff] %v3731_v55  ;;  %v174_v63 = vld [vmem:[#allocation8 + $0x320] sm:$0xff]  ;;  %v175_v2 = vld [vmem:[#allocation8 + $0x328] sm:$0xff]  ;;  %v3743_v13 = vcombine.low %v163_v48, %v167_v49 }
  0x60   :  { %854 = vmatprep.subr.bf16.mxu0 %v3673_v53  ;;  %895 = vmatprep.subr.bf16.mxu1 %v3676_v54  ;;  %5437 = vst [vmem:[#allocation60_spill] sm:$0xff] %v3733_v56  ;;  %5438 = vst [vmem:[#allocation61_spill] sm:$0xff] %v3736_v57  ;;  %v3745_v14 = vcombine.high %v170_v58, %v174_v63  ;;  %v3748_v16 = vcombine.high %v171_v1, %v175_v2  ;;  %v178_v17 = vld [vmem:[#allocation8 + $0x340] sm:$0xff]  ;;  %v179_v31 = vld [vmem:[#allocation8 + $0x348] sm:$0xff] }
  0x61   :  { %5439 = vst [vmem:[#allocation62_spill] sm:$0xff] %v3739_v3  ;;  %5440 = vst [vmem:[#allocation63_spill] sm:$0xff] %v3743_v13  ;;  %v182_v26 = vld [vmem:[#allocation8 + $0x360] sm:$0xff]  ;;  %v183_v32 = vld [vmem:[#allocation8 + $0x368] sm:$0xff]  ;;  %v3751_v33 = vcombine.low %v170_v58, %v174_v63  ;;  %v3755_v42 = vcombine.low %v171_v1, %v175_v2 }
  0x62   :  { %5441 = vst [vmem:[#allocation64_spill] sm:$0xff] %v3745_v14  ;;  %5442 = vst [vmem:[#allocation65_spill] sm:$0xff] %v3748_v16  ;;  %v3757_v47 = vcombine.high %v178_v17, %v182_v26  ;;  %v3760_v48 = vcombine.high %v179_v31, %v183_v32  ;;  %v186_v49 = vld [vmem:[#allocation8 + $0x380] sm:$0xff]  ;;  %v3763_v58 = vcombine.low %v178_v17, %v182_v26 }
  0x63   :  { %855 = vmatpush1.bf16.msra.mxu0 %v3679_v59  ;;  %896 = vmatpush1.bf16.msra.mxu1 %v3683_v60  ;;  %5443 = vst [vmem:[#allocation66_spill] sm:$0xff] %v3751_v33  ;;  %5444 = vst [vmem:[#allocation67_spill] sm:$0xff] %v3755_v42  ;;  %v190_v0 = vld [vmem:[#allocation8 + $0x3a0] sm:$0xff]  ;;  %v3767_v63 = vcombine.low %v179_v31, %v183_v32 }
  0x64   :  { %856 = vmatprep.subr.bf16.mxu0 %v3685_v61  ;;  %897 = vmatprep.subr.bf16.mxu1 %v3688_v62  ;;  %5445 = vst [vmem:[#allocation68_spill] sm:$0xff] %v3757_v47  ;;  %5446 = vst [vmem:[#allocation69_spill] sm:$0xff] %v3760_v48  ;;  %v3769_v1 = vcombine.high %v186_v49, %v190_v0  ;;  %v3775_v17 = vcombine.low %v186_v49, %v190_v0 }
  0x65   :  { %5447 = vst [vmem:[#allocation70_spill] sm:$0xff] %v3763_v58  ;;  %5448 = vst [vmem:[#allocation71_spill] sm:$0xff] %v3767_v63 }
  0x66   :  { %5449 = vst [vmem:[#allocation72_spill] sm:$0xff] %v3769_v1  ;;  %5451 = vst [vmem:[#allocation74_spill] sm:$0xff] %v3775_v17 }
  0x67   :  { %857 = vmatpush1.bf16.msra.mxu0 %v3691_v5  ;;  %898 = vmatpush1.bf16.msra.mxu1 %v3695_v7 }
  0x68   :  { %858 = vmatprep.subr.bf16.mxu0 %v3697_v8  ;;  %899 = vmatprep.subr.bf16.mxu1 %v3700_v12 }
  0x6b   :  { %859 = vmatpush1.bf16.msra.mxu0 %v3703_v18  ;;  %900 = vmatpush1.bf16.msra.mxu1 %v3707_v23 }
  0x6c   :  { %860 = vmatprep.subr.bf16.mxu0 %v3709_v24  ;;  %901 = vmatprep.subr.bf16.mxu1 %v3712_v25 }
  0x6f   :  { %861 = vmatpush1.bf16.msra.mxu0 %v3715_v34  ;;  %902 = vmatpush1.bf16.msra.mxu1 %v3719_v39 }
  0x70   :  { %862 = vmatprep.subr.bf16.mxu0 %v3721_v40  ;;  %903 = vmatprep.subr.bf16.mxu1 %v3724_v41 }
  0x73   :  { %863 = vmatpush1.bf16.msra.mxu0 %v3727_v50  ;;  %904 = vmatpush1.bf16.msra.mxu1 %v3731_v55  ;;  %v113_v55 = vld [vmem:[#allocation8 + $0x138] sm:$0xff] }
  0x74   :  { %864 = vmatprep.subr.bf16.mxu0 %v3733_v56  ;;  %905 = vmatprep.subr.bf16.mxu1 %v3736_v57  ;;  %v187_v57 = vld [vmem:[#allocation8 + $0x388] sm:$0xff] }
  0x75   :  { %v191_v56 = vld [vmem:[#allocation8 + $0x3a8] sm:$0xff] }
  0x76   :  { %v3772_v2 = vcombine.high %v187_v57, %v191_v56  ;;  %v3779_v26 = vcombine.low %v187_v57, %v191_v56 }
  0x77   :  { %865 = vmatpush1.bf16.msra.mxu0 %v3739_v3  ;;  %906 = vmatpush1.bf16.msra.mxu1 %v3743_v13  ;;  %v195_v13 = vld [vmem:[#allocation8 + $0x3c8] sm:$0xff] }
  0x78   :  { %866 = vmatprep.subr.bf16.mxu0 %v3745_v14  ;;  %907 = vmatprep.subr.bf16.mxu1 %v3748_v16  ;;  %5450 = vst [vmem:[#allocation73_spill] sm:$0xff] %v3772_v2  ;;  %v194_v16 = vld [vmem:[#allocation8 + $0x3c0] sm:$0xff]  ;;  %v199_v3 = vld [vmem:[#allocation8 + $0x3e8] sm:$0xff]  ;;  %5452 = vst [vmem:[#allocation75_spill] sm:$0xff] %v3779_v26 }
  0x79   :  { %v198_v14 = vld [vmem:[#allocation8 + $0x3e0] sm:$0xff]  ;;  %v3784_v32 = vcombine.high %v195_v13, %v199_v3  ;;  %v3791_v56 = vcombine.low %v195_v13, %v199_v3 }
  0x7a   :  { %v3781_v31 = vcombine.high %v194_v16, %v198_v14  ;;  %v3787_v0 = vcombine.low %v194_v16, %v198_v14 }
  0x7b   :  { %867 = vmatpush1.bf16.msra.mxu0 %v3751_v33  ;;  %908 = vmatpush1.bf16.msra.mxu1 %v3755_v42  ;;  %5454 = vst [vmem:[#allocation77_spill] sm:$0xff] %v3784_v32  ;;  %v77_v42 = vld [vmem:[#allocation8 + $0x18] sm:$0xff]  ;;  %5456 = vst [vmem:[#allocation79_spill] sm:$0xff] %v3791_v56 }
  0x7c   :  { %868 = vmatprep.subr.bf16.mxu0 %v3757_v47  ;;  %909 = vmatprep.subr.bf16.mxu1 %v3760_v48  ;;  %5453 = vst [vmem:[#allocation76_spill] sm:$0xff] %v3781_v31  ;;  %v76_v48 = vld [vmem:[#allocation8 + $0x10] sm:$0xff]  ;;  %v81_v33 = vld [vmem:[#allocation8 + $0x38] sm:$0xff]  ;;  %5455 = vst [vmem:[#allocation78_spill] sm:$0xff] %v3787_v0 }
  0x7d   :  { %v80_v47 = vld [vmem:[#allocation8 + $0x30] sm:$0xff]  ;;  %v3796_v49 = vcombine.high %v77_v42, %v81_v33  ;;  %v3803_v3 = vcombine.low %v77_v42, %v81_v33 }
  0x7e   :  { %v3793_v57 = vcombine.high %v76_v48, %v80_v47  ;;  %v3799_v14 = vcombine.low %v76_v48, %v80_v47 }
  0x7f   :  { %869 = vmatpush1.bf16.msra.mxu0 %v3763_v58  ;;  %910 = vmatpush1.bf16.msra.mxu1 %v3767_v63  ;;  %5458 = vst [vmem:[#allocation81_spill] sm:$0xff] %v3796_v49  ;;  %v85_v63 = vld [vmem:[#allocation8 + $0x58] sm:$0xff]  ;;  %5460 = vst [vmem:[#allocation83_spill] sm:$0xff] %v3803_v3 }
  0x80   :  { %870 = vmatprep.subr.bf16.mxu0 %v3769_v1  ;;  %911 = vmatprep.subr.bf16.mxu1 %v3772_v2  ;;  %5457 = vst [vmem:[#allocation80_spill] sm:$0xff] %v3793_v57  ;;  %v84_v2 = vld [vmem:[#allocation8 + $0x50] sm:$0xff]  ;;  %v89_v58 = vld [vmem:[#allocation8 + $0x78] sm:$0xff]  ;;  %5459 = vst [vmem:[#allocation82_spill] sm:$0xff] %v3799_v14 }
  0x81   :  { %v88_v1 = vld [vmem:[#allocation8 + $0x70] sm:$0xff]  ;;  %v3808_v16 = vcombine.high %v85_v63, %v89_v58  ;;  %v3817_v33 = vcombine.low %v85_v63, %v89_v58 }
  0x82   :  { %v3805_v13 = vcombine.high %v84_v2, %v88_v1  ;;  %v3813_v47 = vcombine.low %v84_v2, %v88_v1 }
  0x83   :  { %871 = vmatpush1.bf16.msra.mxu0 %v3775_v17  ;;  %912 = vmatpush1.bf16.msra.mxu1 %v3779_v26  ;;  %5462 = vst [vmem:[#allocation85_spill] sm:$0xff] %v3808_v16  ;;  %v5463_v26 = vmov 0   ;;  %v93_v17 = vld [vmem:[#allocation8 + $0x98] sm:$0xff]  ;;  %5465 = vst [vmem:[#allocation87_spill] sm:$0xff] %v3817_v33 }
  0x84   :  { %872 = vmatprep.subr.bf16.mxu0 %v3781_v31  ;;  %913 = vmatprep.subr.bf16.mxu1 %v3784_v32  ;;  %5461 = vst [vmem:[#allocation84_spill] sm:$0xff] %v3805_v13  ;;  %v92_v32 = vld [vmem:[#allocation8 + $0x90] sm:$0xff]  ;;  %5464 = vst [vmem:[#allocation86_spill] sm:$0xff] %v3813_v47 }
  0x85   :  { %v96_v31 = vld [vmem:[#allocation8 + $0xb0] sm:$0xff] }
  0x86   :  { %v3819_v42 = vcombine.high %v92_v32, %v96_v31  ;;  %v3827_v1 = vcombine.low %v92_v32, %v96_v31 }
  0x87   :  { %873 = vmatpush1.bf16.msra.mxu0 %v3787_v0  ;;  %914 = vmatpush1.bf16.msra.mxu1 %v3791_v56  ;;  %v97_v0 = vld [vmem:[#allocation8 + $0xb8] sm:$0xff] }
  0x88   :  { %924 = vmatprep.subr.bf16.mxu0 %v3793_v57  ;;  %965 = vmatprep.subr.bf16.mxu1 %v3796_v49  ;;  %5466 = vst [vmem:[#allocation88_spill] sm:$0xff] %v3819_v42  ;;  %v3822_v48 = vcombine.high %v93_v17, %v97_v0  ;;  %v100_v49 = vld [vmem:[#allocation8 + $0xd0] sm:$0xff]  ;;  %v101_v56 = vld [vmem:[#allocation8 + $0xd8] sm:$0xff]  ;;  %5468 = vst [vmem:[#allocation90_spill] sm:$0xff] %v3827_v1  ;;  %v3831_v58 = vcombine.low %v93_v17, %v97_v0 }
  0x89   :  { %v104_v57 = vld [vmem:[#allocation8 + $0xf0] sm:$0xff] }
  0x8a   :  { %875 = vmatmul.mubr.bf16.vlgmr.msra.gmra.mrb[0].mxu0 %v5463_v26  ;;  %916 = vmatmul.mubr.bf16.vlgmr.msra.gmra.mrb[0].mxu1 %v5463_v26  ;;  %5467 = vst [vmem:[#allocation89_spill] sm:$0xff] %v3822_v48  ;;  %5469 = vst [vmem:[#allocation91_spill] sm:$0xff] %v3831_v58  ;;  %v3833_v63 = vcombine.high %v100_v49, %v104_v57  ;;  %v3839_v31 = vcombine.low %v100_v49, %v104_v57 }
  0x8b   :  { %925 = vmatpush1.bf16.msra.mxu0 %v3799_v14  ;;  %966 = vmatpush1.bf16.msra.mxu1 %v3803_v3  ;;  %v105_v14 = vld [vmem:[#allocation8 + $0xf8] sm:$0xff] }
  0x8c   :  { %926 = vmatprep.subr.bf16.mxu0 %v3805_v13  ;;  %967 = vmatprep.subr.bf16.mxu1 %v3808_v16  ;;  %5470 = vst [vmem:[#allocation92_spill] sm:$0xff] %v3833_v63  ;;  %v3836_v2 = vcombine.high %v101_v56, %v105_v14  ;;  %v108_v16 = vld [vmem:[#allocation8 + $0x110] sm:$0xff]  ;;  %v109_v3 = vld [vmem:[#allocation8 + $0x118] sm:$0xff]  ;;  %5472 = vst [vmem:[#allocation94_spill] sm:$0xff] %v3839_v31  ;;  %v3843_v17 = vcombine.low %v101_v56, %v105_v14 }
  0x8d   :  { %956 = vmatprep.mubr.bf16.mxu0 %v5463_v26  ;;  %997 = vmatprep.mubr.bf16.mxu1 %v5463_v26  ;;  %v112_v13 = vld [vmem:[#allocation8 + $0x130] sm:$0xff]  ;;  %v3848_v0 = vcombine.high %v109_v3, %v113_v55  ;;  %v3855_v56 = vcombine.low %v109_v3, %v113_v55 }
  0x8e   :  { %5471 = vst [vmem:[#allocation93_spill] sm:$0xff] %v3836_v2  ;;  %5473 = vst [vmem:[#allocation95_spill] sm:$0xff] %v3843_v17  ;;  %v3845_v32 = vcombine.high %v108_v16, %v112_v13  ;;  %v3851_v57 = vcombine.low %v108_v16, %v112_v13 }
  0x8f   :  { %927 = vmatpush1.bf16.msra.mxu0 %v3813_v47  ;;  %968 = vmatpush1.bf16.msra.mxu1 %v3817_v33  ;;  %5475 = vst [vmem:[#allocation97_spill] sm:$0xff] %v3848_v0  ;;  %v117_v33 = vld [vmem:[#allocation8 + $0x158] sm:$0xff]  ;;  %5477 = vst [vmem:[#allocation99_spill] sm:$0xff] %v3855_v56 }
  0x90   :  { %928 = vmatprep.subr.bf16.mxu0 %v3819_v42  ;;  %969 = vmatprep.subr.bf16.mxu1 %v3822_v48  ;;  %5474 = vst [vmem:[#allocation96_spill] sm:$0xff] %v3845_v32  ;;  %v116_v48 = vld [vmem:[#allocation8 + $0x150] sm:$0xff]  ;;  %v121_v47 = vld [vmem:[#allocation8 + $0x178] sm:$0xff]  ;;  %5476 = vst [vmem:[#allocation98_spill] sm:$0xff] %v3851_v57 }
  0x91   :  { %v120_v42 = vld [vmem:[#allocation8 + $0x170] sm:$0xff]  ;;  %v3860_v14 = vcombine.high %v117_v33, %v121_v47  ;;  %v3867_v55 = vcombine.low %v117_v33, %v121_v47 }
  0x92   :  { %v3857_v49 = vcombine.high %v116_v48, %v120_v42  ;;  %v3863_v13 = vcombine.low %v116_v48, %v120_v42 }
  0x93   :  { %929 = vmatpush1.bf16.msra.mxu0 %v3827_v1  ;;  %970 = vmatpush1.bf16.msra.mxu1 %v3831_v58  ;;  %5479 = vst [vmem:[#allocation101_spill] sm:$0xff] %v3860_v14  ;;  %v125_v58 = vld [vmem:[#allocation8 + $0x198] sm:$0xff]  ;;  %5481 = vst [vmem:[#allocation103_spill] sm:$0xff] %v3867_v55 }
  0x94   :  { %930 = vmatprep.subr.bf16.mxu0 %v3833_v63  ;;  %971 = vmatprep.subr.bf16.mxu1 %v3836_v2  ;;  %5478 = vst [vmem:[#allocation100_spill] sm:$0xff] %v3857_v49  ;;  %v124_v2 = vld [vmem:[#allocation8 + $0x190] sm:$0xff]  ;;  %v129_v1 = vld [vmem:[#allocation8 + $0x1b8] sm:$0xff]  ;;  %5480 = vst [vmem:[#allocation102_spill] sm:$0xff] %v3863_v13 }
  0x95   :  { %v128_v63 = vld [vmem:[#allocation8 + $0x1b0] sm:$0xff]  ;;  %v3872_v16 = vcombine.high %v125_v58, %v129_v1  ;;  %v3879_v47 = vcombine.low %v125_v58, %v129_v1 }
  0x96   :  { %v3869_v3 = vcombine.high %v124_v2, %v128_v63  ;;  %v3875_v42 = vcombine.low %v124_v2, %v128_v63 }
  0x97   :  { %931 = vmatpush1.bf16.msra.mxu0 %v3839_v31  ;;  %972 = vmatpush1.bf16.msra.mxu1 %v3843_v17  ;;  %5483 = vst [vmem:[#allocation105_spill] sm:$0xff] %v3872_v16  ;;  %v133_v17 = vld [vmem:[#allocation8 + $0x1d8] sm:$0xff]  ;;  %5485 = vst [vmem:[#allocation107_spill] sm:$0xff] %v3879_v47 }
  0x98   :  { %932 = vmatprep.subr.bf16.mxu0 %v3845_v32  ;;  %973 = vmatprep.subr.bf16.mxu1 %v3848_v0  ;;  %5482 = vst [vmem:[#allocation104_spill] sm:$0xff] %v3869_v3  ;;  %v132_v0 = vld [vmem:[#allocation8 + $0x1d0] sm:$0xff]  ;;  %v137_v31 = vld [vmem:[#allocation8 + $0x1f8] sm:$0xff]  ;;  %5484 = vst [vmem:[#allocation106_spill] sm:$0xff] %v3875_v42 }
  0x99   :  { %v136_v32 = vld [vmem:[#allocation8 + $0x1f0] sm:$0xff]  ;;  %v3884_v48 = vcombine.high %v133_v17, %v137_v31  ;;  %v3891_v1 = vcombine.low %v133_v17, %v137_v31 }
  0x9a   :  { %v3881_v33 = vcombine.high %v132_v0, %v136_v32  ;;  %v3887_v63 = vcombine.low %v132_v0, %v136_v32 }
  0x9b   :  { %933 = vmatpush1.bf16.msra.mxu0 %v3851_v57  ;;  %974 = vmatpush1.bf16.msra.mxu1 %v3855_v56  ;;  %5487 = vst [vmem:[#allocation109_spill] sm:$0xff] %v3884_v48  ;;  %v141_v56 = vld [vmem:[#allocation8 + $0x218] sm:$0xff]  ;;  %5489 = vst [vmem:[#allocation111_spill] sm:$0xff] %v3891_v1 }
  0x9c   :  { %934 = vmatprep.subr.bf16.mxu0 %v3857_v49  ;;  %975 = vmatprep.subr.bf16.mxu1 %v3860_v14  ;;  %5486 = vst [vmem:[#allocation108_spill] sm:$0xff] %v3881_v33  ;;  %v140_v14 = vld [vmem:[#allocation8 + $0x210] sm:$0xff]  ;;  %v145_v57 = vld [vmem:[#allocation8 + $0x238] sm:$0xff]  ;;  %5488 = vst [vmem:[#allocation110_spill] sm:$0xff] %v3887_v63 }
  0x9d   :  { %v144_v49 = vld [vmem:[#allocation8 + $0x230] sm:$0xff]  ;;  %v3896_v2 = vcombine.high %v141_v56, %v145_v57  ;;  %v3903_v31 = vcombine.low %v141_v56, %v145_v57 }
  0x9e   :  { %v3893_v58 = vcombine.high %v140_v14, %v144_v49  ;;  %v3899_v32 = vcombine.low %v140_v14, %v144_v49 }
  0x9f   :  { %935 = vmatpush1.bf16.msra.mxu0 %v3863_v13  ;;  %976 = vmatpush1.bf16.msra.mxu1 %v3867_v55  ;;  %5491 = vst [vmem:[#allocation113_spill] sm:$0xff] %v3896_v2  ;;  %v149_v55 = vld [vmem:[#allocation8 + $0x258] sm:$0xff]  ;;  %5493 = vst [vmem:[#allocation115_spill] sm:$0xff] %v3903_v31 }
  0xa0   :  { %936 = vmatprep.subr.bf16.mxu0 %v3869_v3  ;;  %977 = vmatprep.subr.bf16.mxu1 %v3872_v16  ;;  %5490 = vst [vmem:[#allocation112_spill] sm:$0xff] %v3893_v58  ;;  %v148_v16 = vld [vmem:[#allocation8 + $0x250] sm:$0xff]  ;;  %v153_v13 = vld [vmem:[#allocation8 + $0x278] sm:$0xff]  ;;  %5492 = vst [vmem:[#allocation114_spill] sm:$0xff] %v3899_v32 }
  0xa1   :  { %v152_v3 = vld [vmem:[#allocation8 + $0x270] sm:$0xff]  ;;  %v3908_v0 = vcombine.high %v149_v55, %v153_v13  ;;  %v3915_v57 = vcombine.low %v149_v55, %v153_v13 }
  0xa2   :  { %v3905_v17 = vcombine.high %v148_v16, %v152_v3  ;;  %v3911_v49 = vcombine.low %v148_v16, %v152_v3 }
  0xa3   :  { %937 = vmatpush1.bf16.msra.mxu0 %v3875_v42  ;;  %978 = vmatpush1.bf16.msra.mxu1 %v3879_v47  ;;  %5495 = vst [vmem:[#allocation117_spill] sm:$0xff] %v3908_v0  ;;  %v157_v47 = vld [vmem:[#allocation8 + $0x298] sm:$0xff]  ;;  %5497 = vst [vmem:[#allocation119_spill] sm:$0xff] %v3915_v57 }
  0xa4   :  { %938 = vmatprep.subr.bf16.mxu0 %v3881_v33  ;;  %979 = vmatprep.subr.bf16.mxu1 %v3884_v48  ;;  %5494 = vst [vmem:[#allocation116_spill] sm:$0xff] %v3905_v17  ;;  %v156_v48 = vld [vmem:[#allocation8 + $0x290] sm:$0xff]  ;;  %v161_v42 = vld [vmem:[#allocation8 + $0x2b8] sm:$0xff]  ;;  %5496 = vst [vmem:[#allocation118_spill] sm:$0xff] %v3911_v49 }
  0xa5   :  { %v160_v33 = vld [vmem:[#allocation8 + $0x2b0] sm:$0xff]  ;;  %v3920_v14 = vcombine.high %v157_v47, %v161_v42  ;;  %v3927_v13 = vcombine.low %v157_v47, %v161_v42 }
  0xa6   :  { %v3917_v56 = vcombine.high %v156_v48, %v160_v33  ;;  %v3923_v3 = vcombine.low %v156_v48, %v160_v33 }
  0xa7   :  { %939 = vmatpush1.bf16.msra.mxu0 %v3887_v63  ;;  %980 = vmatpush1.bf16.msra.mxu1 %v3891_v1  ;;  %5499 = vst [vmem:[#allocation121_spill] sm:$0xff] %v3920_v14  ;;  %v165_v1 = vld [vmem:[#allocation8 + $0x2d8] sm:$0xff]  ;;  %5501 = vst [vmem:[#allocation123_spill] sm:$0xff] %v3927_v13 }
  0xa8   :  { %940 = vmatprep.subr.bf16.mxu0 %v3893_v58  ;;  %981 = vmatprep.subr.bf16.mxu1 %v3896_v2  ;;  %5498 = vst [vmem:[#allocation120_spill] sm:$0xff] %v3917_v56  ;;  %v164_v2 = vld [vmem:[#allocation8 + $0x2d0] sm:$0xff]  ;;  %v169_v63 = vld [vmem:[#allocation8 + $0x2f8] sm:$0xff]  ;;  %5500 = vst [vmem:[#allocation122_spill] sm:$0xff] %v3923_v3 }
  0xa9   :  { %v168_v58 = vld [vmem:[#allocation8 + $0x2f0] sm:$0xff]  ;;  %v3932_v16 = vcombine.high %v165_v1, %v169_v63  ;;  %v3939_v42 = vcombine.low %v165_v1, %v169_v63 }
  0xaa   :  { %v3929_v55 = vcombine.high %v164_v2, %v168_v58  ;;  %v3935_v33 = vcombine.low %v164_v2, %v168_v58 }
  0xab   :  { %941 = vmatpush1.bf16.msra.mxu0 %v3899_v32  ;;  %982 = vmatpush1.bf16.msra.mxu1 %v3903_v31  ;;  %5503 = vst [vmem:[#allocation125_spill] sm:$0xff] %v3932_v16  ;;  %v173_v31 = vld [vmem:[#allocation8 + $0x318] sm:$0xff]  ;;  %5505 = vst [vmem:[#allocation127_spill] sm:$0xff] %v3939_v42 }
  0xac   :  { %942 = vmatprep.subr.bf16.mxu0 %v3905_v17  ;;  %983 = vmatprep.subr.bf16.mxu1 %v3908_v0  ;;  %5502 = vst [vmem:[#allocation124_spill] sm:$0xff] %v3929_v55  ;;  %v172_v0 = vld [vmem:[#allocation8 + $0x310] sm:$0xff]  ;;  %v177_v32 = vld [vmem:[#allocation8 + $0x338] sm:$0xff]  ;;  %5504 = vst [vmem:[#allocation126_spill] sm:$0xff] %v3935_v33 }
  0xad   :  { %v176_v17 = vld [vmem:[#allocation8 + $0x330] sm:$0xff]  ;;  %v3944_v48 = vcombine.high %v173_v31, %v177_v32  ;;  %v3951_v63 = vcombine.low %v173_v31, %v177_v32 }
  0xae   :  { %v3941_v47 = vcombine.high %v172_v0, %v176_v17  ;;  %v3947_v58 = vcombine.low %v172_v0, %v176_v17 }
  0xaf   :  { %943 = vmatpush1.bf16.msra.mxu0 %v3911_v49  ;;  %984 = vmatpush1.bf16.msra.mxu1 %v3915_v57  ;;  %5507 = vst [vmem:[#allocation129_spill] sm:$0xff] %v3944_v48  ;;  %v181_v57 = vld [vmem:[#allocation8 + $0x358] sm:$0xff]  ;;  %5509 = vst [vmem:[#allocation131_spill] sm:$0xff] %v3951_v63 }
  0xb0   :  { %944 = vmatprep.subr.bf16.mxu0 %v3917_v56  ;;  %985 = vmatprep.subr.bf16.mxu1 %v3920_v14  ;;  %5506 = vst [vmem:[#allocation128_spill] sm:$0xff] %v3941_v47  ;;  %v180_v14 = vld [vmem:[#allocation8 + $0x350] sm:$0xff]  ;;  %v185_v49 = vld [vmem:[#allocation8 + $0x378] sm:$0xff]  ;;  %5508 = vst [vmem:[#allocation130_spill] sm:$0xff] %v3947_v58 }
  0xb1   :  { %v184_v56 = vld [vmem:[#allocation8 + $0x370] sm:$0xff]  ;;  %v3956_v2 = vcombine.high %v181_v57, %v185_v49  ;;  %v3963_v32 = vcombine.low %v181_v57, %v185_v49 }
  0xb2   :  { %v3953_v1 = vcombine.high %v180_v14, %v184_v56  ;;  %v3959_v17 = vcombine.low %v180_v14, %v184_v56 }
  0xb3   :  { %945 = vmatpush1.bf16.msra.mxu0 %v3923_v3  ;;  %986 = vmatpush1.bf16.msra.mxu1 %v3927_v13  ;;  %5511 = vst [vmem:[#allocation133_spill] sm:$0xff] %v3956_v2  ;;  %v189_v13 = vld [vmem:[#allocation8 + $0x398] sm:$0xff]  ;;  %5513 = vst [vmem:[#allocation135_spill] sm:$0xff] %v3963_v32 }
  0xb4   :  { %946 = vmatprep.subr.bf16.mxu0 %v3929_v55  ;;  %987 = vmatprep.subr.bf16.mxu1 %v3932_v16  ;;  %5510 = vst [vmem:[#allocation132_spill] sm:$0xff] %v3953_v1  ;;  %v188_v16 = vld [vmem:[#allocation8 + $0x390] sm:$0xff]  ;;  %v193_v3 = vld [vmem:[#allocation8 + $0x3b8] sm:$0xff]  ;;  %5512 = vst [vmem:[#allocation134_spill] sm:$0xff] %v3959_v17 }
  0xb5   :  { %v192_v55 = vld [vmem:[#allocation8 + $0x3b0] sm:$0xff]  ;;  %v3968_v0 = vcombine.high %v189_v13, %v193_v3  ;;  %v3975_v49 = vcombine.low %v189_v13, %v193_v3  ;;  %v5523_v3 = vld [vmem:[#allocation60_spill] sm:$0xff] }
  0xb6   :  { %v3965_v31 = vcombine.high %v188_v16, %v192_v55  ;;  %v3971_v56 = vcombine.low %v188_v16, %v192_v55  ;;  %v5524_v13 = vld [vmem:[#allocation61_spill] sm:$0xff]  ;;  %v5525_v16 = vld [vmem:[#allocation62_spill] sm:$0xff] }
  0xb7   :  { %947 = vmatpush1.bf16.msra.mxu0 %v3935_v33  ;;  %988 = vmatpush1.bf16.msra.mxu1 %v3939_v42  ;;  %5515 = vst [vmem:[#allocation137_spill] sm:$0xff] %v3968_v0  ;;  %v197_v42 = vld [vmem:[#allocation8 + $0x3d8] sm:$0xff]  ;;  %5517 = vst [vmem:[#allocation139_spill] sm:$0xff] %v3975_v49 }
  0xb8   :  { %948 = vmatprep.subr.bf16.mxu0 %v3941_v47  ;;  %989 = vmatprep.subr.bf16.mxu1 %v3944_v48  ;;  %5514 = vst [vmem:[#allocation136_spill] sm:$0xff] %v3965_v31  ;;  %v196_v48 = vld [vmem:[#allocation8 + $0x3d0] sm:$0xff]  ;;  %v201_v33 = vld [vmem:[#allocation8 + $0x3f8] sm:$0xff]  ;;  %5516 = vst [vmem:[#allocation138_spill] sm:$0xff] %v3971_v56 }
  0xb9   :  { %v200_v47 = vld [vmem:[#allocation8 + $0x3f0] sm:$0xff]  ;;  %v3980_v14 = vcombine.high %v197_v42, %v201_v33  ;;  %v3987_v55 = vcombine.low %v197_v42, %v201_v33  ;;  %v5526_v33 = vld [vmem:[#allocation63_spill] sm:$0xff]  ;;  %v5527_v42 = vld [vmem:[#allocation64_spill] sm:$0xff] }
  0xba   :  { %v3977_v57 = vcombine.high %v196_v48, %v200_v47 }
  0xbb   :  { %949 = vmatpush1.bf16.msra.mxu0 %v3947_v58  ;;  %990 = vmatpush1.bf16.msra.mxu1 %v3951_v63  ;;  %5519 = vst [vmem:[#allocation141_spill] sm:$0xff] %v3980_v14  ;;  %5521 = vst [vmem:[#allocation143_spill] sm:$0xff] %v3987_v55 }
  0xbc   :  { %950 = vmatprep.subr.bf16.mxu0 %v3953_v1  ;;  %991 = vmatprep.subr.bf16.mxu1 %v3956_v2  ;;  %5518 = vst [vmem:[#allocation140_spill] sm:$0xff] %v3977_v57  ;;  %v3983_v2 = vcombine.low %v196_v48, %v200_v47  ;;  %v5528_v47 = vld [vmem:[#allocation65_spill] sm:$0xff]  ;;  %v5529_v48 = vld [vmem:[#allocation66_spill] sm:$0xff] }
  0xbe   :  { %5520 = vst [vmem:[#allocation142_spill] sm:$0xff] %v3983_v2 }
  0xbf   :  { %951 = vmatpush1.bf16.msra.mxu0 %v3959_v17  ;;  %992 = vmatpush1.bf16.msra.mxu1 %v3963_v32 }
  0xc0   :  { %952 = vmatprep.subr.bf16.mxu0 %v3965_v31  ;;  %993 = vmatprep.subr.bf16.mxu1 %v3968_v0 }
  0xc3   :  { %953 = vmatpush1.bf16.msra.mxu0 %v3971_v56  ;;  %994 = vmatpush1.bf16.msra.mxu1 %v3975_v49 }
  0xc4   :  { %954 = vmatprep.subr.bf16.mxu0 %v3977_v57  ;;  %995 = vmatprep.subr.bf16.mxu1 %v3980_v14 }
  0xc7   :  { %955 = vmatpush1.bf16.msra.mxu0 %v3983_v2  ;;  %996 = vmatpush1.bf16.msra.mxu1 %v3987_v55 }
  0xc8   :  { %1108 = vmatprep.subr.bf16.mxu0 %v3604_v4  ;;  %1149 = vmatprep.subr.bf16.mxu1 %v3608_v9 }
  0xca   :  { %957 = vmatmul.mubr.bf16.vlgmr.msra.gmra.mrb[4].mxu0 %v5463_v26  ;;  %998 = vmatmul.mubr.bf16.vlgmr.msra.gmra.mrb[4].mxu1 %v5463_v26  ;;  %v5522_v26 = vld [vmem:[#allocation59_spill] sm:$0xff] }
  0xcb   :  { %1109 = vmatpush1.bf16.msra.mxu0 %v3606_v6  ;;  %1150 = vmatpush1.bf16.msra.mxu1 %v3610_v10 }
  0xcc   :  { %1110 = vmatprep.subr.bf16.mxu0 %v3612_v11  ;;  %1151 = vmatprep.subr.bf16.mxu1 %v3615_v15 }
  0xcf   :  { %1111 = vmatpush1.bf16.msra.mxu0 %v3619_v19  ;;  %1152 = vmatpush1.bf16.msra.mxu1 %v3623_v20 }
  0xd0   :  { %1112 = vmatprep.subr.bf16.mxu0 %v3625_v21  ;;  %1153 = vmatprep.subr.bf16.mxu1 %v3628_v22 }
  0xd3   :  { %1113 = vmatpush1.bf16.msra.mxu0 %v3631_v27  ;;  %1154 = vmatpush1.bf16.msra.mxu1 %v3635_v28 }
  0xd4   :  { %1114 = vmatprep.subr.bf16.mxu0 %v3637_v29  ;;  %1155 = vmatprep.subr.bf16.mxu1 %v3640_v30 }
  0xd7   :  { %1115 = vmatpush1.bf16.msra.mxu0 %v3643_v35  ;;  %1156 = vmatpush1.bf16.msra.mxu1 %v3647_v36 }
  0xd8   :  { %1116 = vmatprep.subr.bf16.mxu0 %v3649_v37  ;;  %1157 = vmatprep.subr.bf16.mxu1 %v3652_v38 }
  0xdb   :  { %1117 = vmatpush1.bf16.msra.mxu0 %v3655_v43  ;;  %1158 = vmatpush1.bf16.msra.mxu1 %v3659_v44 }
  0xdc   :  { %1118 = vmatprep.subr.bf16.mxu0 %v3661_v45  ;;  %1159 = vmatprep.subr.bf16.mxu1 %v3664_v46 }
  0xdf   :  { %1119 = vmatpush1.bf16.msra.mxu0 %v3667_v51  ;;  %1160 = vmatpush1.bf16.msra.mxu1 %v3671_v52 }
  0xe0   :  { %1120 = vmatprep.subr.bf16.mxu0 %v3673_v53  ;;  %1161 = vmatprep.subr.bf16.mxu1 %v3676_v54 }
  0xe3   :  { %1121 = vmatpush1.bf16.msra.mxu0 %v3679_v59  ;;  %1162 = vmatpush1.bf16.msra.mxu1 %v3683_v60 }
  0xe4   :  { %1122 = vmatprep.subr.bf16.mxu0 %v3685_v61  ;;  %1163 = vmatprep.subr.bf16.mxu1 %v3688_v62 }
  0xe7   :  { %1123 = vmatpush1.bf16.msra.mxu0 %v3691_v5  ;;  %1164 = vmatpush1.bf16.msra.mxu1 %v3695_v7 }
  0xe8   :  { %1124 = vmatprep.subr.bf16.mxu0 %v3697_v8  ;;  %1165 = vmatprep.subr.bf16.mxu1 %v3700_v12 }
  0xeb   :  { %1125 = vmatpush1.bf16.msra.mxu0 %v3703_v18  ;;  %1166 = vmatpush1.bf16.msra.mxu1 %v3707_v23 }
  0xec   :  { %1126 = vmatprep.subr.bf16.mxu0 %v3709_v24  ;;  %1167 = vmatprep.subr.bf16.mxu1 %v3712_v25 }
  0xef   :  { %1127 = vmatpush1.bf16.msra.mxu0 %v3715_v34  ;;  %1168 = vmatpush1.bf16.msra.mxu1 %v3719_v39  ;;  %v1021_v39 = vlaneseq }
  0xf0   :  { %1128 = vmatprep.subr.bf16.mxu0 %v3721_v40  ;;  %1169 = vmatprep.subr.bf16.mxu1 %v3724_v41  ;;  %v5530_v40 = vld [vmem:[#allocation67_spill] sm:$0xff]  ;;  %v5531_v41 = vld [vmem:[#allocation68_spill] sm:$0xff] }
  0xf1   :  { %v1022_v34 = vshrl.u32 %v1021_v39, 7 }
  0xf3   :  { %1129 = vmatpush1.bf16.msra.mxu0 %v3727_v50  ;;  %1170 = vmatpush1.bf16.msra.mxu1 %v5522_v26  ;;  %v5532_v50 = vld [vmem:[#allocation69_spill] sm:$0xff]  ;;  %v5533_v26 = vld [vmem:[#allocation70_spill] sm:$0xff] }
  0xf4   :  { %1130 = vmatprep.subr.bf16.mxu0 %v5523_v3  ;;  %1171 = vmatprep.subr.bf16.mxu1 %v5524_v13  ;;  %v5534_v3 = vld [vmem:[#allocation71_spill] sm:$0xff]  ;;  %v5535_v13 = vld [vmem:[#allocation72_spill] sm:$0xff] }
  0xf7   :  { %1131 = vmatpush1.bf16.msra.mxu0 %v5525_v16  ;;  %1172 = vmatpush1.bf16.msra.mxu1 %v5526_v33  ;;  %v5536_v16 = vld [vmem:[#allocation73_spill] sm:$0xff]  ;;  %v5537_v33 = vld [vmem:[#allocation74_spill] sm:$0xff] }
  0xf8   :  { %1132 = vmatprep.subr.bf16.mxu0 %v5527_v42  ;;  %1173 = vmatprep.subr.bf16.mxu1 %v5528_v47  ;;  %v5538_v42 = vld [vmem:[#allocation75_spill] sm:$0xff]  ;;  %v5539_v47 = vld [vmem:[#allocation76_spill] sm:$0xff] }
  0xfb   :  { %1133 = vmatpush1.bf16.msra.mxu0 %v5529_v48  ;;  %1174 = vmatpush1.bf16.msra.mxu1 %v5530_v40  ;;  %v5540_v48 = vld [vmem:[#allocation77_spill] sm:$0xff]  ;;  %v5541_v40 = vld [vmem:[#allocation78_spill] sm:$0xff] }
  0xfc   :  { %1134 = vmatprep.subr.bf16.mxu0 %v5531_v41  ;;  %1175 = vmatprep.subr.bf16.mxu1 %v5532_v50  ;;  %v5542_v41 = vld [vmem:[#allocation79_spill] sm:$0xff]  ;;  %v5543_v50 = vld [vmem:[#allocation80_spill] sm:$0xff] }
  0xff   :  { %1135 = vmatpush1.bf16.msra.mxu0 %v5533_v26  ;;  %1176 = vmatpush1.bf16.msra.mxu1 %v5534_v3  ;;  %v5544_v26 = vld [vmem:[#allocation81_spill] sm:$0xff]  ;;  %v3526_v3 = vmov 1966171168  }
 0x100   :  { %1136 = vmatprep.subr.bf16.mxu0 %v5535_v13  ;;  %1177 = vmatprep.subr.bf16.mxu1 %v5536_v16  ;;  %v1019_v13 = vunpack.c.l.s4 %v3526_v3 }
 0x102   :  { %v1020_v16 = vunpack.c.0.s8 %v1019_v13 }
 0x103   :  { %1137 = vmatpush1.bf16.msra.mxu0 %v5537_v33  ;;  %1178 = vmatpush1.bf16.msra.mxu1 %v5538_v42 }
 0x104   :  { %1138 = vmatprep.subr.bf16.mxu0 %v5539_v47  ;;  %1179 = vmatprep.subr.bf16.mxu1 %v5540_v48  ;;  %v4060_v25 = vsub.s32 %v1020_v16, %v1022_v34 }
 0x107   :  { %1139 = vmatpush1.bf16.msra.mxu0 %v5541_v40  ;;  %1180 = vmatpush1.bf16.msra.mxu1 %v5542_v41 }
 0x108   :  { %1190 = vmatprep.subr.bf16.mxu0 %v5543_v50  ;;  %1231 = vmatprep.subr.bf16.mxu1 %v5544_v26 }
 0x15d   :  { %v876_v33 = vpop.f32.mrb[0].mxu0  ;;  %v917_v42 = vpop.f32.mrb[0].mxu1 }
 0x15e   :  { %v878_v47 = vpop.f32.mrb[1].mxu0  ;;  %v919_v48 = vpop.f32.mrb[1].mxu1 }
 0x15f   :  { %v1014_v24 = vcombine.low %v876_v33, %v878_v47  ;;  %v880_v23 = vpop.f32.mrb[2].mxu0  ;;  %v1015_v40 = vcombine.low %v917_v42, %v919_v48  ;;  %v921_v18 = vpop.f32.mrb[2].mxu1 }
 0x160   :  { %v881_v41 = vpop.f32.mrb[3].mxu0  ;;  %v922_v12 = vpop.f32.mrb[3].mxu1 }
 0x161   :  { %v1024_v50 = vrot.slane %v1014_v24, %v4060_v25  ;;  %v1031_v26 = vrot.slane %v1015_v40, %v4060_v25 }
 0x163   :  { %v1046_v3 = vcombine.low %v1024_v50, %v1031_v26  ;;  %v73_v50 = vld [vmem:[%s72_s15] sm:$0xff]  ;;  %s3254_s15 = sld [smem:[#allocation4 + $0x5]] }
 0x165   :  { %v1054_v40 = vrot.slane %v1046_v3, %v4060_v25 }
 0x169   :  { %s3255_s16 = sshll.u32 %s3254_s15, 3 }
 0x16a   :  { %s2157_s17 = scalar_lea.vmem [#allocation5], %s3255_s16 }
 0x19d   :  { %v958_v13 = vpop.f32.mrb[4].mxu0  ;;  %v999_v39 = vpop.f32.mrb[4].mxu1 }
 0x19e   :  { %v960_v8 = vpop.f32.mrb[5].mxu0  ;;  %v1001_v7 = vpop.f32.mrb[5].mxu1 }
 0x19f   :  { %v1016_v16 = vcombine.low %v958_v13, %v960_v8  ;;  %v962_v5 = vpop.f32.mrb[6].mxu0  ;;  %v1017_v62 = vcombine.low %v999_v39, %v1001_v7  ;;  %v1003_v33 = vpop.f32.mrb[6].mxu1  ;;  %v1087_v13 = vstv %s1086_s18 }
 0x1a0   :  { %v963_v47 = vpop.f32.mrb[7].mxu0  ;;  %v1004_v18 = vpop.f32.mrb[7].mxu1  ;;  %vm1088_vm0 = vcmp.eq.s32.totalorder %v1087_v13, 1  ;;  %v5550_v13 = vld [vmem:[#allocation87_spill] sm:$0xff] }
 0x1a1   :  { %v1038_v23 = vrot.slane %v1016_v16, %v4060_v25  ;;  %v1045_v24 = vrot.slane %v1017_v62, %v4060_v25 }
 0x1a3   :  { %v1047_v12 = vcombine.low %v1038_v23, %v1045_v24 }
 0x1a5   :  { %v1061_v41 = vrot.slane %v1047_v12, %v4060_v25  ;;  %v4073_v12 = vsub.s32 1, %v1022_v34 }
 0x1a7   :  { %v1062_v26 = vcombine.low %v1054_v40, %v1061_v41  ;;  %v4075_v40 = vsub.s32 0, %v1022_v34  ;;  %v5545_v34 = vld [vmem:[#allocation82_spill] sm:$0xff] }
 0x1a9   :  { %v1064_v8 = vadd.f32 %v1062_v26, %v73_v50 }
 0x1ab   :  { %v3241_v42 = vmul.f32 -1.442695, %v1064_v8  ;;  %v1072_v48 = vrot.slane %v1064_v8, 6 }
 0x1ad   :  { %3341 = vpow2.f32 %v3241_v42 }
 0x1b7   :  { %v3342_v5 = vpop.eup %3341 }
 0x1b8   :  { %v1068_v7 = vadd.f32 1.0, %v3342_v5 }
 0x1ba   :  { %3343 = vrcp.f32 %v1068_v7  ;;  %v5546_v7 = vld [vmem:[#allocation83_spill] sm:$0xff] }
 0x1bb   :  { %3345 = vtanh.f32 %v1072_v48  ;;  %v5547_v48 = vld [vmem:[#allocation84_spill] sm:$0xff] }
 0x1c4   :  { %v3344_v62 = vpop.eup %3343 }
 0x1c5   :  { %v1076_v3 = vrot.slane %v3344_v62, 2  ;;  %v3346_v39 = vpop.eup %3345  ;;  %v1082_v18 = vrot.slane %v3344_v62, 4 }
 0x1c6   :  { %v1079_v33 = vmul.f32 %v3346_v39, %v3344_v62  ;;  %v5548_v62 = vld [vmem:[#allocation85_spill] sm:$0xff]  ;;  %v5551_v39 = vld [vmem:[#allocation88_spill] sm:$0xff] }
 0x1c7   :  { %v1078_v16 = vmul.f32 0.0, %v1076_v3  ;;  %v5549_v3 = vld [vmem:[#allocation86_spill] sm:$0xff] }
 0x1c9   :  { %v1080_v47 = vadd.f32 %v1079_v33, %v1078_v16  ;;  %v5552_v16 = vld [vmem:[#allocation89_spill] sm:$0xff]  ;;  %v5553_v33 = vld [vmem:[#allocation90_spill] sm:$0xff] }
 0x1cb   :  { %3347 = vtanh.f32 %v1080_v47  ;;  %v4071_v23 = vsel %vm1088_vm0, %v1080_v47, 0.0  ;;  %v5554_v47 = vld [vmem:[#allocation91_spill] sm:$0xff] }
 0x1d5   :  { %v3348_v24 = vpop.eup %3347 }
 0x1d6   :  { %v1084_v41 = vmul.f32 %v3348_v24, %v1082_v18  ;;  %v5555_v18 = vld [vmem:[#allocation92_spill] sm:$0xff]  ;;  %v5556_v24 = vld [vmem:[#allocation93_spill] sm:$0xff] }
 0x1d8   :  { %v4077_v50 = vsel %vm1088_vm0, %v1084_v41, 0.0  ;;  %v5557_v41 = vld [vmem:[#allocation94_spill] sm:$0xff] }
 0x1d9   :  { %v1103_v26 = vrot.slane %v4077_v50, %v4073_v12  ;;  %v1099_v8 = vrot.slane %v4077_v50, %v4075_v40 }
 0x1db   :  { %v1107_v42 = vpack.c.bf16 %v1103_v26, %v1103_v26  ;;  %v4083_v5 = vpack.c.bf16 %v1099_v8, %v1099_v8  ;;  %v5558_v26 = vld [vmem:[#allocation95_spill] sm:$0xff]  ;;  %v5559_v8 = vld [vmem:[#allocation96_spill] sm:$0xff] }
 0x1dd   :  { %1140 = vmatprep.mubr.bf16.mxu0 %v1107_v42  ;;  %1181 = vmatprep.mubr.bf16.mxu1 %v1107_v42 }
 0x1de   :  { %1141 = vmatmul.mubr.bf16.vlgmr.msra.gmra.mrb[8].mxu0 %v4083_v5  ;;  %1182 = vmatmul.mubr.bf16.vlgmr.msra.gmra.mrb[8].mxu1 %v4083_v5 }
 0x1df   :  { %1191 = vmatpush1.bf16.msra.mxu0 %v5545_v34  ;;  %1232 = vmatpush1.bf16.msra.mxu1 %v5546_v7 }
 0x1e0   :  { %1222 = vmatprep.mubr.bf16.mxu0 %v1107_v42  ;;  %1263 = vmatprep.mubr.bf16.mxu1 %v1107_v42  ;;  %v5560_v42 = vld [vmem:[#allocation97_spill] sm:$0xff] }
 0x1e1   :  { %1192 = vmatprep.subr.bf16.mxu0 %v5547_v48  ;;  %1233 = vmatprep.subr.bf16.mxu1 %v5548_v62 }
 0x1e3   :  { %1193 = vmatpush1.bf16.msra.mxu0 %v5549_v3  ;;  %1234 = vmatpush1.bf16.msra.mxu1 %v5550_v13  ;;  %v5561_v13 = vld [vmem:[#allocation98_spill] sm:$0xff] }
 0x1e4   :  { %1194 = vmatprep.subr.bf16.mxu0 %v5551_v39  ;;  %1235 = vmatprep.subr.bf16.mxu1 %v5552_v16  ;;  %v5562_v39 = vld [vmem:[#allocation99_spill] sm:$0xff]  ;;  %v5563_v16 = vld [vmem:[#allocation100_spill] sm:$0xff] }
 0x1e7   :  { %1195 = vmatpush1.bf16.msra.mxu0 %v5553_v33  ;;  %1236 = vmatpush1.bf16.msra.mxu1 %v5554_v47  ;;  %v5564_v33 = vld [vmem:[#allocation101_spill] sm:$0xff]  ;;  %v5565_v47 = vld [vmem:[#allocation102_spill] sm:$0xff] }
 0x1e8   :  { %1196 = vmatprep.subr.bf16.mxu0 %v5555_v18  ;;  %1237 = vmatprep.subr.bf16.mxu1 %v5556_v24  ;;  %v5566_v18 = vld [vmem:[#allocation103_spill] sm:$0xff]  ;;  %v5567_v24 = vld [vmem:[#allocation104_spill] sm:$0xff] }
 0x1eb   :  { %1197 = vmatpush1.bf16.msra.mxu0 %v5557_v41  ;;  %1238 = vmatpush1.bf16.msra.mxu1 %v5558_v26  ;;  %v5568_v41 = vld [vmem:[#allocation105_spill] sm:$0xff]  ;;  %v5569_v26 = vld [vmem:[#allocation106_spill] sm:$0xff] }
 0x1ec   :  { %1198 = vmatprep.subr.bf16.mxu0 %v5559_v8  ;;  %1239 = vmatprep.subr.bf16.mxu1 %v5560_v42  ;;  %v5570_v8 = vld [vmem:[#allocation107_spill] sm:$0xff]  ;;  %v5571_v42 = vld [vmem:[#allocation108_spill] sm:$0xff] }
 0x1ef   :  { %1199 = vmatpush1.bf16.msra.mxu0 %v5561_v13  ;;  %1240 = vmatpush1.bf16.msra.mxu1 %v5562_v39  ;;  %v5572_v13 = vld [vmem:[#allocation109_spill] sm:$0xff]  ;;  %v5573_v39 = vld [vmem:[#allocation110_spill] sm:$0xff] }
 0x1f0   :  { %1200 = vmatprep.subr.bf16.mxu0 %v5563_v16  ;;  %1241 = vmatprep.subr.bf16.mxu1 %v5564_v33  ;;  %v5574_v16 = vld [vmem:[#allocation111_spill] sm:$0xff]  ;;  %v5575_v33 = vld [vmem:[#allocation112_spill] sm:$0xff] }
 0x1f3   :  { %1201 = vmatpush1.bf16.msra.mxu0 %v5565_v47  ;;  %1242 = vmatpush1.bf16.msra.mxu1 %v5566_v18  ;;  %v5576_v47 = vld [vmem:[#allocation113_spill] sm:$0xff]  ;;  %v5577_v18 = vld [vmem:[#allocation114_spill] sm:$0xff] }
 0x1f4   :  { %1202 = vmatprep.subr.bf16.mxu0 %v5567_v24  ;;  %1243 = vmatprep.subr.bf16.mxu1 %v5568_v41  ;;  %v5578_v24 = vld [vmem:[#allocation115_spill] sm:$0xff]  ;;  %v5579_v41 = vld [vmem:[#allocation116_spill] sm:$0xff] }
 0x1f7   :  { %1203 = vmatpush1.bf16.msra.mxu0 %v5569_v26  ;;  %1244 = vmatpush1.bf16.msra.mxu1 %v5570_v8  ;;  %v5580_v26 = vld [vmem:[#allocation117_spill] sm:$0xff]  ;;  %v5581_v8 = vld [vmem:[#allocation118_spill] sm:$0xff] }
 0x1f8   :  { %1204 = vmatprep.subr.bf16.mxu0 %v5571_v42  ;;  %1245 = vmatprep.subr.bf16.mxu1 %v5572_v13  ;;  %v5582_v42 = vld [vmem:[#allocation119_spill] sm:$0xff]  ;;  %v5583_v13 = vld [vmem:[#allocation120_spill] sm:$0xff] }
 0x1fb   :  { %1205 = vmatpush1.bf16.msra.mxu0 %v5573_v39  ;;  %1246 = vmatpush1.bf16.msra.mxu1 %v5574_v16  ;;  %v5584_v39 = vld [vmem:[#allocation121_spill] sm:$0xff]  ;;  %v5585_v16 = vld [vmem:[#allocation122_spill] sm:$0xff] }
 0x1fc   :  { %1206 = vmatprep.subr.bf16.mxu0 %v5575_v33  ;;  %1247 = vmatprep.subr.bf16.mxu1 %v5576_v47  ;;  %v5586_v33 = vld [vmem:[#allocation123_spill] sm:$0xff]  ;;  %v5587_v47 = vld [vmem:[#allocation124_spill] sm:$0xff] }
 0x1ff   :  { %1207 = vmatpush1.bf16.msra.mxu0 %v5577_v18  ;;  %1248 = vmatpush1.bf16.msra.mxu1 %v5578_v24  ;;  %v5588_v18 = vld [vmem:[#allocation125_spill] sm:$0xff]  ;;  %v5589_v24 = vld [vmem:[#allocation126_spill] sm:$0xff] }
 0x200   :  { %1208 = vmatprep.subr.bf16.mxu0 %v5579_v41  ;;  %1249 = vmatprep.subr.bf16.mxu1 %v5580_v26  ;;  %v5590_v41 = vld [vmem:[#allocation127_spill] sm:$0xff]  ;;  %v5591_v26 = vld [vmem:[#allocation128_spill] sm:$0xff] }
 0x203   :  { %1209 = vmatpush1.bf16.msra.mxu0 %v5581_v8  ;;  %1250 = vmatpush1.bf16.msra.mxu1 %v5582_v42  ;;  %v5592_v8 = vld [vmem:[#allocation129_spill] sm:$0xff] }
 0x204   :  { %1210 = vmatprep.subr.bf16.mxu0 %v5583_v13  ;;  %1251 = vmatprep.subr.bf16.mxu1 %v5584_v39 }
 0x207   :  { %1211 = vmatpush1.bf16.msra.mxu0 %v5585_v16  ;;  %1252 = vmatpush1.bf16.msra.mxu1 %v5586_v33  ;;  %v5593_v16 = vld [vmem:[#allocation133_spill] sm:$0xff] }
 0x208   :  { %1212 = vmatprep.subr.bf16.mxu0 %v5587_v47  ;;  %1253 = vmatprep.subr.bf16.mxu1 %v5588_v18 }
 0x20b   :  { %1213 = vmatpush1.bf16.msra.mxu0 %v5589_v24  ;;  %1254 = vmatpush1.bf16.msra.mxu1 %v5590_v41 }
 0x20c   :  { %1214 = vmatprep.subr.bf16.mxu0 %v5591_v26  ;;  %1255 = vmatprep.subr.bf16.mxu1 %v5592_v8 }
 0x20f   :  { %1215 = vmatpush1.bf16.msra.mxu0 %v3947_v58  ;;  %1256 = vmatpush1.bf16.msra.mxu1 %v3951_v63 }
 0x210   :  { %1216 = vmatprep.subr.bf16.mxu0 %v3953_v1  ;;  %1257 = vmatprep.subr.bf16.mxu1 %v5593_v16 }
 0x213   :  { %1217 = vmatpush1.bf16.msra.mxu0 %v3959_v17  ;;  %1258 = vmatpush1.bf16.msra.mxu1 %v3963_v32 }
 0x214   :  { %1218 = vmatprep.subr.bf16.mxu0 %v3965_v31  ;;  %1259 = vmatprep.subr.bf16.mxu1 %v3968_v0 }
 0x217   :  { %1219 = vmatpush1.bf16.msra.mxu0 %v3971_v56  ;;  %1260 = vmatpush1.bf16.msra.mxu1 %v3975_v49 }
 0x218   :  { %1220 = vmatprep.subr.bf16.mxu0 %v3977_v57  ;;  %1261 = vmatprep.subr.bf16.mxu1 %v3980_v14 }
 0x21b   :  { %1221 = vmatpush1.bf16.msra.mxu0 %v3983_v2  ;;  %1262 = vmatpush1.bf16.msra.mxu1 %v3987_v55 }
 0x21c   :  { %1374 = vmatprep.subr.bf16.mxu0 %v3604_v4  ;;  %1415 = vmatprep.subr.bf16.mxu1 %v3608_v9 }
 0x21e   :  { %1223 = vmatmul.mubr.bf16.vlgmr.msra.gmra.mrb[12].mxu0 %v4083_v5  ;;  %1264 = vmatmul.mubr.bf16.vlgmr.msra.gmra.mrb[12].mxu1 %v4083_v5  ;;  %v5594_v5 = vld [vmem:[#allocation45_spill] sm:$0xff] }
 0x21f   :  { %1375 = vmatpush1.bf16.msra.mxu0 %v3606_v6  ;;  %1416 = vmatpush1.bf16.msra.mxu1 %v3610_v10 }
 0x220   :  { %1376 = vmatprep.subr.bf16.mxu0 %v3612_v11  ;;  %1417 = vmatprep.subr.bf16.mxu1 %v3615_v15 }
 0x223   :  { %1377 = vmatpush1.bf16.msra.mxu0 %v3619_v19  ;;  %1418 = vmatpush1.bf16.msra.mxu1 %v3623_v20 }
 0x224   :  { %1378 = vmatprep.subr.bf16.mxu0 %v3625_v21  ;;  %1419 = vmatprep.subr.bf16.mxu1 %v3628_v22 }
 0x227   :  { %1379 = vmatpush1.bf16.msra.mxu0 %v3631_v27  ;;  %1420 = vmatpush1.bf16.msra.mxu1 %v3635_v28 }
 0x228   :  { %1380 = vmatprep.subr.bf16.mxu0 %v3637_v29  ;;  %1421 = vmatprep.subr.bf16.mxu1 %v3640_v30 }
 0x22b   :  { %1381 = vmatpush1.bf16.msra.mxu0 %v3643_v35  ;;  %1422 = vmatpush1.bf16.msra.mxu1 %v3647_v36 }
 0x22c   :  { %1382 = vmatprep.subr.bf16.mxu0 %v3649_v37  ;;  %1423 = vmatprep.subr.bf16.mxu1 %v3652_v38 }
 0x22f   :  { %1383 = vmatpush1.bf16.msra.mxu0 %v3655_v43  ;;  %1424 = vmatpush1.bf16.msra.mxu1 %v3659_v44  ;;  %v5595_v44 = vld [vmem:[#allocation46_spill] sm:$0xff] }
 0x230   :  { %1384 = vmatprep.subr.bf16.mxu0 %v3661_v45  ;;  %1425 = vmatprep.subr.bf16.mxu1 %v3664_v46  ;;  %v5596_v45 = vld [vmem:[#allocation47_spill] sm:$0xff]  ;;  %v5597_v46 = vld [vmem:[#allocation48_spill] sm:$0xff] }
 0x233   :  { %1385 = vmatpush1.bf16.msra.mxu0 %v3667_v51  ;;  %1426 = vmatpush1.bf16.msra.mxu1 %v3671_v52  ;;  %v5598_v51 = vld [vmem:[#allocation49_spill] sm:$0xff]  ;;  %v5599_v52 = vld [vmem:[#allocation50_spill] sm:$0xff] }
 0x234   :  { %1386 = vmatprep.subr.bf16.mxu0 %v3673_v53  ;;  %1427 = vmatprep.subr.bf16.mxu1 %v3676_v54  ;;  %v5600_v53 = vld [vmem:[#allocation51_spill] sm:$0xff]  ;;  %v5601_v54 = vld [vmem:[#allocation52_spill] sm:$0xff] }
 0x237   :  { %1387 = vmatpush1.bf16.msra.mxu0 %v3679_v59  ;;  %1428 = vmatpush1.bf16.msra.mxu1 %v3683_v60  ;;  %v5602_v59 = vld [vmem:[#allocation53_spill] sm:$0xff]  ;;  %v5603_v60 = vld [vmem:[#allocation54_spill] sm:$0xff] }
 0x238   :  { %1388 = vmatprep.subr.bf16.mxu0 %v3685_v61  ;;  %1429 = vmatprep.subr.bf16.mxu1 %v5594_v5  ;;  %v5604_v61 = vld [vmem:[#allocation55_spill] sm:$0xff]  ;;  %v5605_v5 = vld [vmem:[#allocation56_spill] sm:$0xff] }
 0x23b   :  { %1389 = vmatpush1.bf16.msra.mxu0 %v5595_v44  ;;  %1430 = vmatpush1.bf16.msra.mxu1 %v5596_v45  ;;  %v5606_v44 = vld [vmem:[#allocation57_spill] sm:$0xff]  ;;  %v5607_v45 = vld [vmem:[#allocation58_spill] sm:$0xff] }
 0x23c   :  { %1390 = vmatprep.subr.bf16.mxu0 %v5597_v46  ;;  %1431 = vmatprep.subr.bf16.mxu1 %v5598_v51  ;;  %v5608_v46 = vld [vmem:[#allocation59_spill] sm:$0xff]  ;;  %v5609_v51 = vld [vmem:[#allocation60_spill] sm:$0xff] }
 0x23f   :  { %1391 = vmatpush1.bf16.msra.mxu0 %v5599_v52  ;;  %1432 = vmatpush1.bf16.msra.mxu1 %v5600_v53  ;;  %v5610_v52 = vld [vmem:[#allocation61_spill] sm:$0xff]  ;;  %v5611_v53 = vld [vmem:[#allocation62_spill] sm:$0xff] }
 0x240   :  { %1392 = vmatprep.subr.bf16.mxu0 %v5601_v54  ;;  %1433 = vmatprep.subr.bf16.mxu1 %v5602_v59  ;;  %v5612_v54 = vld [vmem:[#allocation63_spill] sm:$0xff]  ;;  %v5613_v59 = vld [vmem:[#allocation64_spill] sm:$0xff] }
 0x243   :  { %1393 = vmatpush1.bf16.msra.mxu0 %v5603_v60  ;;  %1434 = vmatpush1.bf16.msra.mxu1 %v5604_v61  ;;  %v5614_v60 = vld [vmem:[#allocation65_spill] sm:$0xff]  ;;  %v5615_v61 = vld [vmem:[#allocation66_spill] sm:$0xff] }
 0x244   :  { %1394 = vmatprep.subr.bf16.mxu0 %v5605_v5  ;;  %1435 = vmatprep.subr.bf16.mxu1 %v5606_v44  ;;  %v5616_v5 = vld [vmem:[#allocation67_spill] sm:$0xff]  ;;  %v5617_v44 = vld [vmem:[#allocation68_spill] sm:$0xff] }
 0x247   :  { %1395 = vmatpush1.bf16.msra.mxu0 %v5607_v45  ;;  %1436 = vmatpush1.bf16.msra.mxu1 %v5608_v46  ;;  %v5618_v45 = vld [vmem:[#allocation69_spill] sm:$0xff]  ;;  %v5619_v46 = vld [vmem:[#allocation70_spill] sm:$0xff] }
 0x248   :  { %1396 = vmatprep.subr.bf16.mxu0 %v5609_v51  ;;  %1437 = vmatprep.subr.bf16.mxu1 %v5610_v52  ;;  %v5620_v51 = vld [vmem:[#allocation71_spill] sm:$0xff]  ;;  %v5621_v52 = vld [vmem:[#allocation72_spill] sm:$0xff] }
 0x24b   :  { %1397 = vmatpush1.bf16.msra.mxu0 %v5611_v53  ;;  %1438 = vmatpush1.bf16.msra.mxu1 %v5612_v54  ;;  %v5622_v53 = vld [vmem:[#allocation73_spill] sm:$0xff]  ;;  %v5623_v54 = vld [vmem:[#allocation74_spill] sm:$0xff] }
 0x24c   :  { %1398 = vmatprep.subr.bf16.mxu0 %v5613_v59  ;;  %1439 = vmatprep.subr.bf16.mxu1 %v5614_v60  ;;  %v5624_v59 = vld [vmem:[#allocation75_spill] sm:$0xff]  ;;  %v5625_v60 = vld [vmem:[#allocation76_spill] sm:$0xff] }
 0x24f   :  { %1399 = vmatpush1.bf16.msra.mxu0 %v5615_v61  ;;  %1440 = vmatpush1.bf16.msra.mxu1 %v5616_v5  ;;  %v5626_v61 = vld [vmem:[#allocation77_spill] sm:$0xff]  ;;  %v5627_v5 = vld [vmem:[#allocation78_spill] sm:$0xff] }
 0x250   :  { %1400 = vmatprep.subr.bf16.mxu0 %v5617_v44  ;;  %1441 = vmatprep.subr.bf16.mxu1 %v5618_v45  ;;  %v5628_v44 = vld [vmem:[#allocation79_spill] sm:$0xff]  ;;  %v5629_v45 = vld [vmem:[#allocation80_spill] sm:$0xff] }
 0x253   :  { %1401 = vmatpush1.bf16.msra.mxu0 %v5619_v46  ;;  %1442 = vmatpush1.bf16.msra.mxu1 %v5620_v51  ;;  %v5630_v46 = vld [vmem:[#allocation81_spill] sm:$0xff] }
 0x254   :  { %1402 = vmatprep.subr.bf16.mxu0 %v5621_v52  ;;  %1443 = vmatprep.subr.bf16.mxu1 %v5622_v53 }
 0x257   :  { %1403 = vmatpush1.bf16.msra.mxu0 %v5623_v54  ;;  %1444 = vmatpush1.bf16.msra.mxu1 %v5624_v59 }
 0x258   :  { %1404 = vmatprep.subr.bf16.mxu0 %v5625_v60  ;;  %1445 = vmatprep.subr.bf16.mxu1 %v5626_v61 }
 0x25b   :  { %1405 = vmatpush1.bf16.msra.mxu0 %v5627_v5  ;;  %1446 = vmatpush1.bf16.msra.mxu1 %v5628_v44 }
 0x25c   :  { %1456 = vmatprep.subr.bf16.mxu0 %v5629_v45  ;;  %1497 = vmatprep.subr.bf16.mxu1 %v5630_v46 }
 0x2b1   :  { %v1142_v51 = vpop.f32.mrb[8].mxu0  ;;  %v1183_v52 = vpop.f32.mrb[8].mxu1 }
 0x2b2   :  { %v1144_v43 = vpop.f32.mrb[9].mxu0  ;;  %v1185_v53 = vpop.f32.mrb[9].mxu1 }
 0x2b3   :  { %v1280_v38 = vcombine.low %v1142_v51, %v1144_v43  ;;  %v1281_v54 = vcombine.low %v1183_v52, %v1185_v53  ;;  %v1146_v37 = vpop.f32.mrb[10].mxu0  ;;  %v1187_v59 = vpop.f32.mrb[10].mxu1 }
 0x2b4   :  { %v1147_v36 = vpop.f32.mrb[11].mxu0  ;;  %v1188_v60 = vpop.f32.mrb[11].mxu1 }
 0x2b5   :  { %v1290_v61 = vrot.slane %v1280_v38, %v4060_v25  ;;  %v1297_v5 = vrot.slane %v1281_v54, %v4060_v25  ;;  %v1094_v54 = vld [vmem:[%s1093_s21] sm:$0xff]  ;;  %s3257_s21 = sld [smem:[#allocation4 + $0x6]] }
 0x2b7   :  { %v1312_v35 = vcombine.low %v1290_v61, %v1297_v5 }
 0x2b9   :  { %v1320_v52 = vrot.slane %v1312_v35, %v4060_v25  ;;  %v1353_v35 = vstv %s1352_s24 }
 0x2ba   :  { %vm1354_vm1 = vcmp.eq.s32.totalorder %v1353_v35, 1  ;;  %v5640_v35 = vld [vmem:[#allocation96_spill] sm:$0xff] }
 0x2bb   :  { %s3258_s22 = sshll.u32 %s3257_s21, 3 }
 0x2bc   :  { %s2423_s23 = scalar_lea.vmem [#allocation5], %s3258_s22 }
 0x2f1   :  { %v1224_v44 = vpop.f32.mrb[12].mxu0  ;;  %v1265_v45 = vpop.f32.mrb[12].mxu1 }
 0x2f2   :  { %v1226_v30 = vpop.f32.mrb[13].mxu0  ;;  %v1267_v46 = vpop.f32.mrb[13].mxu1 }
 0x2f3   :  { %v1282_v29 = vcombine.low %v1224_v44, %v1226_v30  ;;  %v1283_v28 = vcombine.low %v1265_v45, %v1267_v46  ;;  %v1228_v27 = vpop.f32.mrb[14].mxu0  ;;  %v1269_v22 = vpop.f32.mrb[14].mxu1 }
 0x2f4   :  { %v1229_v43 = vpop.f32.mrb[15].mxu0  ;;  %v1270_v37 = vpop.f32.mrb[15].mxu1 }
 0x2f5   :  { %v1304_v36 = vrot.slane %v1282_v29, %v4060_v25  ;;  %v1311_v51 = vrot.slane %v1283_v28, %v4060_v25 }
 0x2f7   :  { %v1313_v38 = vcombine.low %v1304_v36, %v1311_v51 }
 0x2f9   :  { %v1327_v53 = vrot.slane %v1313_v38, %v4060_v25 }
 0x2fb   :  { %v1328_v59 = vcombine.low %v1320_v52, %v1327_v53 }
 0x2fd   :  { %v1330_v60 = vadd.f32 %v1328_v59, %v1094_v54 }
 0x2ff   :  { %v3244_v30 = vmul.f32 -1.442695, %v1330_v60  ;;  %v1338_v44 = vrot.slane %v1330_v60, 6  ;;  %v5633_v60 = vld [vmem:[#allocation89_spill] sm:$0xff] }
 0x301   :  { %3349 = vpow2.f32 %v3244_v30  ;;  %v5634_v30 = vld [vmem:[#allocation90_spill] sm:$0xff] }
 0x30b   :  { %v3350_v27 = vpop.eup %3349 }
 0x30c   :  { %v1334_v22 = vadd.f32 1.0, %v3350_v27  ;;  %v5635_v27 = vld [vmem:[#allocation91_spill] sm:$0xff] }
 0x30e   :  { %3351 = vrcp.f32 %v1334_v22  ;;  %v5636_v22 = vld [vmem:[#allocation92_spill] sm:$0xff] }
 0x30f   :  { %3353 = vtanh.f32 %v1338_v44  ;;  %v5637_v44 = vld [vmem:[#allocation93_spill] sm:$0xff] }
 0x318   :  { %v3352_v28 = vpop.eup %3351 }
 0x319   :  { %v1342_v29 = vrot.slane %v3352_v28, 2  ;;  %v3354_v45 = vpop.eup %3353  ;;  %v1348_v37 = vrot.slane %v3352_v28, 4 }
 0x31a   :  { %v1345_v61 = vmul.f32 %v3354_v45, %v3352_v28  ;;  %v5638_v28 = vld [vmem:[#allocation94_spill] sm:$0xff]  ;;  %v5641_v45 = vld [vmem:[#allocation97_spill] sm:$0xff] }
 0x31b   :  { %v1344_v46 = vmul.f32 %v1342_v29, %v4071_v23  ;;  %v5639_v29 = vld [vmem:[#allocation95_spill] sm:$0xff] }
 0x31d   :  { %v1346_v5 = vadd.f32 %v1345_v61, %v1344_v46  ;;  %v5642_v46 = vld [vmem:[#allocation98_spill] sm:$0xff]  ;;  %v5643_v61 = vld [vmem:[#allocation99_spill] sm:$0xff] }
 0x31f   :  { %3355 = vtanh.f32 %v1346_v5  ;;  %v4228_v43 = vsel %vm1354_vm1, %v1346_v5, %v4071_v23  ;;  %v5631_v23 = vld [vmem:[#allocation87_spill] sm:$0xff]  ;;  %v5644_v5 = vld [vmem:[#allocation100_spill] sm:$0xff] }
 0x329   :  { %v3356_v36 = vpop.eup %3355 }
 0x32a   :  { %v1350_v51 = vmul.f32 %v3356_v36, %v1348_v37  ;;  %v5645_v37 = vld [vmem:[#allocation101_spill] sm:$0xff]  ;;  %v5646_v36 = vld [vmem:[#allocation102_spill] sm:$0xff] }
 0x32c   :  { %v4231_v38 = vsel %vm1354_vm1, %v1350_v51, %v4077_v50  ;;  %v5632_v50 = vld [vmem:[#allocation88_spill] sm:$0xff]  ;;  %v5647_v51 = vld [vmem:[#allocation103_spill] sm:$0xff] }
 0x32d   :  { %v1369_v52 = vrot.slane %v4231_v38, %v4073_v12  ;;  %v1365_v53 = vrot.slane %v4231_v38, %v4075_v40 }
 0x32f   :  { %v1373_v54 = vpack.c.bf16 %v1369_v52, %v1369_v52  ;;  %v4237_v59 = vpack.c.bf16 %v1365_v53, %v1365_v53  ;;  %v5648_v52 = vld [vmem:[#allocation104_spill] sm:$0xff]  ;;  %v5649_v53 = vld [vmem:[#allocation105_spill] sm:$0xff] }
 0x331   :  { %1406 = vmatprep.mubr.bf16.mxu0 %v1373_v54  ;;  %1447 = vmatprep.mubr.bf16.mxu1 %v1373_v54 }
 0x332   :  { %1407 = vmatmul.mubr.bf16.vlgmr.msra.gmra.mrb[16].mxu0 %v4237_v59  ;;  %1448 = vmatmul.mubr.bf16.vlgmr.msra.gmra.mrb[16].mxu1 %v4237_v59 }
 0x333   :  { %1457 = vmatpush1.bf16.msra.mxu0 %v5545_v34  ;;  %1498 = vmatpush1.bf16.msra.mxu1 %v5546_v7 }
 0x334   :  { %1488 = vmatprep.mubr.bf16.mxu0 %v1373_v54  ;;  %1529 = vmatprep.mubr.bf16.mxu1 %v1373_v54  ;;  %v5650_v54 = vld [vmem:[#allocation106_spill] sm:$0xff] }
 0x335   :  { %1458 = vmatprep.subr.bf16.mxu0 %v5547_v48  ;;  %1499 = vmatprep.subr.bf16.mxu1 %v5548_v62 }
 0x337   :  { %1459 = vmatpush1.bf16.msra.mxu0 %v5549_v3  ;;  %1500 = vmatpush1.bf16.msra.mxu1 %v5631_v23 }
 0x338   :  { %1460 = vmatprep.subr.bf16.mxu0 %v5632_v50  ;;  %1501 = vmatprep.subr.bf16.mxu1 %v5633_v60 }
 0x33b   :  { %1461 = vmatpush1.bf16.msra.mxu0 %v5634_v30  ;;  %1502 = vmatpush1.bf16.msra.mxu1 %v5635_v27 }
 0x33c   :  { %1462 = vmatprep.subr.bf16.mxu0 %v5636_v22  ;;  %1503 = vmatprep.subr.bf16.mxu1 %v5637_v44 }
 0x33f   :  { %1463 = vmatpush1.bf16.msra.mxu0 %v5638_v28  ;;  %1504 = vmatpush1.bf16.msra.mxu1 %v5639_v29 }
 0x340   :  { %1464 = vmatprep.subr.bf16.mxu0 %v5640_v35  ;;  %1505 = vmatprep.subr.bf16.mxu1 %v5641_v45  ;;  %v5651_v35 = vld [vmem:[#allocation107_spill] sm:$0xff]  ;;  %v5652_v45 = vld [vmem:[#allocation108_spill] sm:$0xff] }
 0x343   :  { %1465 = vmatpush1.bf16.msra.mxu0 %v5642_v46  ;;  %1506 = vmatpush1.bf16.msra.mxu1 %v5643_v61  ;;  %v5653_v46 = vld [vmem:[#allocation109_spill] sm:$0xff]  ;;  %v5654_v61 = vld [vmem:[#allocation110_spill] sm:$0xff] }
 0x344   :  { %1466 = vmatprep.subr.bf16.mxu0 %v5644_v5  ;;  %1507 = vmatprep.subr.bf16.mxu1 %v5645_v37  ;;  %v5655_v5 = vld [vmem:[#allocation111_spill] sm:$0xff]  ;;  %v5656_v37 = vld [vmem:[#allocation112_spill] sm:$0xff] }
 0x347   :  { %1467 = vmatpush1.bf16.msra.mxu0 %v5646_v36  ;;  %1508 = vmatpush1.bf16.msra.mxu1 %v5647_v51  ;;  %v5657_v36 = vld [vmem:[#allocation113_spill] sm:$0xff]  ;;  %v5658_v51 = vld [vmem:[#allocation114_spill] sm:$0xff] }
 0x348   :  { %1468 = vmatprep.subr.bf16.mxu0 %v5648_v52  ;;  %1509 = vmatprep.subr.bf16.mxu1 %v5649_v53  ;;  %v5659_v52 = vld [vmem:[#allocation115_spill] sm:$0xff]  ;;  %v5660_v53 = vld [vmem:[#allocation116_spill] sm:$0xff] }
 0x34b   :  { %1469 = vmatpush1.bf16.msra.mxu0 %v5650_v54  ;;  %1510 = vmatpush1.bf16.msra.mxu1 %v5651_v35  ;;  %v5661_v54 = vld [vmem:[#allocation117_spill] sm:$0xff]  ;;  %v5662_v35 = vld [vmem:[#allocation118_spill] sm:$0xff] }
 0x34c   :  { %1470 = vmatprep.subr.bf16.mxu0 %v5652_v45  ;;  %1511 = vmatprep.subr.bf16.mxu1 %v5653_v46 }
 0x34f   :  { %1471 = vmatpush1.bf16.msra.mxu0 %v5654_v61  ;;  %1512 = vmatpush1.bf16.msra.mxu1 %v5655_v5  ;;  %v5663_v5 = vld [vmem:[#allocation122_spill] sm:$0xff] }
 0x350   :  { %1472 = vmatprep.subr.bf16.mxu0 %v5656_v37  ;;  %1513 = vmatprep.subr.bf16.mxu1 %v5657_v36 }
 0x353   :  { %1473 = vmatpush1.bf16.msra.mxu0 %v5658_v51  ;;  %1514 = vmatpush1.bf16.msra.mxu1 %v5659_v52 }
 0x354   :  { %1474 = vmatprep.subr.bf16.mxu0 %v5660_v53  ;;  %1515 = vmatprep.subr.bf16.mxu1 %v5661_v54 }
 0x357   :  { %1475 = vmatpush1.bf16.msra.mxu0 %v5662_v35  ;;  %1516 = vmatpush1.bf16.msra.mxu1 %v5582_v42 }
 0x358   :  { %1476 = vmatprep.subr.bf16.mxu0 %v5583_v13  ;;  %1517 = vmatprep.subr.bf16.mxu1 %v5584_v39 }
 0x35b   :  { %1477 = vmatpush1.bf16.msra.mxu0 %v5663_v5  ;;  %1518 = vmatpush1.bf16.msra.mxu1 %v5586_v33 }
 0x35c   :  { %1478 = vmatprep.subr.bf16.mxu0 %v5587_v47  ;;  %1519 = vmatprep.subr.bf16.mxu1 %v5588_v18 }
 0x35f   :  { %1479 = vmatpush1.bf16.msra.mxu0 %v5589_v24  ;;  %1520 = vmatpush1.bf16.msra.mxu1 %v5590_v41 }
 0x360   :  { %1480 = vmatprep.subr.bf16.mxu0 %v5591_v26  ;;  %1521 = vmatprep.subr.bf16.mxu1 %v5592_v8 }
 0x363   :  { %1481 = vmatpush1.bf16.msra.mxu0 %v3947_v58  ;;  %1522 = vmatpush1.bf16.msra.mxu1 %v3951_v63 }
 0x364   :  { %1482 = vmatprep.subr.bf16.mxu0 %v3953_v1  ;;  %1523 = vmatprep.subr.bf16.mxu1 %v5593_v16 }
 0x367   :  { %1483 = vmatpush1.bf16.msra.mxu0 %v3959_v17  ;;  %1524 = vmatpush1.bf16.msra.mxu1 %v3963_v32 }
 0x368   :  { %1484 = vmatprep.subr.bf16.mxu0 %v3965_v31  ;;  %1525 = vmatprep.subr.bf16.mxu1 %v3968_v0 }
 0x36b   :  { %1485 = vmatpush1.bf16.msra.mxu0 %v3971_v56  ;;  %1526 = vmatpush1.bf16.msra.mxu1 %v3975_v49 }
 0x36c   :  { %1486 = vmatprep.subr.bf16.mxu0 %v3977_v57  ;;  %1527 = vmatprep.subr.bf16.mxu1 %v3980_v14 }
 0x36f   :  { %1487 = vmatpush1.bf16.msra.mxu0 %v3983_v2  ;;  %1528 = vmatpush1.bf16.msra.mxu1 %v3987_v55  ;;  %v5666_v55 = vld [vmem:[#allocation27_spill] sm:$0xff] }
 0x370   :  { %1640 = vmatprep.subr.bf16.mxu0 %v3604_v4  ;;  %1681 = vmatprep.subr.bf16.mxu1 %v3608_v9  ;;  %v5664_v4 = vld [vmem:[#allocation25_spill] sm:$0xff]  ;;  %v5665_v9 = vld [vmem:[#allocation26_spill] sm:$0xff] }
 0x372   :  { %1489 = vmatmul.mubr.bf16.vlgmr.msra.gmra.mrb[20].mxu0 %v4237_v59  ;;  %1530 = vmatmul.mubr.bf16.vlgmr.msra.gmra.mrb[20].mxu1 %v4237_v59  ;;  %v5667_v59 = vld [vmem:[#allocation28_spill] sm:$0xff] }
 0x373   :  { %1641 = vmatpush1.bf16.msra.mxu0 %v3606_v6  ;;  %1682 = vmatpush1.bf16.msra.mxu1 %v3610_v10  ;;  %v5668_v6 = vld [vmem:[#allocation29_spill] sm:$0xff]  ;;  %v5669_v10 = vld [vmem:[#allocation30_spill] sm:$0xff] }
 0x374   :  { %1642 = vmatprep.subr.bf16.mxu0 %v3612_v11  ;;  %1683 = vmatprep.subr.bf16.mxu1 %v3615_v15  ;;  %v5670_v11 = vld [vmem:[#allocation31_spill] sm:$0xff]  ;;  %v5671_v15 = vld [vmem:[#allocation32_spill] sm:$0xff] }
 0x377   :  { %1643 = vmatpush1.bf16.msra.mxu0 %v3619_v19  ;;  %1684 = vmatpush1.bf16.msra.mxu1 %v3623_v20  ;;  %v5672_v19 = vld [vmem:[#allocation33_spill] sm:$0xff]  ;;  %v5673_v20 = vld [vmem:[#allocation34_spill] sm:$0xff] }
 0x378   :  { %1644 = vmatprep.subr.bf16.mxu0 %v3625_v21  ;;  %1685 = vmatprep.subr.bf16.mxu1 %v5664_v4  ;;  %v5674_v21 = vld [vmem:[#allocation35_spill] sm:$0xff]  ;;  %v5675_v4 = vld [vmem:[#allocation36_spill] sm:$0xff] }
 0x37b   :  { %1645 = vmatpush1.bf16.msra.mxu0 %v5665_v9  ;;  %1686 = vmatpush1.bf16.msra.mxu1 %v5666_v55  ;;  %v5676_v9 = vld [vmem:[#allocation37_spill] sm:$0xff]  ;;  %v5677_v55 = vld [vmem:[#allocation38_spill] sm:$0xff] }
 0x37c   :  { %1646 = vmatprep.subr.bf16.mxu0 %v5667_v59  ;;  %1687 = vmatprep.subr.bf16.mxu1 %v5668_v6  ;;  %v5678_v59 = vld [vmem:[#allocation39_spill] sm:$0xff]  ;;  %v5679_v6 = vld [vmem:[#allocation40_spill] sm:$0xff] }
 0x37f   :  { %1647 = vmatpush1.bf16.msra.mxu0 %v5669_v10  ;;  %1688 = vmatpush1.bf16.msra.mxu1 %v5670_v11  ;;  %v5680_v10 = vld [vmem:[#allocation41_spill] sm:$0xff]  ;;  %v5681_v11 = vld [vmem:[#allocation42_spill] sm:$0xff] }
 0x380   :  { %1648 = vmatprep.subr.bf16.mxu0 %v5671_v15  ;;  %1689 = vmatprep.subr.bf16.mxu1 %v5672_v19  ;;  %v5682_v15 = vld [vmem:[#allocation43_spill] sm:$0xff]  ;;  %v5683_v19 = vld [vmem:[#allocation44_spill] sm:$0xff] }
 0x383   :  { %1649 = vmatpush1.bf16.msra.mxu0 %v5673_v20  ;;  %1690 = vmatpush1.bf16.msra.mxu1 %v5674_v21  ;;  %v5684_v20 = vld [vmem:[#allocation45_spill] sm:$0xff]  ;;  %v5685_v21 = vld [vmem:[#allocation46_spill] sm:$0xff] }
 0x384   :  { %1650 = vmatprep.subr.bf16.mxu0 %v5675_v4  ;;  %1691 = vmatprep.subr.bf16.mxu1 %v5676_v9  ;;  %v5686_v4 = vld [vmem:[#allocation47_spill] sm:$0xff]  ;;  %v5687_v9 = vld [vmem:[#allocation48_spill] sm:$0xff] }
 0x387   :  { %1651 = vmatpush1.bf16.msra.mxu0 %v5677_v55  ;;  %1692 = vmatpush1.bf16.msra.mxu1 %v5678_v59  ;;  %v5688_v55 = vld [vmem:[#allocation49_spill] sm:$0xff]  ;;  %v5689_v59 = vld [vmem:[#allocation50_spill] sm:$0xff] }
 0x388   :  { %1652 = vmatprep.subr.bf16.mxu0 %v5679_v6  ;;  %1693 = vmatprep.subr.bf16.mxu1 %v5680_v10  ;;  %v5690_v6 = vld [vmem:[#allocation51_spill] sm:$0xff]  ;;  %v5691_v10 = vld [vmem:[#allocation52_spill] sm:$0xff] }
 0x38b   :  { %1653 = vmatpush1.bf16.msra.mxu0 %v5681_v11  ;;  %1694 = vmatpush1.bf16.msra.mxu1 %v5682_v15  ;;  %v5692_v11 = vld [vmem:[#allocation53_spill] sm:$0xff]  ;;  %v5693_v15 = vld [vmem:[#allocation54_spill] sm:$0xff] }
 0x38c   :  { %1654 = vmatprep.subr.bf16.mxu0 %v5683_v19  ;;  %1695 = vmatprep.subr.bf16.mxu1 %v5684_v20  ;;  %v5694_v19 = vld [vmem:[#allocation55_spill] sm:$0xff]  ;;  %v5695_v20 = vld [vmem:[#allocation56_spill] sm:$0xff] }
 0x38f   :  { %1655 = vmatpush1.bf16.msra.mxu0 %v5685_v21  ;;  %1696 = vmatpush1.bf16.msra.mxu1 %v5686_v4  ;;  %v5696_v21 = vld [vmem:[#allocation57_spill] sm:$0xff]  ;;  %v5697_v4 = vld [vmem:[#allocation58_spill] sm:$0xff] }
 0x390   :  { %1656 = vmatprep.subr.bf16.mxu0 %v5687_v9  ;;  %1697 = vmatprep.subr.bf16.mxu1 %v5688_v55  ;;  %v5698_v9 = vld [vmem:[#allocation59_spill] sm:$0xff]  ;;  %v5699_v55 = vld [vmem:[#allocation60_spill] sm:$0xff] }
 0x393   :  { %1657 = vmatpush1.bf16.msra.mxu0 %v5689_v59  ;;  %1698 = vmatpush1.bf16.msra.mxu1 %v5690_v6  ;;  %v5700_v59 = vld [vmem:[#allocation61_spill] sm:$0xff]  ;;  %v5701_v6 = vld [vmem:[#allocation62_spill] sm:$0xff] }
 0x394   :  { %1658 = vmatprep.subr.bf16.mxu0 %v5691_v10  ;;  %1699 = vmatprep.subr.bf16.mxu1 %v5692_v11  ;;  %v5702_v10 = vld [vmem:[#allocation63_spill] sm:$0xff]  ;;  %v5703_v11 = vld [vmem:[#allocation64_spill] sm:$0xff] }
 0x397   :  { %1659 = vmatpush1.bf16.msra.mxu0 %v5693_v15  ;;  %1700 = vmatpush1.bf16.msra.mxu1 %v5694_v19  ;;  %v5704_v15 = vld [vmem:[#allocation65_spill] sm:$0xff]  ;;  %v5705_v19 = vld [vmem:[#allocation66_spill] sm:$0xff] }
 0x398   :  { %1660 = vmatprep.subr.bf16.mxu0 %v5695_v20  ;;  %1701 = vmatprep.subr.bf16.mxu1 %v5696_v21  ;;  %v5706_v20 = vld [vmem:[#allocation67_spill] sm:$0xff]  ;;  %v5707_v21 = vld [vmem:[#allocation68_spill] sm:$0xff] }
 0x39b   :  { %1661 = vmatpush1.bf16.msra.mxu0 %v5697_v4  ;;  %1702 = vmatpush1.bf16.msra.mxu1 %v5698_v9  ;;  %v5708_v4 = vld [vmem:[#allocation69_spill] sm:$0xff]  ;;  %v5709_v9 = vld [vmem:[#allocation70_spill] sm:$0xff] }
 0x39c   :  { %1662 = vmatprep.subr.bf16.mxu0 %v5699_v55  ;;  %1703 = vmatprep.subr.bf16.mxu1 %v5700_v59  ;;  %v5710_v55 = vld [vmem:[#allocation71_spill] sm:$0xff]  ;;  %v5711_v59 = vld [vmem:[#allocation72_spill] sm:$0xff] }
 0x39f   :  { %1663 = vmatpush1.bf16.msra.mxu0 %v5701_v6  ;;  %1704 = vmatpush1.bf16.msra.mxu1 %v5702_v10  ;;  %v5712_v6 = vld [vmem:[#allocation73_spill] sm:$0xff]  ;;  %v5713_v10 = vld [vmem:[#allocation74_spill] sm:$0xff] }
 0x3a0   :  { %1664 = vmatprep.subr.bf16.mxu0 %v5703_v11  ;;  %1705 = vmatprep.subr.bf16.mxu1 %v5704_v15  ;;  %v5714_v11 = vld [vmem:[#allocation75_spill] sm:$0xff]  ;;  %v5715_v15 = vld [vmem:[#allocation76_spill] sm:$0xff] }
 0x3a3   :  { %1665 = vmatpush1.bf16.msra.mxu0 %v5705_v19  ;;  %1706 = vmatpush1.bf16.msra.mxu1 %v5706_v20  ;;  %v5716_v19 = vld [vmem:[#allocation77_spill] sm:$0xff]  ;;  %v5717_v20 = vld [vmem:[#allocation78_spill] sm:$0xff] }
 0x3a4   :  { %1666 = vmatprep.subr.bf16.mxu0 %v5707_v21  ;;  %1707 = vmatprep.subr.bf16.mxu1 %v5708_v4  ;;  %v5718_v21 = vld [vmem:[#allocation79_spill] sm:$0xff]  ;;  %v5719_v4 = vld [vmem:[#allocation80_spill] sm:$0xff] }
 0x3a7   :  { %1667 = vmatpush1.bf16.msra.mxu0 %v5709_v9  ;;  %1708 = vmatpush1.bf16.msra.mxu1 %v5710_v55  ;;  %v5720_v9 = vld [vmem:[#allocation81_spill] sm:$0xff] }
 0x3a8   :  { %1668 = vmatprep.subr.bf16.mxu0 %v5711_v59  ;;  %1709 = vmatprep.subr.bf16.mxu1 %v5712_v6 }
 0x3ab   :  { %1669 = vmatpush1.bf16.msra.mxu0 %v5713_v10  ;;  %1710 = vmatpush1.bf16.msra.mxu1 %v5714_v11 }
 0x3ac   :  { %1670 = vmatprep.subr.bf16.mxu0 %v5715_v15  ;;  %1711 = vmatprep.subr.bf16.mxu1 %v5716_v19 }
 0x3af   :  { %1671 = vmatpush1.bf16.msra.mxu0 %v5717_v20  ;;  %1712 = vmatpush1.bf16.msra.mxu1 %v5718_v21 }
 0x3b0   :  { %1722 = vmatprep.subr.bf16.mxu0 %v5719_v4  ;;  %1763 = vmatprep.subr.bf16.mxu1 %v5720_v9 }
 0x405   :  { %v1408_v55 = vpop.f32.mrb[16].mxu0  ;;  %v1449_v59 = vpop.f32.mrb[16].mxu1 }
 0x406   :  { %v1410_v2 = vpop.f32.mrb[17].mxu0  ;;  %v1451_v6 = vpop.f32.mrb[17].mxu1 }
 0x407   :  { %v1546_v14 = vcombine.low %v1408_v55, %v1410_v2  ;;  %v1547_v10 = vcombine.low %v1449_v59, %v1451_v6  ;;  %v1412_v57 = vpop.f32.mrb[18].mxu0  ;;  %v1453_v11 = vpop.f32.mrb[18].mxu1 }
 0x408   :  { %v1413_v49 = vpop.f32.mrb[19].mxu0  ;;  %v1454_v15 = vpop.f32.mrb[19].mxu1 }
 0x409   :  { %v1556_v19 = vrot.slane %v1546_v14, %v4060_v25  ;;  %v1563_v20 = vrot.slane %v1547_v10, %v4060_v25 }
 0x40b   :  { %v1578_v56 = vcombine.low %v1556_v19, %v1563_v20  ;;  %v1360_v20 = vld [vmem:[%s1359_s26] sm:$0xff]  ;;  %s3260_s26 = sld [smem:[#allocation4 + $0x7]] }
 0x40d   :  { %v1586_v10 = vrot.slane %v1578_v56, %v4060_v25 }
 0x411   :  { %s3261_s27 = sshll.u32 %s3260_s26, 3 }
 0x412   :  { %s2689_s1 = scalar_lea.vmem [#allocation5], %s3261_s27 }
 0x445   :  { %v1490_v21 = vpop.f32.mrb[20].mxu0  ;;  %v1531_v4 = vpop.f32.mrb[20].mxu1 }
 0x446   :  { %v1492_v0 = vpop.f32.mrb[21].mxu0  ;;  %v1533_v9 = vpop.f32.mrb[21].mxu1 }
 0x447   :  { %v1548_v31 = vcombine.low %v1490_v21, %v1492_v0  ;;  %v1549_v32 = vcombine.low %v1531_v4, %v1533_v9  ;;  %v1494_v17 = vpop.f32.mrb[22].mxu0  ;;  %v1535_v16 = vpop.f32.mrb[22].mxu1  ;;  %v1619_v0 = vstv %s1618_s28 }
 0x448   :  { %v1495_v6 = vpop.f32.mrb[23].mxu0  ;;  %v1536_v2 = vpop.f32.mrb[23].mxu1  ;;  %vm1620_vm2 = vcmp.eq.s32.totalorder %v1619_v0, 1  ;;  %v5730_v0 = vld [vmem:[#allocation105_spill] sm:$0xff] }
 0x449   :  { %v1570_v11 = vrot.slane %v1548_v31, %v4060_v25  ;;  %v1577_v15 = vrot.slane %v1549_v32, %v4060_v25 }
 0x44b   :  { %v1579_v49 = vcombine.low %v1570_v11, %v1577_v15 }
 0x44d   :  { %v1593_v19 = vrot.slane %v1579_v49, %v4060_v25 }
 0x44f   :  { %v1594_v57 = vcombine.low %v1586_v10, %v1593_v19 }
 0x451   :  { %v1596_v14 = vadd.f32 %v1594_v57, %v1360_v20 }
 0x453   :  { %v3247_v21 = vmul.f32 -1.442695, %v1596_v14  ;;  %v1604_v17 = vrot.slane %v1596_v14, 6  ;;  %v5723_v14 = vld [vmem:[#allocation98_spill] sm:$0xff] }
 0x455   :  { %3357 = vpow2.f32 %v3247_v21  ;;  %v5724_v21 = vld [vmem:[#allocation99_spill] sm:$0xff] }
 0x45f   :  { %v3358_v4 = vpop.eup %3357 }
 0x460   :  { %v1600_v9 = vadd.f32 1.0, %v3358_v4  ;;  %v5725_v4 = vld [vmem:[#allocation100_spill] sm:$0xff] }
 0x462   :  { %3359 = vrcp.f32 %v1600_v9  ;;  %v5726_v9 = vld [vmem:[#allocation101_spill] sm:$0xff] }
 0x463   :  { %3361 = vtanh.f32 %v1604_v17  ;;  %v5727_v17 = vld [vmem:[#allocation102_spill] sm:$0xff] }
 0x46c   :  { %v3360_v32 = vpop.eup %3359 }
 0x46d   :  { %v1608_v31 = vrot.slane %v3360_v32, 2  ;;  %v3362_v56 = vpop.eup %3361  ;;  %v1614_v2 = vrot.slane %v3360_v32, 4 }
 0x46e   :  { %v1611_v16 = vmul.f32 %v3362_v56, %v3360_v32  ;;  %v5728_v32 = vld [vmem:[#allocation103_spill] sm:$0xff]  ;;  %v5731_v56 = vld [vmem:[#allocation106_spill] sm:$0xff] }
 0x46f   :  { %v1610_v55 = vmul.f32 %v1608_v31, %v4228_v43  ;;  %v5729_v31 = vld [vmem:[#allocation104_spill] sm:$0xff] }
 0x471   :  { %v1612_v59 = vadd.f32 %v1611_v16, %v1610_v55  ;;  %v5732_v55 = vld [vmem:[#allocation107_spill] sm:$0xff] }
 0x472   :  { %v5733_v16 = vld [vmem:[#allocation111_spill] sm:$0xff] }
 0x473   :  { %3363 = vtanh.f32 %v1612_v59  ;;  %v4382_v6 = vsel %vm1620_vm2, %v1612_v59, %v4228_v43  ;;  %v5721_v43 = vld [vmem:[#allocation96_spill] sm:$0xff]  ;;  %v5734_v59 = vld [vmem:[#allocation133_spill] sm:$0xff] }
 0x47d   :  { %v3364_v11 = vpop.eup %3363 }
 0x47e   :  { %v1616_v15 = vmul.f32 %v3364_v11, %v1614_v2  ;;  %v5735_v2 = vld [vmem:[#allocation134_spill] sm:$0xff]  ;;  %v5736_v11 = vld [vmem:[#allocation135_spill] sm:$0xff] }
 0x480   :  { %v4385_v49 = vsel %vm1620_vm2, %v1616_v15, %v4231_v38  ;;  %v5722_v38 = vld [vmem:[#allocation97_spill] sm:$0xff]  ;;  %v5737_v15 = vld [vmem:[#allocation136_spill] sm:$0xff] }
 0x481   :  { %v1635_v10 = vrot.slane %v4385_v49, %v4073_v12  ;;  %v1631_v19 = vrot.slane %v4385_v49, %v4075_v40 }
 0x483   :  { %v1639_v20 = vpack.c.bf16 %v1635_v10, %v1635_v10  ;;  %v4391_v57 = vpack.c.bf16 %v1631_v19, %v1631_v19  ;;  %v5738_v10 = vld [vmem:[#allocation137_spill] sm:$0xff]  ;;  %v5739_v19 = vld [vmem:[#allocation138_spill] sm:$0xff] }
 0x485   :  { %1672 = vmatprep.mubr.bf16.mxu0 %v1639_v20  ;;  %1713 = vmatprep.mubr.bf16.mxu1 %v1639_v20 }
 0x486   :  { %1673 = vmatmul.mubr.bf16.vlgmr.msra.gmra.mrb[24].mxu0 %v4391_v57  ;;  %1714 = vmatmul.mubr.bf16.vlgmr.msra.gmra.mrb[24].mxu1 %v4391_v57 }
 0x487   :  { %1723 = vmatpush1.bf16.msra.mxu0 %v5545_v34  ;;  %1764 = vmatpush1.bf16.msra.mxu1 %v5546_v7 }
 0x488   :  { %1754 = vmatprep.mubr.bf16.mxu0 %v1639_v20  ;;  %1795 = vmatprep.mubr.bf16.mxu1 %v1639_v20  ;;  %v5740_v20 = vld [vmem:[#allocation139_spill] sm:$0xff] }
 0x489   :  { %1724 = vmatprep.subr.bf16.mxu0 %v5547_v48  ;;  %1765 = vmatprep.subr.bf16.mxu1 %v5548_v62 }
 0x48b   :  { %1725 = vmatpush1.bf16.msra.mxu0 %v5549_v3  ;;  %1766 = vmatpush1.bf16.msra.mxu1 %v5631_v23 }
 0x48c   :  { %1726 = vmatprep.subr.bf16.mxu0 %v5632_v50  ;;  %1767 = vmatprep.subr.bf16.mxu1 %v5633_v60 }
 0x48f   :  { %1727 = vmatpush1.bf16.msra.mxu0 %v5634_v30  ;;  %1768 = vmatpush1.bf16.msra.mxu1 %v5635_v27 }
 0x490   :  { %1728 = vmatprep.subr.bf16.mxu0 %v5636_v22  ;;  %1769 = vmatprep.subr.bf16.mxu1 %v5637_v44 }
 0x493   :  { %1729 = vmatpush1.bf16.msra.mxu0 %v5638_v28  ;;  %1770 = vmatpush1.bf16.msra.mxu1 %v5639_v29 }
 0x494   :  { %1730 = vmatprep.subr.bf16.mxu0 %v5721_v43  ;;  %1771 = vmatprep.subr.bf16.mxu1 %v5722_v38 }
 0x497   :  { %1731 = vmatpush1.bf16.msra.mxu0 %v5723_v14  ;;  %1772 = vmatpush1.bf16.msra.mxu1 %v5724_v21 }
 0x498   :  { %1732 = vmatprep.subr.bf16.mxu0 %v5725_v4  ;;  %1773 = vmatprep.subr.bf16.mxu1 %v5726_v9 }
 0x49b   :  { %1733 = vmatpush1.bf16.msra.mxu0 %v5727_v17  ;;  %1774 = vmatpush1.bf16.msra.mxu1 %v5728_v32 }
 0x49c   :  { %1734 = vmatprep.subr.bf16.mxu0 %v5729_v31  ;;  %1775 = vmatprep.subr.bf16.mxu1 %v5730_v0 }
 0x49f   :  { %1735 = vmatpush1.bf16.msra.mxu0 %v5731_v56  ;;  %1776 = vmatpush1.bf16.msra.mxu1 %v5732_v55 }
 0x4a0   :  { %1736 = vmatprep.subr.bf16.mxu0 %v5652_v45  ;;  %1777 = vmatprep.subr.bf16.mxu1 %v5653_v46 }
 0x4a3   :  { %1737 = vmatpush1.bf16.msra.mxu0 %v5654_v61  ;;  %1778 = vmatpush1.bf16.msra.mxu1 %v5733_v16 }
 0x4a4   :  { %1738 = vmatprep.subr.bf16.mxu0 %v5656_v37  ;;  %1779 = vmatprep.subr.bf16.mxu1 %v5657_v36 }
 0x4a7   :  { %1739 = vmatpush1.bf16.msra.mxu0 %v5658_v51  ;;  %1780 = vmatpush1.bf16.msra.mxu1 %v5659_v52 }
 0x4a8   :  { %1740 = vmatprep.subr.bf16.mxu0 %v5660_v53  ;;  %1781 = vmatprep.subr.bf16.mxu1 %v5661_v54 }
 0x4ab   :  { %1741 = vmatpush1.bf16.msra.mxu0 %v5662_v35  ;;  %1782 = vmatpush1.bf16.msra.mxu1 %v5582_v42 }
 0x4ac   :  { %1742 = vmatprep.subr.bf16.mxu0 %v5583_v13  ;;  %1783 = vmatprep.subr.bf16.mxu1 %v5584_v39 }
 0x4af   :  { %1743 = vmatpush1.bf16.msra.mxu0 %v5663_v5  ;;  %1784 = vmatpush1.bf16.msra.mxu1 %v5586_v33 }
 0x4b0   :  { %1744 = vmatprep.subr.bf16.mxu0 %v5587_v47  ;;  %1785 = vmatprep.subr.bf16.mxu1 %v5588_v18 }
 0x4b3   :  { %1745 = vmatpush1.bf16.msra.mxu0 %v5589_v24  ;;  %1786 = vmatpush1.bf16.msra.mxu1 %v5590_v41 }
 0x4b4   :  { %1746 = vmatprep.subr.bf16.mxu0 %v5591_v26  ;;  %1787 = vmatprep.subr.bf16.mxu1 %v5592_v8  ;;  %v5741_v8 = vld [vmem:[#allocation140_spill] sm:$0xff] }
 0x4b7   :  { %1747 = vmatpush1.bf16.msra.mxu0 %v3947_v58  ;;  %1788 = vmatpush1.bf16.msra.mxu1 %v3951_v63  ;;  %v5742_v58 = vld [vmem:[#allocation141_spill] sm:$0xff]  ;;  %v5743_v63 = vld [vmem:[#allocation142_spill] sm:$0xff] }
 0x4b8   :  { %1748 = vmatprep.subr.bf16.mxu0 %v3953_v1  ;;  %1789 = vmatprep.subr.bf16.mxu1 %v5734_v59  ;;  %v5744_v1 = vld [vmem:[#allocation143_spill] sm:$0xff]  ;;  %v5745_v59 = vld [vmem:[#allocation16_spill] sm:$0xff] }
 0x4bb   :  { %1749 = vmatpush1.bf16.msra.mxu0 %v5735_v2  ;;  %1790 = vmatpush1.bf16.msra.mxu1 %v5736_v11  ;;  %v5746_v2 = vld [vmem:[#allocation18_spill] sm:$0xff] }
 0x4bc   :  { %1750 = vmatprep.subr.bf16.mxu0 %v5737_v15  ;;  %1791 = vmatprep.subr.bf16.mxu1 %v5738_v10  ;;  %v5747_v10 = vld [vmem:[#allocation17_spill] sm:$0xff]  ;;  %v5756_v15 = vld [vmem:[#allocation27_spill] sm:$0xff] }
 0x4bf   :  { %1751 = vmatpush1.bf16.msra.mxu0 %v5739_v19  ;;  %1792 = vmatpush1.bf16.msra.mxu1 %v5740_v20  ;;  %v5748_v19 = vld [vmem:[#allocation19_spill] sm:$0xff]  ;;  %v5749_v20 = vld [vmem:[#allocation20_spill] sm:$0xff] }
 0x4c0   :  { %1752 = vmatprep.subr.bf16.mxu0 %v5741_v8  ;;  %1793 = vmatprep.subr.bf16.mxu1 %v5742_v58  ;;  %v5750_v8 = vld [vmem:[#allocation21_spill] sm:$0xff]  ;;  %v5751_v58 = vld [vmem:[#allocation22_spill] sm:$0xff] }
 0x4c3   :  { %1753 = vmatpush1.bf16.msra.mxu0 %v5743_v63  ;;  %1794 = vmatpush1.bf16.msra.mxu1 %v5744_v1  ;;  %v5752_v63 = vld [vmem:[#allocation23_spill] sm:$0xff]  ;;  %v5753_v1 = vld [vmem:[#allocation24_spill] sm:$0xff] }
 0x4c4   :  { %1906 = vmatprep.subr.bf16.mxu0 %v5745_v59  ;;  %1947 = vmatprep.subr.bf16.mxu1 %v5746_v2  ;;  %v5754_v59 = vld [vmem:[#allocation25_spill] sm:$0xff]  ;;  %v5755_v2 = vld [vmem:[#allocation26_spill] sm:$0xff] }
 0x4c6   :  { %1755 = vmatmul.mubr.bf16.vlgmr.msra.gmra.mrb[28].mxu0 %v4391_v57  ;;  %1796 = vmatmul.mubr.bf16.vlgmr.msra.gmra.mrb[28].mxu1 %v4391_v57  ;;  %v5757_v57 = vld [vmem:[#allocation28_spill] sm:$0xff] }
 0x4c7   :  { %1907 = vmatpush1.bf16.msra.mxu0 %v5747_v10  ;;  %1948 = vmatpush1.bf16.msra.mxu1 %v5748_v19  ;;  %v5758_v10 = vld [vmem:[#allocation29_spill] sm:$0xff]  ;;  %v5759_v19 = vld [vmem:[#allocation30_spill] sm:$0xff] }
 0x4c8   :  { %1908 = vmatprep.subr.bf16.mxu0 %v5749_v20  ;;  %1949 = vmatprep.subr.bf16.mxu1 %v5750_v8  ;;  %v5760_v20 = vld [vmem:[#allocation31_spill] sm:$0xff]  ;;  %v5761_v8 = vld [vmem:[#allocation32_spill] sm:$0xff] }
 0x4cb   :  { %1909 = vmatpush1.bf16.msra.mxu0 %v5751_v58  ;;  %1950 = vmatpush1.bf16.msra.mxu1 %v5752_v63  ;;  %v5762_v58 = vld [vmem:[#allocation33_spill] sm:$0xff]  ;;  %v5763_v63 = vld [vmem:[#allocation34_spill] sm:$0xff] }
 0x4cc   :  { %1910 = vmatprep.subr.bf16.mxu0 %v5753_v1  ;;  %1951 = vmatprep.subr.bf16.mxu1 %v5754_v59  ;;  %v5764_v1 = vld [vmem:[#allocation35_spill] sm:$0xff]  ;;  %v5765_v59 = vld [vmem:[#allocation36_spill] sm:$0xff] }
 0x4cf   :  { %1911 = vmatpush1.bf16.msra.mxu0 %v5755_v2  ;;  %1952 = vmatpush1.bf16.msra.mxu1 %v5756_v15  ;;  %v5766_v2 = vld [vmem:[#allocation37_spill] sm:$0xff]  ;;  %v5767_v15 = vld [vmem:[#allocation38_spill] sm:$0xff] }
 0x4d0   :  { %1912 = vmatprep.subr.bf16.mxu0 %v5757_v57  ;;  %1953 = vmatprep.subr.bf16.mxu1 %v5758_v10  ;;  %v5768_v57 = vld [vmem:[#allocation39_spill] sm:$0xff]  ;;  %v5769_v10 = vld [vmem:[#allocation40_spill] sm:$0xff] }
 0x4d3   :  { %1913 = vmatpush1.bf16.msra.mxu0 %v5759_v19  ;;  %1954 = vmatpush1.bf16.msra.mxu1 %v5760_v20  ;;  %v5770_v19 = vld [vmem:[#allocation41_spill] sm:$0xff]  ;;  %v5771_v20 = vld [vmem:[#allocation42_spill] sm:$0xff] }
 0x4d4   :  { %1914 = vmatprep.subr.bf16.mxu0 %v5761_v8  ;;  %1955 = vmatprep.subr.bf16.mxu1 %v5762_v58  ;;  %v5772_v8 = vld [vmem:[#allocation43_spill] sm:$0xff]  ;;  %v5773_v58 = vld [vmem:[#allocation44_spill] sm:$0xff] }
 0x4d7   :  { %1915 = vmatpush1.bf16.msra.mxu0 %v5763_v63  ;;  %1956 = vmatpush1.bf16.msra.mxu1 %v5764_v1  ;;  %v5774_v63 = vld [vmem:[#allocation45_spill] sm:$0xff]  ;;  %v5775_v1 = vld [vmem:[#allocation46_spill] sm:$0xff] }
 0x4d8   :  { %1916 = vmatprep.subr.bf16.mxu0 %v5765_v59  ;;  %1957 = vmatprep.subr.bf16.mxu1 %v5766_v2  ;;  %v5776_v59 = vld [vmem:[#allocation47_spill] sm:$0xff]  ;;  %v5777_v2 = vld [vmem:[#allocation48_spill] sm:$0xff] }
 0x4db   :  { %1917 = vmatpush1.bf16.msra.mxu0 %v5767_v15  ;;  %1958 = vmatpush1.bf16.msra.mxu1 %v5768_v57  ;;  %v5778_v15 = vld [vmem:[#allocation49_spill] sm:$0xff]  ;;  %v5779_v57 = vld [vmem:[#allocation50_spill] sm:$0xff] }
 0x4dc   :  { %1918 = vmatprep.subr.bf16.mxu0 %v5769_v10  ;;  %1959 = vmatprep.subr.bf16.mxu1 %v5770_v19  ;;  %v5780_v10 = vld [vmem:[#allocation51_spill] sm:$0xff]  ;;  %v5781_v19 = vld [vmem:[#allocation52_spill] sm:$0xff] }
 0x4df   :  { %1919 = vmatpush1.bf16.msra.mxu0 %v5771_v20  ;;  %1960 = vmatpush1.bf16.msra.mxu1 %v5772_v8  ;;  %v5782_v20 = vld [vmem:[#allocation53_spill] sm:$0xff]  ;;  %v5783_v8 = vld [vmem:[#allocation54_spill] sm:$0xff] }
 0x4e0   :  { %1920 = vmatprep.subr.bf16.mxu0 %v5773_v58  ;;  %1961 = vmatprep.subr.bf16.mxu1 %v5774_v63  ;;  %v5784_v58 = vld [vmem:[#allocation55_spill] sm:$0xff]  ;;  %v5785_v63 = vld [vmem:[#allocation56_spill] sm:$0xff] }
 0x4e3   :  { %1921 = vmatpush1.bf16.msra.mxu0 %v5775_v1  ;;  %1962 = vmatpush1.bf16.msra.mxu1 %v5776_v59  ;;  %v5786_v1 = vld [vmem:[#allocation57_spill] sm:$0xff]  ;;  %v5787_v59 = vld [vmem:[#allocation58_spill] sm:$0xff] }
 0x4e4   :  { %1922 = vmatprep.subr.bf16.mxu0 %v5777_v2  ;;  %1963 = vmatprep.subr.bf16.mxu1 %v5778_v15  ;;  %v5788_v2 = vld [vmem:[#allocation59_spill] sm:$0xff]  ;;  %v5789_v15 = vld [vmem:[#allocation60_spill] sm:$0xff] }
 0x4e7   :  { %1923 = vmatpush1.bf16.msra.mxu0 %v5779_v57  ;;  %1964 = vmatpush1.bf16.msra.mxu1 %v5780_v10  ;;  %v5790_v57 = vld [vmem:[#allocation61_spill] sm:$0xff]  ;;  %v5791_v10 = vld [vmem:[#allocation62_spill] sm:$0xff] }
 0x4e8   :  { %1924 = vmatprep.subr.bf16.mxu0 %v5781_v19  ;;  %1965 = vmatprep.subr.bf16.mxu1 %v5782_v20  ;;  %v5792_v19 = vld [vmem:[#allocation63_spill] sm:$0xff]  ;;  %v5793_v20 = vld [vmem:[#allocation64_spill] sm:$0xff] }
 0x4eb   :  { %1925 = vmatpush1.bf16.msra.mxu0 %v5783_v8  ;;  %1966 = vmatpush1.bf16.msra.mxu1 %v5784_v58  ;;  %v5794_v8 = vld [vmem:[#allocation65_spill] sm:$0xff]  ;;  %v5795_v58 = vld [vmem:[#allocation66_spill] sm:$0xff] }
 0x4ec   :  { %1926 = vmatprep.subr.bf16.mxu0 %v5785_v63  ;;  %1967 = vmatprep.subr.bf16.mxu1 %v5786_v1  ;;  %v5796_v63 = vld [vmem:[#allocation67_spill] sm:$0xff]  ;;  %v5797_v1 = vld [vmem:[#allocation68_spill] sm:$0xff] }
 0x4ef   :  { %1927 = vmatpush1.bf16.msra.mxu0 %v5787_v59  ;;  %1968 = vmatpush1.bf16.msra.mxu1 %v5788_v2  ;;  %v5798_v59 = vld [vmem:[#allocation69_spill] sm:$0xff]  ;;  %v5799_v2 = vld [vmem:[#allocation70_spill] sm:$0xff] }
 0x4f0   :  { %1928 = vmatprep.subr.bf16.mxu0 %v5789_v15  ;;  %1969 = vmatprep.subr.bf16.mxu1 %v5790_v57  ;;  %v5800_v15 = vld [vmem:[#allocation71_spill] sm:$0xff]  ;;  %v5801_v57 = vld [vmem:[#allocation72_spill] sm:$0xff] }
 0x4f3   :  { %1929 = vmatpush1.bf16.msra.mxu0 %v5791_v10  ;;  %1970 = vmatpush1.bf16.msra.mxu1 %v5792_v19  ;;  %v5802_v10 = vld [vmem:[#allocation73_spill] sm:$0xff]  ;;  %v5803_v19 = vld [vmem:[#allocation74_spill] sm:$0xff] }
 0x4f4   :  { %1930 = vmatprep.subr.bf16.mxu0 %v5793_v20  ;;  %1971 = vmatprep.subr.bf16.mxu1 %v5794_v8  ;;  %v5804_v20 = vld [vmem:[#allocation75_spill] sm:$0xff]  ;;  %v5805_v8 = vld [vmem:[#allocation76_spill] sm:$0xff] }
 0x4f7   :  { %1931 = vmatpush1.bf16.msra.mxu0 %v5795_v58  ;;  %1972 = vmatpush1.bf16.msra.mxu1 %v5796_v63  ;;  %v5806_v58 = vld [vmem:[#allocation77_spill] sm:$0xff]  ;;  %v5807_v63 = vld [vmem:[#allocation78_spill] sm:$0xff] }
 0x4f8   :  { %1932 = vmatprep.subr.bf16.mxu0 %v5797_v1  ;;  %1973 = vmatprep.subr.bf16.mxu1 %v5798_v59  ;;  %v5808_v1 = vld [vmem:[#allocation79_spill] sm:$0xff]  ;;  %v5809_v59 = vld [vmem:[#allocation80_spill] sm:$0xff] }
 0x4fb   :  { %1933 = vmatpush1.bf16.msra.mxu0 %v5799_v2  ;;  %1974 = vmatpush1.bf16.msra.mxu1 %v5800_v15  ;;  %v5810_v2 = vld [vmem:[#allocation81_spill] sm:$0xff] }
 0x4fc   :  { %1934 = vmatprep.subr.bf16.mxu0 %v5801_v57  ;;  %1975 = vmatprep.subr.bf16.mxu1 %v5802_v10 }
 0x4ff   :  { %1935 = vmatpush1.bf16.msra.mxu0 %v5803_v19  ;;  %1976 = vmatpush1.bf16.msra.mxu1 %v5804_v20 }
 0x500   :  { %1936 = vmatprep.subr.bf16.mxu0 %v5805_v8  ;;  %1977 = vmatprep.subr.bf16.mxu1 %v5806_v58 }
 0x503   :  { %1937 = vmatpush1.bf16.msra.mxu0 %v5807_v63  ;;  %1978 = vmatpush1.bf16.msra.mxu1 %v5808_v1 }
 0x504   :  { %1988 = vmatprep.subr.bf16.mxu0 %v5809_v59  ;;  %2029 = vmatprep.subr.bf16.mxu1 %v5810_v2 }
 0x559   :  { %v1674_v15 = vpop.f32.mrb[24].mxu0  ;;  %v1715_v57 = vpop.f32.mrb[24].mxu1 }
 0x55a   :  { %v1676_v11 = vpop.f32.mrb[25].mxu0  ;;  %v1717_v10 = vpop.f32.mrb[25].mxu1 }
 0x55b   :  { %v1812_v26 = vcombine.low %v1674_v15, %v1676_v11  ;;  %v1813_v19 = vcombine.low %v1715_v57, %v1717_v10  ;;  %v1678_v41 = vpop.f32.mrb[26].mxu0  ;;  %v1719_v20 = vpop.f32.mrb[26].mxu1 }
 0x55c   :  { %v1679_v24 = vpop.f32.mrb[27].mxu0  ;;  %v1720_v8 = vpop.f32.mrb[27].mxu1 }
 0x55d   :  { %v1822_v58 = vrot.slane %v1812_v26, %v4060_v25  ;;  %v1829_v63 = vrot.slane %v1813_v19, %v4060_v25 }
 0x55f   :  { %v1844_v18 = vcombine.low %v1822_v58, %v1829_v63  ;;  %v1626_v63 = vld [vmem:[%s1625_s7] sm:$0xff] }
 0x561   :  { %v1852_v15 = vrot.slane %v1844_v18, %v4060_v25 }
 0x599   :  { %v1756_v1 = vpop.f32.mrb[28].mxu0  ;;  %v1797_v59 = vpop.f32.mrb[28].mxu1 }
 0x59a   :  { %v1758_v47 = vpop.f32.mrb[29].mxu0  ;;  %v1799_v2 = vpop.f32.mrb[29].mxu1 }
 0x59b   :  { %v1814_v33 = vcombine.low %v1756_v1, %v1758_v47  ;;  %v1815_v5 = vcombine.low %v1797_v59, %v1799_v2  ;;  %v1760_v39 = vpop.f32.mrb[30].mxu0  ;;  %v1801_v13 = vpop.f32.mrb[30].mxu1 }
 0x59c   :  { %v1761_v11 = vpop.f32.mrb[31].mxu0  ;;  %v1802_v41 = vpop.f32.mrb[31].mxu1 }
 0x59d   :  { %v1836_v24 = vrot.slane %v1814_v33, %v4060_v25  ;;  %v1843_v8 = vrot.slane %v1815_v5, %v4060_v25  ;;  %v1885_v5 = vstv %s1884_s10  ;;  %s3491_s10 = scalar_lea.vmem %s3087_s9, 32 }
 0x59e   :  { %vm1886_vm3 = vcmp.eq.s32.totalorder %v1885_v5, 1  ;;  %v5820_v5 = vld [vmem:[#allocation129_spill] sm:$0xff] }
 0x59f   :  { %v1845_v26 = vcombine.low %v1836_v24, %v1843_v8 }
 0x5a1   :  { %v1859_v58 = vrot.slane %v1845_v26, %v4060_v25 }
 0x5a3   :  { %v1860_v10 = vcombine.low %v1852_v15, %v1859_v58 }
 0x5a5   :  { %v1862_v19 = vadd.f32 %v1860_v10, %v1626_v63 }
 0x5a7   :  { %v3250_v1 = vmul.f32 -1.442695, %v1862_v19  ;;  %v1870_v47 = vrot.slane %v1862_v19, 6  ;;  %v5813_v19 = vld [vmem:[#allocation122_spill] sm:$0xff] }
 0x5a9   :  { %3365 = vpow2.f32 %v3250_v1  ;;  %v5814_v1 = vld [vmem:[#allocation123_spill] sm:$0xff] }
 0x5b3   :  { %v3366_v39 = vpop.eup %3365 }
 0x5b4   :  { %v1866_v13 = vadd.f32 1.0, %v3366_v39  ;;  %v5815_v39 = vld [vmem:[#allocation124_spill] sm:$0xff] }
 0x5b6   :  { %3367 = vrcp.f32 %v1866_v13  ;;  %v5816_v13 = vld [vmem:[#allocation125_spill] sm:$0xff] }
 0x5b7   :  { %3369 = vtanh.f32 %v1870_v47  ;;  %v5817_v47 = vld [vmem:[#allocation126_spill] sm:$0xff] }
 0x5c0   :  { %v3368_v33 = vpop.eup %3367 }
 0x5c1   :  { %v1874_v18 = vrot.slane %v3368_v33, 2  ;;  %v3370_v59 = vpop.eup %3369  ;;  %v1880_v41 = vrot.slane %v3368_v33, 4 }
 0x5c2   :  { %v1877_v20 = vmul.f32 %v3370_v59, %v3368_v33  ;;  %v5818_v33 = vld [vmem:[#allocation127_spill] sm:$0xff]  ;;  %v5821_v59 = vld [vmem:[#allocation130_spill] sm:$0xff] }
 0x5c3   :  { %v1876_v2 = vmul.f32 %v1874_v18, %v4382_v6  ;;  %v5819_v18 = vld [vmem:[#allocation128_spill] sm:$0xff] }
 0x5c5   :  { %v1878_v57 = vadd.f32 %v1877_v20, %v1876_v2  ;;  %v5822_v2 = vld [vmem:[#allocation131_spill] sm:$0xff]  ;;  %v5823_v20 = vld [vmem:[#allocation132_spill] sm:$0xff] }
 0x5c7   :  { %3371 = vtanh.f32 %v1878_v57  ;;  %v4536_v11 = vsel %vm1886_vm3, %v1878_v57, %v4382_v6  ;;  %v5811_v6 = vld [vmem:[#allocation120_spill] sm:$0xff]  ;;  %v5824_v57 = vld [vmem:[#allocation133_spill] sm:$0xff] }
 0x5d1   :  { %v3372_v24 = vpop.eup %3371 }
 0x5d2   :  { %v1882_v8 = vmul.f32 %v3372_v24, %v1880_v41  ;;  %v5825_v41 = vld [vmem:[#allocation134_spill] sm:$0xff]  ;;  %v5826_v24 = vld [vmem:[#allocation135_spill] sm:$0xff] }
 0x5d4   :  { %v4539_v26 = vsel %vm1886_vm3, %v1882_v8, %v4385_v49  ;;  %v5812_v49 = vld [vmem:[#allocation121_spill] sm:$0xff]  ;;  %v5827_v8 = vld [vmem:[#allocation136_spill] sm:$0xff] }
 0x5d5   :  { %v1901_v15 = vrot.slane %v4539_v26, %v4073_v12  ;;  %v1897_v58 = vrot.slane %v4539_v26, %v4075_v40 }
 0x5d7   :  { %v1905_v63 = vpack.c.bf16 %v1901_v15, %v1901_v15  ;;  %v4545_v10 = vpack.c.bf16 %v1897_v58, %v1897_v58  ;;  %v5828_v15 = vld [vmem:[#allocation137_spill] sm:$0xff]  ;;  %v5829_v58 = vld [vmem:[#allocation138_spill] sm:$0xff] }
 0x5d9   :  { %1938 = vmatprep.mubr.bf16.mxu0 %v1905_v63  ;;  %1979 = vmatprep.mubr.bf16.mxu1 %v1905_v63 }
 0x5da   :  { %1939 = vmatmul.mubr.bf16.vlgmr.msra.gmra.mrb[32].mxu0 %v4545_v10  ;;  %1980 = vmatmul.mubr.bf16.vlgmr.msra.gmra.mrb[32].mxu1 %v4545_v10 }
 0x5db   :  { %1989 = vmatpush1.bf16.msra.mxu0 %v5545_v34  ;;  %2030 = vmatpush1.bf16.msra.mxu1 %v5546_v7 }
 0x5dc   :  { %2020 = vmatprep.mubr.bf16.mxu0 %v1905_v63  ;;  %2061 = vmatprep.mubr.bf16.mxu1 %v1905_v63  ;;  %v5830_v63 = vld [vmem:[#allocation139_spill] sm:$0xff] }
 0x5dd   :  { %1990 = vmatprep.subr.bf16.mxu0 %v5547_v48  ;;  %2031 = vmatprep.subr.bf16.mxu1 %v5548_v62 }
 0x5df   :  { %1991 = vmatpush1.bf16.msra.mxu0 %v5549_v3  ;;  %2032 = vmatpush1.bf16.msra.mxu1 %v5631_v23 }
 0x5e0   :  { %1992 = vmatprep.subr.bf16.mxu0 %v5632_v50  ;;  %2033 = vmatprep.subr.bf16.mxu1 %v5633_v60 }
 0x5e3   :  { %1993 = vmatpush1.bf16.msra.mxu0 %v5634_v30  ;;  %2034 = vmatpush1.bf16.msra.mxu1 %v5635_v27 }
 0x5e4   :  { %1994 = vmatprep.subr.bf16.mxu0 %v5636_v22  ;;  %2035 = vmatprep.subr.bf16.mxu1 %v5637_v44 }
 0x5e7   :  { %1995 = vmatpush1.bf16.msra.mxu0 %v5638_v28  ;;  %2036 = vmatpush1.bf16.msra.mxu1 %v5639_v29 }
 0x5e8   :  { %1996 = vmatprep.subr.bf16.mxu0 %v5721_v43  ;;  %2037 = vmatprep.subr.bf16.mxu1 %v5722_v38 }
 0x5eb   :  { %1997 = vmatpush1.bf16.msra.mxu0 %v5723_v14  ;;  %2038 = vmatpush1.bf16.msra.mxu1 %v5724_v21 }
 0x5ec   :  { %1998 = vmatprep.subr.bf16.mxu0 %v5725_v4  ;;  %2039 = vmatprep.subr.bf16.mxu1 %v5726_v9 }
 0x5ef   :  { %1999 = vmatpush1.bf16.msra.mxu0 %v5727_v17  ;;  %2040 = vmatpush1.bf16.msra.mxu1 %v5728_v32 }
 0x5f0   :  { %2000 = vmatprep.subr.bf16.mxu0 %v5729_v31  ;;  %2041 = vmatprep.subr.bf16.mxu1 %v5730_v0 }
 0x5f3   :  { %2001 = vmatpush1.bf16.msra.mxu0 %v5731_v56  ;;  %2042 = vmatpush1.bf16.msra.mxu1 %v5732_v55 }
 0x5f4   :  { %2002 = vmatprep.subr.bf16.mxu0 %v5652_v45  ;;  %2043 = vmatprep.subr.bf16.mxu1 %v5653_v46 }
 0x5f7   :  { %2003 = vmatpush1.bf16.msra.mxu0 %v5654_v61  ;;  %2044 = vmatpush1.bf16.msra.mxu1 %v5733_v16 }
 0x5f8   :  { %2004 = vmatprep.subr.bf16.mxu0 %v5656_v37  ;;  %2045 = vmatprep.subr.bf16.mxu1 %v5657_v36 }
 0x5fb   :  { %2005 = vmatpush1.bf16.msra.mxu0 %v5658_v51  ;;  %2046 = vmatpush1.bf16.msra.mxu1 %v5659_v52 }
 0x5fc   :  { %2006 = vmatprep.subr.bf16.mxu0 %v5660_v53  ;;  %2047 = vmatprep.subr.bf16.mxu1 %v5661_v54 }
 0x5ff   :  { %2007 = vmatpush1.bf16.msra.mxu0 %v5662_v35  ;;  %2048 = vmatpush1.bf16.msra.mxu1 %v5582_v42 }
 0x600   :  { %2008 = vmatprep.subr.bf16.mxu0 %v5811_v6  ;;  %2049 = vmatprep.subr.bf16.mxu1 %v5812_v49 }
 0x603   :  { %2009 = vmatpush1.bf16.msra.mxu0 %v5813_v19  ;;  %2050 = vmatpush1.bf16.msra.mxu1 %v5814_v1 }
 0x604   :  { %2010 = vmatprep.subr.bf16.mxu0 %v5815_v39  ;;  %2051 = vmatprep.subr.bf16.mxu1 %v5816_v13 }
 0x607   :  { %2011 = vmatpush1.bf16.msra.mxu0 %v5817_v47  ;;  %2052 = vmatpush1.bf16.msra.mxu1 %v5818_v33 }
 0x608   :  { %2012 = vmatprep.subr.bf16.mxu0 %v5819_v18  ;;  %2053 = vmatprep.subr.bf16.mxu1 %v5820_v5  ;;  %v5831_v5 = vld [vmem:[#allocation140_spill] sm:$0xff] }
 0x60b   :  { %2013 = vmatpush1.bf16.msra.mxu0 %v5821_v59  ;;  %2054 = vmatpush1.bf16.msra.mxu1 %v5822_v2  ;;  %v5832_v59 = vld [vmem:[#allocation141_spill] sm:$0xff]  ;;  %v5833_v2 = vld [vmem:[#allocation142_spill] sm:$0xff] }
 0x60c   :  { %2014 = vmatprep.subr.bf16.mxu0 %v5823_v20  ;;  %2055 = vmatprep.subr.bf16.mxu1 %v5824_v57  ;;  %v5834_v20 = vld [vmem:[#allocation143_spill] sm:$0xff]  ;;  %v5835_v57 = vld [vmem:[#allocation16_spill] sm:$0xff] }
 0x60f   :  { %2015 = vmatpush1.bf16.msra.mxu0 %v5825_v41  ;;  %2056 = vmatpush1.bf16.msra.mxu1 %v5826_v24  ;;  %v5836_v41 = vld [vmem:[#allocation18_spill] sm:$0xff] }
 0x610   :  { %2016 = vmatprep.subr.bf16.mxu0 %v5827_v8  ;;  %2057 = vmatprep.subr.bf16.mxu1 %v5828_v15  ;;  %v5837_v15 = vld [vmem:[#allocation17_spill] sm:$0xff]  ;;  %v5846_v8 = vld [vmem:[#allocation27_spill] sm:$0xff] }
 0x613   :  { %2017 = vmatpush1.bf16.msra.mxu0 %v5829_v58  ;;  %2058 = vmatpush1.bf16.msra.mxu1 %v5830_v63  ;;  %v5838_v58 = vld [vmem:[#allocation19_spill] sm:$0xff]  ;;  %v5839_v63 = vld [vmem:[#allocation20_spill] sm:$0xff] }
 0x614   :  { %2018 = vmatprep.subr.bf16.mxu0 %v5831_v5  ;;  %2059 = vmatprep.subr.bf16.mxu1 %v5832_v59  ;;  %v5840_v5 = vld [vmem:[#allocation21_spill] sm:$0xff]  ;;  %v5841_v59 = vld [vmem:[#allocation22_spill] sm:$0xff] }
 0x617   :  { %2019 = vmatpush1.bf16.msra.mxu0 %v5833_v2  ;;  %2060 = vmatpush1.bf16.msra.mxu1 %v5834_v20  ;;  %v5842_v2 = vld [vmem:[#allocation23_spill] sm:$0xff]  ;;  %v5843_v20 = vld [vmem:[#allocation24_spill] sm:$0xff] }
 0x618   :  { %2172 = vmatprep.subr.bf16.mxu0 %v5835_v57  ;;  %2213 = vmatprep.subr.bf16.mxu1 %v5836_v41  ;;  %v5844_v57 = vld [vmem:[#allocation25_spill] sm:$0xff]  ;;  %v5845_v41 = vld [vmem:[#allocation26_spill] sm:$0xff] }
 0x61a   :  { %2021 = vmatmul.mubr.bf16.vlgmr.msra.gmra.mrb[36].mxu0 %v4545_v10  ;;  %2062 = vmatmul.mubr.bf16.vlgmr.msra.gmra.mrb[36].mxu1 %v4545_v10  ;;  %v5847_v10 = vld [vmem:[#allocation28_spill] sm:$0xff] }
 0x61b   :  { %2173 = vmatpush1.bf16.msra.mxu0 %v5837_v15  ;;  %2214 = vmatpush1.bf16.msra.mxu1 %v5838_v58  ;;  %v5848_v15 = vld [vmem:[#allocation29_spill] sm:$0xff]  ;;  %v5849_v58 = vld [vmem:[#allocation30_spill] sm:$0xff] }
 0x61c   :  { %2174 = vmatprep.subr.bf16.mxu0 %v5839_v63  ;;  %2215 = vmatprep.subr.bf16.mxu1 %v5840_v5  ;;  %v5850_v63 = vld [vmem:[#allocation31_spill] sm:$0xff]  ;;  %v5851_v5 = vld [vmem:[#allocation32_spill] sm:$0xff] }
 0x61f   :  { %2175 = vmatpush1.bf16.msra.mxu0 %v5841_v59  ;;  %2216 = vmatpush1.bf16.msra.mxu1 %v5842_v2  ;;  %v5852_v59 = vld [vmem:[#allocation33_spill] sm:$0xff]  ;;  %v5853_v2 = vld [vmem:[#allocation34_spill] sm:$0xff] }
 0x620   :  { %2176 = vmatprep.subr.bf16.mxu0 %v5843_v20  ;;  %2217 = vmatprep.subr.bf16.mxu1 %v5844_v57  ;;  %v5854_v20 = vld [vmem:[#allocation35_spill] sm:$0xff]  ;;  %v5855_v57 = vld [vmem:[#allocation36_spill] sm:$0xff] }
 0x623   :  { %2177 = vmatpush1.bf16.msra.mxu0 %v5845_v41  ;;  %2218 = vmatpush1.bf16.msra.mxu1 %v5846_v8  ;;  %v5856_v41 = vld [vmem:[#allocation37_spill] sm:$0xff]  ;;  %v5857_v8 = vld [vmem:[#allocation38_spill] sm:$0xff] }
 0x624   :  { %2178 = vmatprep.subr.bf16.mxu0 %v5847_v10  ;;  %2219 = vmatprep.subr.bf16.mxu1 %v5848_v15  ;;  %v5858_v10 = vld [vmem:[#allocation39_spill] sm:$0xff]  ;;  %v5859_v15 = vld [vmem:[#allocation40_spill] sm:$0xff] }
 0x627   :  { %2179 = vmatpush1.bf16.msra.mxu0 %v5849_v58  ;;  %2220 = vmatpush1.bf16.msra.mxu1 %v5850_v63  ;;  %v5860_v58 = vld [vmem:[#allocation41_spill] sm:$0xff]  ;;  %v5861_v63 = vld [vmem:[#allocation42_spill] sm:$0xff] }
 0x628   :  { %2180 = vmatprep.subr.bf16.mxu0 %v5851_v5  ;;  %2221 = vmatprep.subr.bf16.mxu1 %v5852_v59  ;;  %v5862_v5 = vld [vmem:[#allocation43_spill] sm:$0xff]  ;;  %v5863_v59 = vld [vmem:[#allocation44_spill] sm:$0xff] }
 0x62b   :  { %2181 = vmatpush1.bf16.msra.mxu0 %v5853_v2  ;;  %2222 = vmatpush1.bf16.msra.mxu1 %v5854_v20  ;;  %v5864_v2 = vld [vmem:[#allocation45_spill] sm:$0xff]  ;;  %v5865_v20 = vld [vmem:[#allocation46_spill] sm:$0xff] }
 0x62c   :  { %2182 = vmatprep.subr.bf16.mxu0 %v5855_v57  ;;  %2223 = vmatprep.subr.bf16.mxu1 %v5856_v41  ;;  %v5866_v57 = vld [vmem:[#allocation47_spill] sm:$0xff]  ;;  %v5867_v41 = vld [vmem:[#allocation48_spill] sm:$0xff] }
 0x62f   :  { %2183 = vmatpush1.bf16.msra.mxu0 %v5857_v8  ;;  %2224 = vmatpush1.bf16.msra.mxu1 %v5858_v10  ;;  %v5868_v8 = vld [vmem:[#allocation49_spill] sm:$0xff]  ;;  %v5869_v10 = vld [vmem:[#allocation50_spill] sm:$0xff] }
 0x630   :  { %2184 = vmatprep.subr.bf16.mxu0 %v5859_v15  ;;  %2225 = vmatprep.subr.bf16.mxu1 %v5860_v58  ;;  %v5870_v15 = vld [vmem:[#allocation51_spill] sm:$0xff]  ;;  %v5871_v58 = vld [vmem:[#allocation52_spill] sm:$0xff] }
 0x633   :  { %2185 = vmatpush1.bf16.msra.mxu0 %v5861_v63  ;;  %2226 = vmatpush1.bf16.msra.mxu1 %v5862_v5  ;;  %v5872_v63 = vld [vmem:[#allocation53_spill] sm:$0xff]  ;;  %v5873_v5 = vld [vmem:[#allocation54_spill] sm:$0xff] }
 0x634   :  { %2186 = vmatprep.subr.bf16.mxu0 %v5863_v59  ;;  %2227 = vmatprep.subr.bf16.mxu1 %v5864_v2  ;;  %v5874_v59 = vld [vmem:[#allocation55_spill] sm:$0xff]  ;;  %v5875_v2 = vld [vmem:[#allocation56_spill] sm:$0xff] }
 0x637   :  { %2187 = vmatpush1.bf16.msra.mxu0 %v5865_v20  ;;  %2228 = vmatpush1.bf16.msra.mxu1 %v5866_v57  ;;  %v5876_v20 = vld [vmem:[#allocation57_spill] sm:$0xff]  ;;  %v5877_v57 = vld [vmem:[#allocation58_spill] sm:$0xff] }
 0x638   :  { %2188 = vmatprep.subr.bf16.mxu0 %v5867_v41  ;;  %2229 = vmatprep.subr.bf16.mxu1 %v5868_v8  ;;  %v5878_v41 = vld [vmem:[#allocation59_spill] sm:$0xff]  ;;  %v5879_v8 = vld [vmem:[#allocation60_spill] sm:$0xff] }
 0x63b   :  { %2189 = vmatpush1.bf16.msra.mxu0 %v5869_v10  ;;  %2230 = vmatpush1.bf16.msra.mxu1 %v5870_v15  ;;  %v5880_v10 = vld [vmem:[#allocation61_spill] sm:$0xff]  ;;  %v5881_v15 = vld [vmem:[#allocation62_spill] sm:$0xff] }
 0x63c   :  { %2190 = vmatprep.subr.bf16.mxu0 %v5871_v58  ;;  %2231 = vmatprep.subr.bf16.mxu1 %v5872_v63  ;;  %v5882_v58 = vld [vmem:[#allocation63_spill] sm:$0xff]  ;;  %v5883_v63 = vld [vmem:[#allocation64_spill] sm:$0xff] }
 0x63f   :  { %2191 = vmatpush1.bf16.msra.mxu0 %v5873_v5  ;;  %2232 = vmatpush1.bf16.msra.mxu1 %v5874_v59  ;;  %v5884_v5 = vld [vmem:[#allocation65_spill] sm:$0xff]  ;;  %v5885_v59 = vld [vmem:[#allocation66_spill] sm:$0xff] }
 0x640   :  { %2192 = vmatprep.subr.bf16.mxu0 %v5875_v2  ;;  %2233 = vmatprep.subr.bf16.mxu1 %v5876_v20  ;;  %v5886_v2 = vld [vmem:[#allocation67_spill] sm:$0xff]  ;;  %v5887_v20 = vld [vmem:[#allocation68_spill] sm:$0xff] }
 0x643   :  { %2193 = vmatpush1.bf16.msra.mxu0 %v5877_v57  ;;  %2234 = vmatpush1.bf16.msra.mxu1 %v5878_v41  ;;  %v5888_v57 = vld [vmem:[#allocation69_spill] sm:$0xff]  ;;  %v5889_v41 = vld [vmem:[#allocation70_spill] sm:$0xff] }
 0x644   :  { %2194 = vmatprep.subr.bf16.mxu0 %v5879_v8  ;;  %2235 = vmatprep.subr.bf16.mxu1 %v5880_v10  ;;  %v5890_v8 = vld [vmem:[#allocation71_spill] sm:$0xff]  ;;  %v5891_v10 = vld [vmem:[#allocation72_spill] sm:$0xff] }
 0x647   :  { %2195 = vmatpush1.bf16.msra.mxu0 %v5881_v15  ;;  %2236 = vmatpush1.bf16.msra.mxu1 %v5882_v58  ;;  %v5892_v15 = vld [vmem:[#allocation73_spill] sm:$0xff]  ;;  %v5893_v58 = vld [vmem:[#allocation74_spill] sm:$0xff] }
 0x648   :  { %2196 = vmatprep.subr.bf16.mxu0 %v5883_v63  ;;  %2237 = vmatprep.subr.bf16.mxu1 %v5884_v5  ;;  %v5894_v63 = vld [vmem:[#allocation75_spill] sm:$0xff]  ;;  %v5895_v5 = vld [vmem:[#allocation76_spill] sm:$0xff] }
 0x64b   :  { %2197 = vmatpush1.bf16.msra.mxu0 %v5885_v59  ;;  %2238 = vmatpush1.bf16.msra.mxu1 %v5886_v2  ;;  %v5896_v59 = vld [vmem:[#allocation77_spill] sm:$0xff]  ;;  %v5897_v2 = vld [vmem:[#allocation78_spill] sm:$0xff] }
 0x64c   :  { %2198 = vmatprep.subr.bf16.mxu0 %v5887_v20  ;;  %2239 = vmatprep.subr.bf16.mxu1 %v5888_v57  ;;  %v5898_v20 = vld [vmem:[#allocation79_spill] sm:$0xff]  ;;  %v5899_v57 = vld [vmem:[#allocation80_spill] sm:$0xff] }
 0x64f   :  { %2199 = vmatpush1.bf16.msra.mxu0 %v5889_v41  ;;  %2240 = vmatpush1.bf16.msra.mxu1 %v5890_v8  ;;  %v5900_v41 = vld [vmem:[#allocation81_spill] sm:$0xff] }
 0x650   :  { %2200 = vmatprep.subr.bf16.mxu0 %v5891_v10  ;;  %2241 = vmatprep.subr.bf16.mxu1 %v5892_v15 }
 0x653   :  { %2201 = vmatpush1.bf16.msra.mxu0 %v5893_v58  ;;  %2242 = vmatpush1.bf16.msra.mxu1 %v5894_v63 }
 0x654   :  { %2202 = vmatprep.subr.bf16.mxu0 %v5895_v5  ;;  %2243 = vmatprep.subr.bf16.mxu1 %v5896_v59 }
 0x657   :  { %2203 = vmatpush1.bf16.msra.mxu0 %v5897_v2  ;;  %2244 = vmatpush1.bf16.msra.mxu1 %v5898_v20 }
 0x658   :  { %2254 = vmatprep.subr.bf16.mxu0 %v5899_v57  ;;  %2295 = vmatprep.subr.bf16.mxu1 %v5900_v41 }
 0x6ad   :  { %v1940_v8 = vpop.f32.mrb[32].mxu0  ;;  %v1981_v10 = vpop.f32.mrb[32].mxu1 }
 0x6ae   :  { %v1942_v24 = vpop.f32.mrb[33].mxu0  ;;  %v1983_v15 = vpop.f32.mrb[33].mxu1 }
 0x6af   :  { %v2078_v18 = vcombine.low %v1940_v8, %v1942_v24  ;;  %v2079_v58 = vcombine.low %v1981_v10, %v1983_v15  ;;  %v1944_v33 = vpop.f32.mrb[34].mxu0  ;;  %v1985_v63 = vpop.f32.mrb[34].mxu1 }
 0x6b0   :  { %v1945_v47 = vpop.f32.mrb[35].mxu0  ;;  %v1986_v5 = vpop.f32.mrb[35].mxu1 }
 0x6b1   :  { %v2088_v59 = vrot.slane %v2078_v18, %v4060_v25  ;;  %v2095_v2 = vrot.slane %v2079_v58, %v4060_v25 }
 0x6b3   :  { %v2110_v13 = vcombine.low %v2088_v59, %v2095_v2  ;;  %v1892_v2 = vld [vmem:[%s1891_s2] sm:$0xff] }
 0x6b5   :  { %v2118_v8 = vrot.slane %v2110_v13, %v4060_v25  ;;  %v2151_v13 = vstv %s2150_s14 }
 0x6b6   :  { %vm2152_vm4 = vcmp.eq.s32.totalorder %v2151_v13, 1  ;;  %v5910_v13 = vld [vmem:[#allocation129_spill] sm:$0xff] }
 0x6ed   :  { %v2022_v20 = vpop.f32.mrb[36].mxu0  ;;  %v2063_v57 = vpop.f32.mrb[36].mxu1 }
 0x6ee   :  { %v2024_v39 = vpop.f32.mrb[37].mxu0  ;;  %v2065_v41 = vpop.f32.mrb[37].mxu1 }
 0x6ef   :  { %v2080_v1 = vcombine.low %v2022_v20, %v2024_v39  ;;  %v2081_v19 = vcombine.low %v2063_v57, %v2065_v41  ;;  %v2026_v49 = vpop.f32.mrb[38].mxu0  ;;  %v2067_v6 = vpop.f32.mrb[38].mxu1 }
 0x6f0   :  { %v2027_v24 = vpop.f32.mrb[39].mxu0  ;;  %v2068_v33 = vpop.f32.mrb[39].mxu1 }
 0x6f1   :  { %v2102_v47 = vrot.slane %v2080_v1, %v4060_v25  ;;  %v2109_v5 = vrot.slane %v2081_v19, %v4060_v25 }
 0x6f3   :  { %v2111_v18 = vcombine.low %v2102_v47, %v2109_v5 }
 0x6f5   :  { %v2125_v59 = vrot.slane %v2111_v18, %v4060_v25 }
 0x6f7   :  { %v2126_v15 = vcombine.low %v2118_v8, %v2125_v59 }
 0x6f9   :  { %v2128_v58 = vadd.f32 %v2126_v15, %v1892_v2 }
 0x6fb   :  { %v3253_v39 = vmul.f32 -1.442695, %v2128_v58  ;;  %v2136_v20 = vrot.slane %v2128_v58, 6  ;;  %v5903_v58 = vld [vmem:[#allocation122_spill] sm:$0xff] }
 0x6fd   :  { %3373 = vpow2.f32 %v3253_v39  ;;  %v5904_v39 = vld [vmem:[#allocation123_spill] sm:$0xff] }
 0x707   :  { %v3374_v49 = vpop.eup %3373 }
 0x708   :  { %v2132_v6 = vadd.f32 1.0, %v3374_v49  ;;  %v5905_v49 = vld [vmem:[#allocation124_spill] sm:$0xff] }
 0x70a   :  { %3375 = vrcp.f32 %v2132_v6  ;;  %v5906_v6 = vld [vmem:[#allocation125_spill] sm:$0xff] }
 0x70b   :  { %3377 = vtanh.f32 %v2136_v20  ;;  %v5907_v20 = vld [vmem:[#allocation126_spill] sm:$0xff] }
 0x714   :  { %v3376_v19 = vpop.eup %3375 }
 0x715   :  { %v2140_v1 = vrot.slane %v3376_v19, 2  ;;  %v3378_v57 = vpop.eup %3377  ;;  %v2146_v33 = vrot.slane %v3376_v19, 4 }
 0x716   :  { %v2143_v63 = vmul.f32 %v3378_v57, %v3376_v19  ;;  %v5908_v19 = vld [vmem:[#allocation127_spill] sm:$0xff]  ;;  %v5911_v57 = vld [vmem:[#allocation130_spill] sm:$0xff] }
 0x717   :  { %v2142_v41 = vmul.f32 %v2140_v1, %v4536_v11  ;;  %v5909_v1 = vld [vmem:[#allocation128_spill] sm:$0xff] }
 0x719   :  { %v2144_v10 = vadd.f32 %v2143_v63, %v2142_v41  ;;  %v5912_v41 = vld [vmem:[#allocation131_spill] sm:$0xff]  ;;  %v5913_v63 = vld [vmem:[#allocation132_spill] sm:$0xff] }
 0x71b   :  { %3379 = vtanh.f32 %v2144_v10  ;;  %v4690_v24 = vsel %vm2152_vm4, %v2144_v10, %v4536_v11  ;;  %v5901_v11 = vld [vmem:[#allocation120_spill] sm:$0xff]  ;;  %v5914_v10 = vld [vmem:[#allocation133_spill] sm:$0xff] }
 0x725   :  { %v3380_v47 = vpop.eup %3379 }
 0x726   :  { %v2148_v5 = vmul.f32 %v3380_v47, %v2146_v33  ;;  %v5915_v33 = vld [vmem:[#allocation134_spill] sm:$0xff]  ;;  %v5916_v47 = vld [vmem:[#allocation135_spill] sm:$0xff] }
 0x728   :  { %v4693_v18 = vsel %vm2152_vm4, %v2148_v5, %v4539_v26  ;;  %v5902_v26 = vld [vmem:[#allocation121_spill] sm:$0xff]  ;;  %v5917_v5 = vld [vmem:[#allocation136_spill] sm:$0xff] }
 0x729   :  { %v2167_v8 = vrot.slane %v4693_v18, %v4073_v12  ;;  %v2163_v59 = vrot.slane %v4693_v18, %v4075_v40 }
 0x72b   :  { %v2171_v2 = vpack.c.bf16 %v2167_v8, %v2167_v8  ;;  %v4699_v15 = vpack.c.bf16 %v2163_v59, %v2163_v59  ;;  %v5918_v8 = vld [vmem:[#allocation137_spill] sm:$0xff]  ;;  %v5919_v59 = vld [vmem:[#allocation138_spill] sm:$0xff] }
 0x72d   :  { %2204 = vmatprep.mubr.bf16.mxu0 %v2171_v2  ;;  %2245 = vmatprep.mubr.bf16.mxu1 %v2171_v2 }
 0x72e   :  { %2205 = vmatmul.mubr.bf16.vlgmr.msra.gmra.mrb[40].mxu0 %v4699_v15  ;;  %2246 = vmatmul.mubr.bf16.vlgmr.msra.gmra.mrb[40].mxu1 %v4699_v15 }
 0x72f   :  { %2255 = vmatpush1.bf16.msra.mxu0 %v5545_v34  ;;  %2296 = vmatpush1.bf16.msra.mxu1 %v5546_v7 }
 0x730   :  { %2286 = vmatprep.mubr.bf16.mxu0 %v2171_v2  ;;  %2327 = vmatprep.mubr.bf16.mxu1 %v2171_v2  ;;  %v5920_v2 = vld [vmem:[#allocation139_spill] sm:$0xff] }
 0x731   :  { %2256 = vmatprep.subr.bf16.mxu0 %v5547_v48  ;;  %2297 = vmatprep.subr.bf16.mxu1 %v5548_v62 }
 0x733   :  { %2257 = vmatpush1.bf16.msra.mxu0 %v5549_v3  ;;  %2298 = vmatpush1.bf16.msra.mxu1 %v5631_v23 }
 0x734   :  { %2258 = vmatprep.subr.bf16.mxu0 %v5632_v50  ;;  %2299 = vmatprep.subr.bf16.mxu1 %v5633_v60 }
 0x737   :  { %2259 = vmatpush1.bf16.msra.mxu0 %v5634_v30  ;;  %2300 = vmatpush1.bf16.msra.mxu1 %v5635_v27 }
 0x738   :  { %2260 = vmatprep.subr.bf16.mxu0 %v5636_v22  ;;  %2301 = vmatprep.subr.bf16.mxu1 %v5637_v44 }
 0x73b   :  { %2261 = vmatpush1.bf16.msra.mxu0 %v5638_v28  ;;  %2302 = vmatpush1.bf16.msra.mxu1 %v5639_v29 }
 0x73c   :  { %2262 = vmatprep.subr.bf16.mxu0 %v5721_v43  ;;  %2303 = vmatprep.subr.bf16.mxu1 %v5722_v38 }
 0x73f   :  { %2263 = vmatpush1.bf16.msra.mxu0 %v5723_v14  ;;  %2304 = vmatpush1.bf16.msra.mxu1 %v5724_v21 }
 0x740   :  { %2264 = vmatprep.subr.bf16.mxu0 %v5725_v4  ;;  %2305 = vmatprep.subr.bf16.mxu1 %v5726_v9 }
 0x743   :  { %2265 = vmatpush1.bf16.msra.mxu0 %v5727_v17  ;;  %2306 = vmatpush1.bf16.msra.mxu1 %v5728_v32 }
 0x744   :  { %2266 = vmatprep.subr.bf16.mxu0 %v5729_v31  ;;  %2307 = vmatprep.subr.bf16.mxu1 %v5730_v0 }
 0x747   :  { %2267 = vmatpush1.bf16.msra.mxu0 %v5731_v56  ;;  %2308 = vmatpush1.bf16.msra.mxu1 %v5732_v55 }
 0x748   :  { %2268 = vmatprep.subr.bf16.mxu0 %v5652_v45  ;;  %2309 = vmatprep.subr.bf16.mxu1 %v5653_v46 }
 0x74b   :  { %2269 = vmatpush1.bf16.msra.mxu0 %v5654_v61  ;;  %2310 = vmatpush1.bf16.msra.mxu1 %v5733_v16 }
 0x74c   :  { %2270 = vmatprep.subr.bf16.mxu0 %v5656_v37  ;;  %2311 = vmatprep.subr.bf16.mxu1 %v5657_v36 }
 0x74f   :  { %2271 = vmatpush1.bf16.msra.mxu0 %v5658_v51  ;;  %2312 = vmatpush1.bf16.msra.mxu1 %v5659_v52 }
 0x750   :  { %2272 = vmatprep.subr.bf16.mxu0 %v5660_v53  ;;  %2313 = vmatprep.subr.bf16.mxu1 %v5661_v54 }
 0x753   :  { %2273 = vmatpush1.bf16.msra.mxu0 %v5662_v35  ;;  %2314 = vmatpush1.bf16.msra.mxu1 %v5582_v42 }
 0x754   :  { %2274 = vmatprep.subr.bf16.mxu0 %v5901_v11  ;;  %2315 = vmatprep.subr.bf16.mxu1 %v5902_v26 }
 0x757   :  { %2275 = vmatpush1.bf16.msra.mxu0 %v5903_v58  ;;  %2316 = vmatpush1.bf16.msra.mxu1 %v5904_v39 }
 0x758   :  { %2276 = vmatprep.subr.bf16.mxu0 %v5905_v49  ;;  %2317 = vmatprep.subr.bf16.mxu1 %v5906_v6 }
 0x75b   :  { %2277 = vmatpush1.bf16.msra.mxu0 %v5907_v20  ;;  %2318 = vmatpush1.bf16.msra.mxu1 %v5908_v19 }
 0x75c   :  { %2278 = vmatprep.subr.bf16.mxu0 %v5909_v1  ;;  %2319 = vmatprep.subr.bf16.mxu1 %v5910_v13  ;;  %v5921_v13 = vld [vmem:[#allocation140_spill] sm:$0xff] }
 0x75f   :  { %2279 = vmatpush1.bf16.msra.mxu0 %v5911_v57  ;;  %2320 = vmatpush1.bf16.msra.mxu1 %v5912_v41  ;;  %v5922_v57 = vld [vmem:[#allocation141_spill] sm:$0xff]  ;;  %v5923_v41 = vld [vmem:[#allocation142_spill] sm:$0xff] }
 0x760   :  { %2280 = vmatprep.subr.bf16.mxu0 %v5913_v63  ;;  %2321 = vmatprep.subr.bf16.mxu1 %v5914_v10  ;;  %v5924_v63 = vld [vmem:[#allocation143_spill] sm:$0xff]  ;;  %v5925_v10 = vld [vmem:[#allocation16_spill] sm:$0xff] }
 0x763   :  { %2281 = vmatpush1.bf16.msra.mxu0 %v5915_v33  ;;  %2322 = vmatpush1.bf16.msra.mxu1 %v5916_v47  ;;  %v5926_v33 = vld [vmem:[#allocation18_spill] sm:$0xff] }
 0x764   :  { %2282 = vmatprep.subr.bf16.mxu0 %v5917_v5  ;;  %2323 = vmatprep.subr.bf16.mxu1 %v5918_v8  ;;  %v5927_v8 = vld [vmem:[#allocation17_spill] sm:$0xff]  ;;  %v5936_v5 = vld [vmem:[#allocation27_spill] sm:$0xff] }
 0x767   :  { %2283 = vmatpush1.bf16.msra.mxu0 %v5919_v59  ;;  %2324 = vmatpush1.bf16.msra.mxu1 %v5920_v2  ;;  %v5928_v59 = vld [vmem:[#allocation19_spill] sm:$0xff]  ;;  %v5929_v2 = vld [vmem:[#allocation20_spill] sm:$0xff] }
 0x768   :  { %2284 = vmatprep.subr.bf16.mxu0 %v5921_v13  ;;  %2325 = vmatprep.subr.bf16.mxu1 %v5922_v57  ;;  %v5930_v13 = vld [vmem:[#allocation21_spill] sm:$0xff]  ;;  %v5931_v57 = vld [vmem:[#allocation22_spill] sm:$0xff] }
 0x76b   :  { %2285 = vmatpush1.bf16.msra.mxu0 %v5923_v41  ;;  %2326 = vmatpush1.bf16.msra.mxu1 %v5924_v63  ;;  %v5932_v41 = vld [vmem:[#allocation23_spill] sm:$0xff]  ;;  %v5933_v63 = vld [vmem:[#allocation24_spill] sm:$0xff] }
 0x76c   :  { %2438 = vmatprep.subr.bf16.mxu0 %v5925_v10  ;;  %2479 = vmatprep.subr.bf16.mxu1 %v5926_v33  ;;  %v5934_v10 = vld [vmem:[#allocation25_spill] sm:$0xff]  ;;  %v5935_v33 = vld [vmem:[#allocation26_spill] sm:$0xff] }
 0x76e   :  { %2287 = vmatmul.mubr.bf16.vlgmr.msra.gmra.mrb[44].mxu0 %v4699_v15  ;;  %2328 = vmatmul.mubr.bf16.vlgmr.msra.gmra.mrb[44].mxu1 %v4699_v15  ;;  %v5937_v15 = vld [vmem:[#allocation28_spill] sm:$0xff] }
 0x76f   :  { %2439 = vmatpush1.bf16.msra.mxu0 %v5927_v8  ;;  %2480 = vmatpush1.bf16.msra.mxu1 %v5928_v59  ;;  %v5938_v8 = vld [vmem:[#allocation29_spill] sm:$0xff]  ;;  %v5939_v59 = vld [vmem:[#allocation30_spill] sm:$0xff] }
 0x770   :  { %2440 = vmatprep.subr.bf16.mxu0 %v5929_v2  ;;  %2481 = vmatprep.subr.bf16.mxu1 %v5930_v13  ;;  %v5940_v2 = vld [vmem:[#allocation31_spill] sm:$0xff]  ;;  %v5941_v13 = vld [vmem:[#allocation32_spill] sm:$0xff] }
 0x773   :  { %2441 = vmatpush1.bf16.msra.mxu0 %v5931_v57  ;;  %2482 = vmatpush1.bf16.msra.mxu1 %v5932_v41  ;;  %v5942_v57 = vld [vmem:[#allocation33_spill] sm:$0xff]  ;;  %v5943_v41 = vld [vmem:[#allocation34_spill] sm:$0xff] }
 0x774   :  { %2442 = vmatprep.subr.bf16.mxu0 %v5933_v63  ;;  %2483 = vmatprep.subr.bf16.mxu1 %v5934_v10  ;;  %v5944_v63 = vld [vmem:[#allocation35_spill] sm:$0xff]  ;;  %v5945_v10 = vld [vmem:[#allocation36_spill] sm:$0xff] }
 0x777   :  { %2443 = vmatpush1.bf16.msra.mxu0 %v5935_v33  ;;  %2484 = vmatpush1.bf16.msra.mxu1 %v5936_v5  ;;  %v5946_v33 = vld [vmem:[#allocation37_spill] sm:$0xff]  ;;  %v5947_v5 = vld [vmem:[#allocation38_spill] sm:$0xff] }
 0x778   :  { %2444 = vmatprep.subr.bf16.mxu0 %v5937_v15  ;;  %2485 = vmatprep.subr.bf16.mxu1 %v5938_v8  ;;  %v5948_v15 = vld [vmem:[#allocation39_spill] sm:$0xff]  ;;  %v5949_v8 = vld [vmem:[#allocation40_spill] sm:$0xff] }
 0x77b   :  { %2445 = vmatpush1.bf16.msra.mxu0 %v5939_v59  ;;  %2486 = vmatpush1.bf16.msra.mxu1 %v5940_v2  ;;  %v5950_v59 = vld [vmem:[#allocation41_spill] sm:$0xff]  ;;  %v5951_v2 = vld [vmem:[#allocation42_spill] sm:$0xff] }
 0x77c   :  { %2446 = vmatprep.subr.bf16.mxu0 %v5941_v13  ;;  %2487 = vmatprep.subr.bf16.mxu1 %v5942_v57  ;;  %v5952_v13 = vld [vmem:[#allocation43_spill] sm:$0xff]  ;;  %v5953_v57 = vld [vmem:[#allocation44_spill] sm:$0xff] }
 0x77f   :  { %2447 = vmatpush1.bf16.msra.mxu0 %v5943_v41  ;;  %2488 = vmatpush1.bf16.msra.mxu1 %v5944_v63  ;;  %v5954_v41 = vld [vmem:[#allocation45_spill] sm:$0xff]  ;;  %v5955_v63 = vld [vmem:[#allocation46_spill] sm:$0xff] }
 0x780   :  { %2448 = vmatprep.subr.bf16.mxu0 %v5945_v10  ;;  %2489 = vmatprep.subr.bf16.mxu1 %v5946_v33  ;;  %v5956_v10 = vld [vmem:[#allocation47_spill] sm:$0xff]  ;;  %v5957_v33 = vld [vmem:[#allocation48_spill] sm:$0xff] }
 0x783   :  { %2449 = vmatpush1.bf16.msra.mxu0 %v5947_v5  ;;  %2490 = vmatpush1.bf16.msra.mxu1 %v5948_v15  ;;  %v5958_v5 = vld [vmem:[#allocation49_spill] sm:$0xff]  ;;  %v5959_v15 = vld [vmem:[#allocation50_spill] sm:$0xff] }
 0x784   :  { %2450 = vmatprep.subr.bf16.mxu0 %v5949_v8  ;;  %2491 = vmatprep.subr.bf16.mxu1 %v5950_v59  ;;  %v5960_v8 = vld [vmem:[#allocation51_spill] sm:$0xff]  ;;  %v5961_v59 = vld [vmem:[#allocation52_spill] sm:$0xff] }
 0x787   :  { %2451 = vmatpush1.bf16.msra.mxu0 %v5951_v2  ;;  %2492 = vmatpush1.bf16.msra.mxu1 %v5952_v13  ;;  %v5962_v2 = vld [vmem:[#allocation53_spill] sm:$0xff]  ;;  %v5963_v13 = vld [vmem:[#allocation54_spill] sm:$0xff] }
 0x788   :  { %2452 = vmatprep.subr.bf16.mxu0 %v5953_v57  ;;  %2493 = vmatprep.subr.bf16.mxu1 %v5954_v41  ;;  %v5964_v57 = vld [vmem:[#allocation55_spill] sm:$0xff]  ;;  %v5965_v41 = vld [vmem:[#allocation56_spill] sm:$0xff] }
 0x78b   :  { %2453 = vmatpush1.bf16.msra.mxu0 %v5955_v63  ;;  %2494 = vmatpush1.bf16.msra.mxu1 %v5956_v10  ;;  %v5966_v63 = vld [vmem:[#allocation57_spill] sm:$0xff]  ;;  %v5967_v10 = vld [vmem:[#allocation58_spill] sm:$0xff] }
 0x78c   :  { %2454 = vmatprep.subr.bf16.mxu0 %v5957_v33  ;;  %2495 = vmatprep.subr.bf16.mxu1 %v5958_v5  ;;  %v5968_v33 = vld [vmem:[#allocation59_spill] sm:$0xff]  ;;  %v5969_v5 = vld [vmem:[#allocation60_spill] sm:$0xff] }
 0x78f   :  { %2455 = vmatpush1.bf16.msra.mxu0 %v5959_v15  ;;  %2496 = vmatpush1.bf16.msra.mxu1 %v5960_v8  ;;  %v5970_v15 = vld [vmem:[#allocation61_spill] sm:$0xff]  ;;  %v5971_v8 = vld [vmem:[#allocation62_spill] sm:$0xff] }
 0x790   :  { %2456 = vmatprep.subr.bf16.mxu0 %v5961_v59  ;;  %2497 = vmatprep.subr.bf16.mxu1 %v5962_v2  ;;  %v5972_v59 = vld [vmem:[#allocation63_spill] sm:$0xff]  ;;  %v5973_v2 = vld [vmem:[#allocation64_spill] sm:$0xff] }
 0x793   :  { %2457 = vmatpush1.bf16.msra.mxu0 %v5963_v13  ;;  %2498 = vmatpush1.bf16.msra.mxu1 %v5964_v57  ;;  %v5974_v13 = vld [vmem:[#allocation65_spill] sm:$0xff]  ;;  %v5975_v57 = vld [vmem:[#allocation66_spill] sm:$0xff] }
 0x794   :  { %2458 = vmatprep.subr.bf16.mxu0 %v5965_v41  ;;  %2499 = vmatprep.subr.bf16.mxu1 %v5966_v63  ;;  %v5976_v41 = vld [vmem:[#allocation67_spill] sm:$0xff]  ;;  %v5977_v63 = vld [vmem:[#allocation68_spill] sm:$0xff] }
 0x797   :  { %2459 = vmatpush1.bf16.msra.mxu0 %v5967_v10  ;;  %2500 = vmatpush1.bf16.msra.mxu1 %v5968_v33  ;;  %v5978_v10 = vld [vmem:[#allocation69_spill] sm:$0xff]  ;;  %v5979_v33 = vld [vmem:[#allocation70_spill] sm:$0xff] }
 0x798   :  { %2460 = vmatprep.subr.bf16.mxu0 %v5969_v5  ;;  %2501 = vmatprep.subr.bf16.mxu1 %v5970_v15  ;;  %v5980_v5 = vld [vmem:[#allocation71_spill] sm:$0xff]  ;;  %v5981_v15 = vld [vmem:[#allocation72_spill] sm:$0xff] }
 0x79b   :  { %2461 = vmatpush1.bf16.msra.mxu0 %v5971_v8  ;;  %2502 = vmatpush1.bf16.msra.mxu1 %v5972_v59  ;;  %v5982_v8 = vld [vmem:[#allocation73_spill] sm:$0xff]  ;;  %v5983_v59 = vld [vmem:[#allocation74_spill] sm:$0xff] }
 0x79c   :  { %2462 = vmatprep.subr.bf16.mxu0 %v5973_v2  ;;  %2503 = vmatprep.subr.bf16.mxu1 %v5974_v13  ;;  %v5984_v2 = vld [vmem:[#allocation75_spill] sm:$0xff]  ;;  %v5985_v13 = vld [vmem:[#allocation76_spill] sm:$0xff] }
 0x79f   :  { %2463 = vmatpush1.bf16.msra.mxu0 %v5975_v57  ;;  %2504 = vmatpush1.bf16.msra.mxu1 %v5976_v41  ;;  %v5986_v57 = vld [vmem:[#allocation77_spill] sm:$0xff]  ;;  %v5987_v41 = vld [vmem:[#allocation78_spill] sm:$0xff] }
 0x7a0   :  { %2464 = vmatprep.subr.bf16.mxu0 %v5977_v63  ;;  %2505 = vmatprep.subr.bf16.mxu1 %v5978_v10  ;;  %v5988_v63 = vld [vmem:[#allocation79_spill] sm:$0xff]  ;;  %v5989_v10 = vld [vmem:[#allocation80_spill] sm:$0xff] }
 0x7a3   :  { %2465 = vmatpush1.bf16.msra.mxu0 %v5979_v33  ;;  %2506 = vmatpush1.bf16.msra.mxu1 %v5980_v5  ;;  %v5990_v33 = vld [vmem:[#allocation81_spill] sm:$0xff] }
 0x7a4   :  { %2466 = vmatprep.subr.bf16.mxu0 %v5981_v15  ;;  %2507 = vmatprep.subr.bf16.mxu1 %v5982_v8 }
 0x7a7   :  { %2467 = vmatpush1.bf16.msra.mxu0 %v5983_v59  ;;  %2508 = vmatpush1.bf16.msra.mxu1 %v5984_v2 }
 0x7a8   :  { %2468 = vmatprep.subr.bf16.mxu0 %v5985_v13  ;;  %2509 = vmatprep.subr.bf16.mxu1 %v5986_v57 }
 0x7ab   :  { %2469 = vmatpush1.bf16.msra.mxu0 %v5987_v41  ;;  %2510 = vmatpush1.bf16.msra.mxu1 %v5988_v63 }
 0x7ac   :  { %2520 = vmatprep.subr.bf16.mxu0 %v5989_v10  ;;  %2561 = vmatprep.subr.bf16.mxu1 %v5990_v33 }
 0x801   :  { %v2206_v5 = vpop.f32.mrb[40].mxu0  ;;  %v2247_v15 = vpop.f32.mrb[40].mxu1 }
 0x802   :  { %v2208_v47 = vpop.f32.mrb[41].mxu0  ;;  %v2249_v8 = vpop.f32.mrb[41].mxu1 }
 0x803   :  { %v2344_v1 = vcombine.low %v2206_v5, %v2208_v47  ;;  %v2345_v59 = vcombine.low %v2247_v15, %v2249_v8  ;;  %v2210_v19 = vpop.f32.mrb[42].mxu0  ;;  %v2251_v2 = vpop.f32.mrb[42].mxu1 }
 0x804   :  { %v2211_v20 = vpop.f32.mrb[43].mxu0  ;;  %v2252_v13 = vpop.f32.mrb[43].mxu1 }
 0x805   :  { %v2354_v57 = vrot.slane %v2344_v1, %v4060_v25  ;;  %v2361_v41 = vrot.slane %v2345_v59, %v4060_v25 }
 0x807   :  { %v2376_v6 = vcombine.low %v2354_v57, %v2361_v41  ;;  %v2158_v41 = vld [vmem:[%s2157_s17] sm:$0xff] }
 0x809   :  { %v2384_v5 = vrot.slane %v2376_v6, %v4060_v25  ;;  %v2417_v6 = vstv %s2416_s20 }
 0x80a   :  { %vm2418_vm5 = vcmp.eq.s32.totalorder %v2417_v6, 1  ;;  %v6000_v6 = vld [vmem:[#allocation129_spill] sm:$0xff] }
 0x841   :  { %v2288_v63 = vpop.f32.mrb[44].mxu0  ;;  %v2329_v10 = vpop.f32.mrb[44].mxu1 }
 0x842   :  { %v2290_v49 = vpop.f32.mrb[45].mxu0  ;;  %v2331_v33 = vpop.f32.mrb[45].mxu1 }
 0x843   :  { %v2346_v39 = vcombine.low %v2288_v63, %v2290_v49  ;;  %v2347_v58 = vcombine.low %v2329_v10, %v2331_v33  ;;  %v2292_v26 = vpop.f32.mrb[46].mxu0  ;;  %v2333_v11 = vpop.f32.mrb[46].mxu1 }
 0x844   :  { %v2293_v47 = vpop.f32.mrb[47].mxu0  ;;  %v2334_v19 = vpop.f32.mrb[47].mxu1 }
 0x845   :  { %v2368_v20 = vrot.slane %v2346_v39, %v4060_v25  ;;  %v2375_v13 = vrot.slane %v2347_v58, %v4060_v25 }
 0x847   :  { %v2377_v1 = vcombine.low %v2368_v20, %v2375_v13 }
 0x849   :  { %v2391_v57 = vrot.slane %v2377_v1, %v4060_v25 }
 0x84b   :  { %v2392_v8 = vcombine.low %v2384_v5, %v2391_v57 }
 0x84d   :  { %v2394_v59 = vadd.f32 %v2392_v8, %v2158_v41 }
 0x84f   :  { %v3256_v49 = vmul.f32 -1.442695, %v2394_v59  ;;  %v2402_v63 = vrot.slane %v2394_v59, 6  ;;  %v5993_v59 = vld [vmem:[#allocation122_spill] sm:$0xff] }
 0x851   :  { %3381 = vpow2.f32 %v3256_v49  ;;  %v5994_v49 = vld [vmem:[#allocation123_spill] sm:$0xff] }
 0x85b   :  { %v3382_v26 = vpop.eup %3381 }
 0x85c   :  { %v2398_v11 = vadd.f32 1.0, %v3382_v26  ;;  %v5995_v26 = vld [vmem:[#allocation124_spill] sm:$0xff] }
 0x85e   :  { %3383 = vrcp.f32 %v2398_v11  ;;  %v5996_v11 = vld [vmem:[#allocation125_spill] sm:$0xff] }
 0x85f   :  { %3385 = vtanh.f32 %v2402_v63  ;;  %v5997_v63 = vld [vmem:[#allocation126_spill] sm:$0xff] }
 0x868   :  { %v3384_v58 = vpop.eup %3383 }
 0x869   :  { %v2406_v39 = vrot.slane %v3384_v58, 2  ;;  %v3386_v10 = vpop.eup %3385  ;;  %v2412_v19 = vrot.slane %v3384_v58, 4 }
 0x86a   :  { %v2409_v2 = vmul.f32 %v3386_v10, %v3384_v58  ;;  %v5998_v58 = vld [vmem:[#allocation127_spill] sm:$0xff]  ;;  %v6001_v10 = vld [vmem:[#allocation130_spill] sm:$0xff] }
 0x86b   :  { %v2408_v33 = vmul.f32 %v2406_v39, %v4690_v24  ;;  %v5999_v39 = vld [vmem:[#allocation128_spill] sm:$0xff] }
 0x86d   :  { %v2410_v15 = vadd.f32 %v2409_v2, %v2408_v33  ;;  %v6002_v33 = vld [vmem:[#allocation131_spill] sm:$0xff]  ;;  %v6003_v2 = vld [vmem:[#allocation132_spill] sm:$0xff] }
 0x86f   :  { %3387 = vtanh.f32 %v2410_v15  ;;  %v4844_v47 = vsel %vm2418_vm5, %v2410_v15, %v4690_v24  ;;  %v5991_v24 = vld [vmem:[#allocation120_spill] sm:$0xff]  ;;  %v6004_v15 = vld [vmem:[#allocation133_spill] sm:$0xff] }
 0x879   :  { %v3388_v20 = vpop.eup %3387 }
 0x87a   :  { %v2414_v13 = vmul.f32 %v3388_v20, %v2412_v19  ;;  %v6005_v19 = vld [vmem:[#allocation134_spill] sm:$0xff]  ;;  %v6006_v20 = vld [vmem:[#allocation135_spill] sm:$0xff] }
 0x87c   :  { %v4847_v1 = vsel %vm2418_vm5, %v2414_v13, %v4693_v18  ;;  %v5992_v18 = vld [vmem:[#allocation121_spill] sm:$0xff]  ;;  %v6007_v13 = vld [vmem:[#allocation136_spill] sm:$0xff] }
 0x87d   :  { %v2433_v5 = vrot.slane %v4847_v1, %v4073_v12  ;;  %v2429_v57 = vrot.slane %v4847_v1, %v4075_v40 }
 0x87f   :  { %v2437_v41 = vpack.c.bf16 %v2433_v5, %v2433_v5  ;;  %v4853_v8 = vpack.c.bf16 %v2429_v57, %v2429_v57  ;;  %v6008_v5 = vld [vmem:[#allocation137_spill] sm:$0xff]  ;;  %v6009_v57 = vld [vmem:[#allocation138_spill] sm:$0xff] }
 0x881   :  { %2470 = vmatprep.mubr.bf16.mxu0 %v2437_v41  ;;  %2511 = vmatprep.mubr.bf16.mxu1 %v2437_v41 }
 0x882   :  { %2471 = vmatmul.mubr.bf16.vlgmr.msra.gmra.mrb[48].mxu0 %v4853_v8  ;;  %2512 = vmatmul.mubr.bf16.vlgmr.msra.gmra.mrb[48].mxu1 %v4853_v8 }
 0x883   :  { %2521 = vmatpush1.bf16.msra.mxu0 %v5545_v34  ;;  %2562 = vmatpush1.bf16.msra.mxu1 %v5546_v7 }
 0x884   :  { %2552 = vmatprep.mubr.bf16.mxu0 %v2437_v41  ;;  %2593 = vmatprep.mubr.bf16.mxu1 %v2437_v41  ;;  %v6010_v41 = vld [vmem:[#allocation139_spill] sm:$0xff] }
 0x885   :  { %2522 = vmatprep.subr.bf16.mxu0 %v5547_v48  ;;  %2563 = vmatprep.subr.bf16.mxu1 %v5548_v62 }
 0x887   :  { %2523 = vmatpush1.bf16.msra.mxu0 %v5549_v3  ;;  %2564 = vmatpush1.bf16.msra.mxu1 %v5631_v23 }
 0x888   :  { %2524 = vmatprep.subr.bf16.mxu0 %v5632_v50  ;;  %2565 = vmatprep.subr.bf16.mxu1 %v5633_v60 }
 0x88b   :  { %2525 = vmatpush1.bf16.msra.mxu0 %v5634_v30  ;;  %2566 = vmatpush1.bf16.msra.mxu1 %v5635_v27 }
 0x88c   :  { %2526 = vmatprep.subr.bf16.mxu0 %v5636_v22  ;;  %2567 = vmatprep.subr.bf16.mxu1 %v5637_v44 }
 0x88f   :  { %2527 = vmatpush1.bf16.msra.mxu0 %v5638_v28  ;;  %2568 = vmatpush1.bf16.msra.mxu1 %v5639_v29 }
 0x890   :  { %2528 = vmatprep.subr.bf16.mxu0 %v5721_v43  ;;  %2569 = vmatprep.subr.bf16.mxu1 %v5722_v38 }
 0x893   :  { %2529 = vmatpush1.bf16.msra.mxu0 %v5723_v14  ;;  %2570 = vmatpush1.bf16.msra.mxu1 %v5724_v21 }
 0x894   :  { %2530 = vmatprep.subr.bf16.mxu0 %v5725_v4  ;;  %2571 = vmatprep.subr.bf16.mxu1 %v5726_v9 }
 0x897   :  { %2531 = vmatpush1.bf16.msra.mxu0 %v5727_v17  ;;  %2572 = vmatpush1.bf16.msra.mxu1 %v5728_v32 }
 0x898   :  { %2532 = vmatprep.subr.bf16.mxu0 %v5729_v31  ;;  %2573 = vmatprep.subr.bf16.mxu1 %v5730_v0 }
 0x89b   :  { %2533 = vmatpush1.bf16.msra.mxu0 %v5731_v56  ;;  %2574 = vmatpush1.bf16.msra.mxu1 %v5732_v55 }
 0x89c   :  { %2534 = vmatprep.subr.bf16.mxu0 %v5652_v45  ;;  %2575 = vmatprep.subr.bf16.mxu1 %v5653_v46 }
 0x89f   :  { %2535 = vmatpush1.bf16.msra.mxu0 %v5654_v61  ;;  %2576 = vmatpush1.bf16.msra.mxu1 %v5733_v16 }
 0x8a0   :  { %2536 = vmatprep.subr.bf16.mxu0 %v5656_v37  ;;  %2577 = vmatprep.subr.bf16.mxu1 %v5657_v36 }
 0x8a3   :  { %2537 = vmatpush1.bf16.msra.mxu0 %v5658_v51  ;;  %2578 = vmatpush1.bf16.msra.mxu1 %v5659_v52 }
 0x8a4   :  { %2538 = vmatprep.subr.bf16.mxu0 %v5660_v53  ;;  %2579 = vmatprep.subr.bf16.mxu1 %v5661_v54 }
 0x8a7   :  { %2539 = vmatpush1.bf16.msra.mxu0 %v5662_v35  ;;  %2580 = vmatpush1.bf16.msra.mxu1 %v5582_v42 }
 0x8a8   :  { %2540 = vmatprep.subr.bf16.mxu0 %v5991_v24  ;;  %2581 = vmatprep.subr.bf16.mxu1 %v5992_v18 }
 0x8ab   :  { %2541 = vmatpush1.bf16.msra.mxu0 %v5993_v59  ;;  %2582 = vmatpush1.bf16.msra.mxu1 %v5994_v49 }
 0x8ac   :  { %2542 = vmatprep.subr.bf16.mxu0 %v5995_v26  ;;  %2583 = vmatprep.subr.bf16.mxu1 %v5996_v11 }
 0x8af   :  { %2543 = vmatpush1.bf16.msra.mxu0 %v5997_v63  ;;  %2584 = vmatpush1.bf16.msra.mxu1 %v5998_v58 }
 0x8b0   :  { %2544 = vmatprep.subr.bf16.mxu0 %v5999_v39  ;;  %2585 = vmatprep.subr.bf16.mxu1 %v6000_v6  ;;  %v6011_v6 = vld [vmem:[#allocation140_spill] sm:$0xff] }
 0x8b3   :  { %2545 = vmatpush1.bf16.msra.mxu0 %v6001_v10  ;;  %2586 = vmatpush1.bf16.msra.mxu1 %v6002_v33  ;;  %v6012_v10 = vld [vmem:[#allocation141_spill] sm:$0xff]  ;;  %v6013_v33 = vld [vmem:[#allocation142_spill] sm:$0xff] }
 0x8b4   :  { %2546 = vmatprep.subr.bf16.mxu0 %v6003_v2  ;;  %2587 = vmatprep.subr.bf16.mxu1 %v6004_v15  ;;  %v6014_v2 = vld [vmem:[#allocation143_spill] sm:$0xff]  ;;  %v6015_v15 = vld [vmem:[#allocation16_spill] sm:$0xff] }
 0x8b7   :  { %2547 = vmatpush1.bf16.msra.mxu0 %v6005_v19  ;;  %2588 = vmatpush1.bf16.msra.mxu1 %v6006_v20  ;;  %v6016_v19 = vld [vmem:[#allocation18_spill] sm:$0xff] }
 0x8b8   :  { %2548 = vmatprep.subr.bf16.mxu0 %v6007_v13  ;;  %2589 = vmatprep.subr.bf16.mxu1 %v6008_v5  ;;  %v6017_v5 = vld [vmem:[#allocation17_spill] sm:$0xff]  ;;  %v6026_v13 = vld [vmem:[#allocation27_spill] sm:$0xff] }
 0x8bb   :  { %2549 = vmatpush1.bf16.msra.mxu0 %v6009_v57  ;;  %2590 = vmatpush1.bf16.msra.mxu1 %v6010_v41  ;;  %v6018_v57 = vld [vmem:[#allocation19_spill] sm:$0xff]  ;;  %v6019_v41 = vld [vmem:[#allocation20_spill] sm:$0xff] }
 0x8bc   :  { %2550 = vmatprep.subr.bf16.mxu0 %v6011_v6  ;;  %2591 = vmatprep.subr.bf16.mxu1 %v6012_v10  ;;  %v6020_v6 = vld [vmem:[#allocation21_spill] sm:$0xff]  ;;  %v6021_v10 = vld [vmem:[#allocation22_spill] sm:$0xff] }
 0x8bf   :  { %2551 = vmatpush1.bf16.msra.mxu0 %v6013_v33  ;;  %2592 = vmatpush1.bf16.msra.mxu1 %v6014_v2  ;;  %v6022_v33 = vld [vmem:[#allocation23_spill] sm:$0xff]  ;;  %v6023_v2 = vld [vmem:[#allocation24_spill] sm:$0xff] }
 0x8c0   :  { %2704 = vmatprep.subr.bf16.mxu0 %v6015_v15  ;;  %2745 = vmatprep.subr.bf16.mxu1 %v6016_v19  ;;  %v6024_v15 = vld [vmem:[#allocation25_spill] sm:$0xff]  ;;  %v6025_v19 = vld [vmem:[#allocation26_spill] sm:$0xff] }
 0x8c2   :  { %2553 = vmatmul.mubr.bf16.vlgmr.msra.gmra.mrb[52].mxu0 %v4853_v8  ;;  %2594 = vmatmul.mubr.bf16.vlgmr.msra.gmra.mrb[52].mxu1 %v4853_v8  ;;  %v6027_v8 = vld [vmem:[#allocation28_spill] sm:$0xff] }
 0x8c3   :  { %2705 = vmatpush1.bf16.msra.mxu0 %v6017_v5  ;;  %2746 = vmatpush1.bf16.msra.mxu1 %v6018_v57  ;;  %v6028_v5 = vld [vmem:[#allocation29_spill] sm:$0xff]  ;;  %v6029_v57 = vld [vmem:[#allocation30_spill] sm:$0xff] }
 0x8c4   :  { %2706 = vmatprep.subr.bf16.mxu0 %v6019_v41  ;;  %2747 = vmatprep.subr.bf16.mxu1 %v6020_v6  ;;  %v6030_v41 = vld [vmem:[#allocation31_spill] sm:$0xff]  ;;  %v6031_v6 = vld [vmem:[#allocation32_spill] sm:$0xff] }
 0x8c7   :  { %2707 = vmatpush1.bf16.msra.mxu0 %v6021_v10  ;;  %2748 = vmatpush1.bf16.msra.mxu1 %v6022_v33  ;;  %v6032_v10 = vld [vmem:[#allocation33_spill] sm:$0xff]  ;;  %v6033_v33 = vld [vmem:[#allocation34_spill] sm:$0xff] }
 0x8c8   :  { %2708 = vmatprep.subr.bf16.mxu0 %v6023_v2  ;;  %2749 = vmatprep.subr.bf16.mxu1 %v6024_v15  ;;  %v6034_v2 = vld [vmem:[#allocation35_spill] sm:$0xff]  ;;  %v6035_v15 = vld [vmem:[#allocation36_spill] sm:$0xff] }
 0x8cb   :  { %2709 = vmatpush1.bf16.msra.mxu0 %v6025_v19  ;;  %2750 = vmatpush1.bf16.msra.mxu1 %v6026_v13  ;;  %v6036_v19 = vld [vmem:[#allocation37_spill] sm:$0xff]  ;;  %v6037_v13 = vld [vmem:[#allocation38_spill] sm:$0xff] }
 0x8cc   :  { %2710 = vmatprep.subr.bf16.mxu0 %v6027_v8  ;;  %2751 = vmatprep.subr.bf16.mxu1 %v6028_v5  ;;  %v6038_v8 = vld [vmem:[#allocation39_spill] sm:$0xff]  ;;  %v6039_v5 = vld [vmem:[#allocation40_spill] sm:$0xff] }
 0x8cf   :  { %2711 = vmatpush1.bf16.msra.mxu0 %v6029_v57  ;;  %2752 = vmatpush1.bf16.msra.mxu1 %v6030_v41  ;;  %v6040_v57 = vld [vmem:[#allocation41_spill] sm:$0xff]  ;;  %v6041_v41 = vld [vmem:[#allocation42_spill] sm:$0xff] }
 0x8d0   :  { %2712 = vmatprep.subr.bf16.mxu0 %v6031_v6  ;;  %2753 = vmatprep.subr.bf16.mxu1 %v6032_v10  ;;  %v6042_v6 = vld [vmem:[#allocation43_spill] sm:$0xff]  ;;  %v6043_v10 = vld [vmem:[#allocation44_spill] sm:$0xff] }
 0x8d3   :  { %2713 = vmatpush1.bf16.msra.mxu0 %v6033_v33  ;;  %2754 = vmatpush1.bf16.msra.mxu1 %v6034_v2  ;;  %v6044_v33 = vld [vmem:[#allocation45_spill] sm:$0xff]  ;;  %v6045_v2 = vld [vmem:[#allocation46_spill] sm:$0xff] }
 0x8d4   :  { %2714 = vmatprep.subr.bf16.mxu0 %v6035_v15  ;;  %2755 = vmatprep.subr.bf16.mxu1 %v6036_v19  ;;  %v6046_v15 = vld [vmem:[#allocation47_spill] sm:$0xff]  ;;  %v6047_v19 = vld [vmem:[#allocation48_spill] sm:$0xff] }
 0x8d7   :  { %2715 = vmatpush1.bf16.msra.mxu0 %v6037_v13  ;;  %2756 = vmatpush1.bf16.msra.mxu1 %v6038_v8  ;;  %v6048_v13 = vld [vmem:[#allocation49_spill] sm:$0xff]  ;;  %v6049_v8 = vld [vmem:[#allocation50_spill] sm:$0xff] }
 0x8d8   :  { %2716 = vmatprep.subr.bf16.mxu0 %v6039_v5  ;;  %2757 = vmatprep.subr.bf16.mxu1 %v6040_v57  ;;  %v6050_v5 = vld [vmem:[#allocation51_spill] sm:$0xff]  ;;  %v6051_v57 = vld [vmem:[#allocation52_spill] sm:$0xff] }
 0x8db   :  { %2717 = vmatpush1.bf16.msra.mxu0 %v6041_v41  ;;  %2758 = vmatpush1.bf16.msra.mxu1 %v6042_v6  ;;  %v6052_v41 = vld [vmem:[#allocation53_spill] sm:$0xff]  ;;  %v6053_v6 = vld [vmem:[#allocation54_spill] sm:$0xff] }
 0x8dc   :  { %2718 = vmatprep.subr.bf16.mxu0 %v6043_v10  ;;  %2759 = vmatprep.subr.bf16.mxu1 %v6044_v33  ;;  %v6054_v10 = vld [vmem:[#allocation55_spill] sm:$0xff]  ;;  %v6055_v33 = vld [vmem:[#allocation56_spill] sm:$0xff] }
 0x8df   :  { %2719 = vmatpush1.bf16.msra.mxu0 %v6045_v2  ;;  %2760 = vmatpush1.bf16.msra.mxu1 %v6046_v15  ;;  %v6056_v2 = vld [vmem:[#allocation57_spill] sm:$0xff]  ;;  %v6057_v15 = vld [vmem:[#allocation58_spill] sm:$0xff] }
 0x8e0   :  { %2720 = vmatprep.subr.bf16.mxu0 %v6047_v19  ;;  %2761 = vmatprep.subr.bf16.mxu1 %v6048_v13  ;;  %v6058_v19 = vld [vmem:[#allocation59_spill] sm:$0xff]  ;;  %v6059_v13 = vld [vmem:[#allocation60_spill] sm:$0xff] }
 0x8e3   :  { %2721 = vmatpush1.bf16.msra.mxu0 %v6049_v8  ;;  %2762 = vmatpush1.bf16.msra.mxu1 %v6050_v5  ;;  %v6060_v8 = vld [vmem:[#allocation61_spill] sm:$0xff]  ;;  %v6061_v5 = vld [vmem:[#allocation62_spill] sm:$0xff] }
 0x8e4   :  { %2722 = vmatprep.subr.bf16.mxu0 %v6051_v57  ;;  %2763 = vmatprep.subr.bf16.mxu1 %v6052_v41  ;;  %v6062_v57 = vld [vmem:[#allocation63_spill] sm:$0xff]  ;;  %v6063_v41 = vld [vmem:[#allocation64_spill] sm:$0xff] }
 0x8e7   :  { %2723 = vmatpush1.bf16.msra.mxu0 %v6053_v6  ;;  %2764 = vmatpush1.bf16.msra.mxu1 %v6054_v10  ;;  %v6064_v6 = vld [vmem:[#allocation65_spill] sm:$0xff]  ;;  %v6065_v10 = vld [vmem:[#allocation66_spill] sm:$0xff] }
 0x8e8   :  { %2724 = vmatprep.subr.bf16.mxu0 %v6055_v33  ;;  %2765 = vmatprep.subr.bf16.mxu1 %v6056_v2  ;;  %v6066_v33 = vld [vmem:[#allocation67_spill] sm:$0xff]  ;;  %v6067_v2 = vld [vmem:[#allocation68_spill] sm:$0xff] }
 0x8eb   :  { %2725 = vmatpush1.bf16.msra.mxu0 %v6057_v15  ;;  %2766 = vmatpush1.bf16.msra.mxu1 %v6058_v19  ;;  %v6068_v15 = vld [vmem:[#allocation69_spill] sm:$0xff]  ;;  %v6069_v19 = vld [vmem:[#allocation70_spill] sm:$0xff] }
 0x8ec   :  { %2726 = vmatprep.subr.bf16.mxu0 %v6059_v13  ;;  %2767 = vmatprep.subr.bf16.mxu1 %v6060_v8  ;;  %v6070_v13 = vld [vmem:[#allocation71_spill] sm:$0xff]  ;;  %v6071_v8 = vld [vmem:[#allocation72_spill] sm:$0xff] }
 0x8ef   :  { %2727 = vmatpush1.bf16.msra.mxu0 %v6061_v5  ;;  %2768 = vmatpush1.bf16.msra.mxu1 %v6062_v57  ;;  %v6072_v5 = vld [vmem:[#allocation73_spill] sm:$0xff]  ;;  %v6073_v57 = vld [vmem:[#allocation74_spill] sm:$0xff] }
 0x8f0   :  { %2728 = vmatprep.subr.bf16.mxu0 %v6063_v41  ;;  %2769 = vmatprep.subr.bf16.mxu1 %v6064_v6  ;;  %v6074_v41 = vld [vmem:[#allocation75_spill] sm:$0xff]  ;;  %v6075_v6 = vld [vmem:[#allocation76_spill] sm:$0xff] }
 0x8f3   :  { %2729 = vmatpush1.bf16.msra.mxu0 %v6065_v10  ;;  %2770 = vmatpush1.bf16.msra.mxu1 %v6066_v33  ;;  %v6076_v10 = vld [vmem:[#allocation77_spill] sm:$0xff]  ;;  %v6077_v33 = vld [vmem:[#allocation78_spill] sm:$0xff] }
 0x8f4   :  { %2730 = vmatprep.subr.bf16.mxu0 %v6067_v2  ;;  %2771 = vmatprep.subr.bf16.mxu1 %v6068_v15  ;;  %v6078_v2 = vld [vmem:[#allocation79_spill] sm:$0xff]  ;;  %v6079_v15 = vld [vmem:[#allocation80_spill] sm:$0xff] }
 0x8f7   :  { %2731 = vmatpush1.bf16.msra.mxu0 %v6069_v19  ;;  %2772 = vmatpush1.bf16.msra.mxu1 %v6070_v13  ;;  %v6080_v19 = vld [vmem:[#allocation81_spill] sm:$0xff] }
 0x8f8   :  { %2732 = vmatprep.subr.bf16.mxu0 %v6071_v8  ;;  %2773 = vmatprep.subr.bf16.mxu1 %v6072_v5 }
 0x8fb   :  { %2733 = vmatpush1.bf16.msra.mxu0 %v6073_v57  ;;  %2774 = vmatpush1.bf16.msra.mxu1 %v6074_v41 }
 0x8fc   :  { %2734 = vmatprep.subr.bf16.mxu0 %v6075_v6  ;;  %2775 = vmatprep.subr.bf16.mxu1 %v6076_v10 }
 0x8ff   :  { %2735 = vmatpush1.bf16.msra.mxu0 %v6077_v33  ;;  %2776 = vmatpush1.bf16.msra.mxu1 %v6078_v2 }
 0x900   :  { %2786 = vmatprep.subr.bf16.mxu0 %v6079_v15  ;;  %2827 = vmatprep.subr.bf16.mxu1 %v6080_v19 }
 0x955   :  { %v2472_v13 = vpop.f32.mrb[48].mxu0  ;;  %v2513_v8 = vpop.f32.mrb[48].mxu1 }
 0x956   :  { %v2474_v20 = vpop.f32.mrb[49].mxu0  ;;  %v2515_v5 = vpop.f32.mrb[49].mxu1 }
 0x957   :  { %v2610_v39 = vcombine.low %v2472_v13, %v2474_v20  ;;  %v2611_v57 = vcombine.low %v2513_v8, %v2515_v5  ;;  %v2476_v58 = vpop.f32.mrb[50].mxu0  ;;  %v2517_v41 = vpop.f32.mrb[50].mxu1 }
 0x958   :  { %v2477_v63 = vpop.f32.mrb[51].mxu0  ;;  %v2518_v6 = vpop.f32.mrb[51].mxu1 }
 0x959   :  { %v2620_v10 = vrot.slane %v2610_v39, %v4060_v25  ;;  %v2627_v33 = vrot.slane %v2611_v57, %v4060_v25  ;;  %v2424_v57 = vld [vmem:[%s2423_s23] sm:$0xff] }
 0x95b   :  { %v2642_v11 = vcombine.low %v2620_v10, %v2627_v33 }
 0x95d   :  { %v2650_v8 = vrot.slane %v2642_v11, %v4060_v25  ;;  %v2683_v11 = vstv %s2682_s25 }
 0x95e   :  { %vm4997_vm6 = vcmp.eq.s32.totalorder %v2683_v11, 1  ;;  %v2958_v11 = vld [vmem:[#allocation10 + $0x30] sm:$0xff] }
 0x995   :  { %v2554_v2 = vpop.f32.mrb[52].mxu0  ;;  %v2595_v15 = vpop.f32.mrb[52].mxu1 }
 0x996   :  { %v2556_v26 = vpop.f32.mrb[53].mxu0  ;;  %v2597_v19 = vpop.f32.mrb[53].mxu1 }
 0x997   :  { %v2612_v49 = vcombine.low %v2554_v2, %v2556_v26  ;;  %v2613_v59 = vcombine.low %v2595_v15, %v2597_v19  ;;  %v2558_v18 = vpop.f32.mrb[54].mxu0  ;;  %v2599_v24 = vpop.f32.mrb[54].mxu1 }
 0x998   :  { %v2559_v20 = vpop.f32.mrb[55].mxu0  ;;  %v2600_v58 = vpop.f32.mrb[55].mxu1 }
 0x999   :  { %v2634_v63 = vrot.slane %v2612_v49, %v4060_v25  ;;  %v2641_v13 = vrot.slane %v2613_v59, %v4060_v25 }
 0x99b   :  { %v2643_v39 = vcombine.low %v2634_v63, %v2641_v13 }
 0x99d   :  { %v2657_v5 = vrot.slane %v2643_v39, %v4060_v25 }
 0x99f   :  { %v2658_v41 = vcombine.low %v2650_v8, %v2657_v5 }
 0x9a1   :  { %v2660_v6 = vadd.f32 %v2658_v41, %v2424_v57 }
 0x9a3   :  { %v3259_v26 = vmul.f32 -1.442695, %v2660_v6  ;;  %v2668_v10 = vrot.slane %v2660_v6, 6 }
 0x9a5   :  { %3389 = vpow2.f32 %v3259_v26  ;;  %v2956_v26 = vld [vmem:[#allocation10 + $0x20] sm:$0xff] }
 0x9af   :  { %v3390_v18 = vpop.eup %3389 }
 0x9b0   :  { %v2664_v24 = vadd.f32 1.0, %v3390_v18  ;;  %v2957_v18 = vld [vmem:[#allocation10 + $0x28] sm:$0xff] }
 0x9b2   :  { %3391 = vrcp.f32 %v2664_v24  ;;  %v2974_v24 = vld [vmem:[#allocation10 + $0xb0] sm:$0xff] }
 0x9b3   :  { %3393 = vtanh.f32 %v2668_v10  ;;  %v2975_v10 = vld [vmem:[#allocation10 + $0xb8] sm:$0xff] }
 0x9bc   :  { %v3392_v59 = vpop.eup %3391 }
 0x9bd   :  { %v2672_v49 = vrot.slane %v3392_v59, 2  ;;  %v3394_v33 = vpop.eup %3393  ;;  %v2678_v63 = vrot.slane %v3392_v59, 4 }
 0x9be   :  { %v2675_v15 = vmul.f32 %v3394_v33, %v3392_v59  ;;  %v3308_v59 = vpack.c.bf16 %v2957_v18, %v2956_v26  ;;  %v2959_v33 = vld [vmem:[#allocation10 + $0x38] sm:$0xff] }
 0x9bf   :  { %v2674_v2 = vmul.f32 %v2672_v49, %v4844_v47  ;;  %v3310_v49 = vpack.c.bf16 %v2975_v10, %v2974_v24 }
 0x9c1   :  { %v5001_v20 = vadd.f32 %v2675_v15, %v2674_v2  ;;  %v2976_v2 = vld [vmem:[#allocation10 + $0xc0] sm:$0xff]  ;;  %v2977_v15 = vld [vmem:[#allocation10 + $0xc8] sm:$0xff] }
 0x9c3   :  { %3395 = vtanh.f32 %v5001_v20  ;;  %v2686_v58 = vsel %vm4997_vm6, %v5001_v20, %v4844_v47 }
 0x9cd   :  { %v3396_v13 = vpop.eup %3395 }
 0x9ce   :  { %v2680_v39 = vmul.f32 %v3396_v13, %v2678_v63  ;;  %v3312_v63 = vpack.c.bf16 %v2959_v33, %v2958_v11  ;;  %v3314_v13 = vpack.c.bf16 %v2977_v15, %v2976_v2 }
 0x9d0   :  { %v5011_v8 = vsel %vm4997_vm6, %v2680_v39, %v4847_v1  ;;  %v2960_v39 = vld [vmem:[#allocation10 + $0x40] sm:$0xff] }
 0x9d1   :  { %v2699_v5 = vrot.slane %v5011_v8, %v4073_v12  ;;  %v2695_v57 = vrot.slane %v5011_v8, %v4075_v40 }
 0x9d3   :  { %v2703_v41 = vpack.c.bf16 %v2699_v5, %v2699_v5  ;;  %v5017_v6 = vpack.c.bf16 %v2695_v57, %v2695_v57  ;;  %v2961_v5 = vld [vmem:[#allocation10 + $0x48] sm:$0xff]  ;;  %v2978_v57 = vld [vmem:[#allocation10 + $0xd0] sm:$0xff] }
 0x9d5   :  { %2736 = vmatprep.mubr.bf16.mxu0 %v2703_v41  ;;  %2777 = vmatprep.mubr.bf16.mxu1 %v2703_v41 }
 0x9d6   :  { %2737 = vmatmul.mubr.bf16.vlgmr.msra.gmra.mrb[56].mxu0 %v5017_v6  ;;  %2778 = vmatmul.mubr.bf16.vlgmr.msra.gmra.mrb[56].mxu1 %v5017_v6 }
 0x9d7   :  { %2787 = vmatpush1.bf16.msra.mxu0 %v5545_v34  ;;  %2828 = vmatpush1.bf16.msra.mxu1 %v5546_v7  ;;  %v6083_v34 = vld [vmem:[#allocation120_spill] sm:$0xff]  ;;  %v6084_v7 = vld [vmem:[#allocation121_spill] sm:$0xff] }
 0x9d8   :  { %2818 = vmatprep.mubr.bf16.mxu0 %v2703_v41  ;;  %2859 = vmatprep.mubr.bf16.mxu1 %v2703_v41  ;;  %v2979_v41 = vld [vmem:[#allocation10 + $0xd8] sm:$0xff] }
 0x9d9   :  { %2788 = vmatprep.subr.bf16.mxu0 %v5547_v48  ;;  %2829 = vmatprep.subr.bf16.mxu1 %v5548_v62  ;;  %v6085_v48 = vld [vmem:[#allocation122_spill] sm:$0xff]  ;;  %v6086_v62 = vld [vmem:[#allocation123_spill] sm:$0xff] }
 0x9db   :  { %2789 = vmatpush1.bf16.msra.mxu0 %v5549_v3  ;;  %2830 = vmatpush1.bf16.msra.mxu1 %v5631_v23  ;;  %v6087_v3 = vld [vmem:[#allocation124_spill] sm:$0xff]  ;;  %v6088_v23 = vld [vmem:[#allocation125_spill] sm:$0xff] }
 0x9dc   :  { %2790 = vmatprep.subr.bf16.mxu0 %v5632_v50  ;;  %2831 = vmatprep.subr.bf16.mxu1 %v5633_v60  ;;  %v6089_v50 = vld [vmem:[#allocation126_spill] sm:$0xff]  ;;  %v6090_v60 = vld [vmem:[#allocation127_spill] sm:$0xff] }
 0x9df   :  { %2791 = vmatpush1.bf16.msra.mxu0 %v5634_v30  ;;  %2832 = vmatpush1.bf16.msra.mxu1 %v5635_v27  ;;  %v6091_v30 = vld [vmem:[#allocation128_spill] sm:$0xff]  ;;  %v6092_v27 = vld [vmem:[#allocation129_spill] sm:$0xff] }
 0x9e0   :  { %2792 = vmatprep.subr.bf16.mxu0 %v5636_v22  ;;  %2833 = vmatprep.subr.bf16.mxu1 %v5637_v44  ;;  %v6094_v22 = vld [vmem:[#allocation131_spill] sm:$0xff]  ;;  %v6095_v44 = vld [vmem:[#allocation132_spill] sm:$0xff] }
 0x9e3   :  { %2793 = vmatpush1.bf16.msra.mxu0 %v5638_v28  ;;  %2834 = vmatpush1.bf16.msra.mxu1 %v5639_v29  ;;  %v6096_v28 = vld [vmem:[#allocation133_spill] sm:$0xff]  ;;  %v6097_v29 = vld [vmem:[#allocation134_spill] sm:$0xff] }
 0x9e4   :  { %2794 = vmatprep.subr.bf16.mxu0 %v5721_v43  ;;  %2835 = vmatprep.subr.bf16.mxu1 %v5722_v38  ;;  %v2969_v43 = vld [vmem:[#allocation10 + $0x88] sm:$0xff]  ;;  %v2952_v38 = vld [vmem:[#allocation10] sm:$0xff] }
 0x9e7   :  { %2795 = vmatpush1.bf16.msra.mxu0 %v5723_v14  ;;  %2836 = vmatpush1.bf16.msra.mxu1 %v5724_v21  ;;  %v2953_v21 = vld [vmem:[#allocation10 + $0x8] sm:$0xff] }
 0x9e8   :  { %2796 = vmatprep.subr.bf16.mxu0 %v5725_v4  ;;  %2837 = vmatprep.subr.bf16.mxu1 %v5726_v9  ;;  %v2970_v4 = vld [vmem:[#allocation10 + $0x90] sm:$0xff]  ;;  %v2971_v9 = vld [vmem:[#allocation10 + $0x98] sm:$0xff] }
 0x9eb   :  { %2797 = vmatpush1.bf16.msra.mxu0 %v5727_v17  ;;  %2838 = vmatpush1.bf16.msra.mxu1 %v5728_v32  ;;  %v3300_v17 = vpack.c.bf16 %v2953_v21, %v2952_v38  ;;  %v3302_v32 = vpack.c.bf16 %v2971_v9, %v2970_v4 }
 0x9ec   :  { %2798 = vmatprep.subr.bf16.mxu0 %v5729_v31  ;;  %2839 = vmatprep.subr.bf16.mxu1 %v5730_v0  ;;  %v2954_v31 = vld [vmem:[#allocation10 + $0x10] sm:$0xff]  ;;  %v2955_v0 = vld [vmem:[#allocation10 + $0x18] sm:$0xff] }
 0x9ef   :  { %2799 = vmatpush1.bf16.msra.mxu0 %v5731_v56  ;;  %2840 = vmatpush1.bf16.msra.mxu1 %v5732_v55  ;;  %v2972_v56 = vld [vmem:[#allocation10 + $0xa0] sm:$0xff]  ;;  %v2973_v55 = vld [vmem:[#allocation10 + $0xa8] sm:$0xff] }
 0x9f0   :  { %2800 = vmatprep.subr.bf16.mxu0 %v5652_v45  ;;  %2841 = vmatprep.subr.bf16.mxu1 %v5653_v46  ;;  %v6099_v45 = vld [vmem:[#allocation136_spill] sm:$0xff]  ;;  %v6100_v46 = vld [vmem:[#allocation137_spill] sm:$0xff]  ;;  %v3306_v1 = vpack.c.bf16 %v2973_v55, %v2972_v56 }
 0x9f3   :  { %2801 = vmatpush1.bf16.msra.mxu0 %v5654_v61  ;;  %2842 = vmatpush1.bf16.msra.mxu1 %v5733_v16  ;;  %v6101_v61 = vld [vmem:[#allocation138_spill] sm:$0xff]  ;;  %v3304_v16 = vpack.c.bf16 %v2955_v0, %v2954_v31 }
 0x9f4   :  { %2802 = vmatprep.subr.bf16.mxu0 %v5656_v37  ;;  %2843 = vmatprep.subr.bf16.mxu1 %v5657_v36  ;;  %v6102_v37 = vld [vmem:[#allocation139_spill] sm:$0xff]  ;;  %v6103_v36 = vld [vmem:[#allocation140_spill] sm:$0xff] }
 0x9f7   :  { %2803 = vmatpush1.bf16.msra.mxu0 %v5658_v51  ;;  %2844 = vmatpush1.bf16.msra.mxu1 %v5659_v52  ;;  %v6104_v51 = vld [vmem:[#allocation141_spill] sm:$0xff]  ;;  %v6105_v52 = vld [vmem:[#allocation142_spill] sm:$0xff] }
 0x9f8   :  { %2804 = vmatprep.subr.bf16.mxu0 %v5660_v53  ;;  %2845 = vmatprep.subr.bf16.mxu1 %v5661_v54  ;;  %v6106_v53 = vld [vmem:[#allocation143_spill] sm:$0xff] }
 0x9f9   :  { %v2968_v54 = vld [vmem:[#allocation10 + $0x80] sm:$0xff] }
 0x9fa   :  { %v3298_v14 = vpack.c.bf16 %v2969_v43, %v2968_v54 }
 0x9fb   :  { %2805 = vmatpush1.bf16.msra.mxu0 %v5662_v35  ;;  %2846 = vmatpush1.bf16.msra.mxu1 %v5582_v42  ;;  %v6093_v42 = vld [vmem:[#allocation130_spill] sm:$0xff]  ;;  %v6098_v35 = vld [vmem:[#allocation135_spill] sm:$0xff] }
 0x9fc   :  { %2806 = vmatprep.subr.bf16.mxu0 %v6083_v34  ;;  %2847 = vmatprep.subr.bf16.mxu1 %v6084_v7  ;;  %v3318_v34 = vpack.c.bf16 %v2979_v41, %v2978_v57  ;;  %v2962_v7 = vld [vmem:[#allocation10 + $0x50] sm:$0xff] }
 0x9ff   :  { %2807 = vmatpush1.bf16.msra.mxu0 %v6085_v48  ;;  %2848 = vmatpush1.bf16.msra.mxu1 %v6086_v62  ;;  %v2963_v48 = vld [vmem:[#allocation10 + $0x58] sm:$0xff]  ;;  %v2980_v62 = vld [vmem:[#allocation10 + $0xe0] sm:$0xff] }
 0xa00   :  { %2808 = vmatprep.subr.bf16.mxu0 %v6087_v3  ;;  %2849 = vmatprep.subr.bf16.mxu1 %v6088_v23  ;;  %v2981_v3 = vld [vmem:[#allocation10 + $0xe8] sm:$0xff]  ;;  %v3320_v23 = vpack.c.bf16 %v2963_v48, %v2962_v7 }
 0xa03   :  { %2809 = vmatpush1.bf16.msra.mxu0 %v6089_v50  ;;  %2850 = vmatpush1.bf16.msra.mxu1 %v6090_v60  ;;  %v3322_v50 = vpack.c.bf16 %v2981_v3, %v2980_v62  ;;  %v2964_v60 = vld [vmem:[#allocation10 + $0x60] sm:$0xff] }
 0xa04   :  { %2810 = vmatprep.subr.bf16.mxu0 %v6091_v30  ;;  %2851 = vmatprep.subr.bf16.mxu1 %v6092_v27  ;;  %v2965_v30 = vld [vmem:[#allocation10 + $0x68] sm:$0xff]  ;;  %v2982_v27 = vld [vmem:[#allocation10 + $0xf0] sm:$0xff] }
 0xa07   :  { %2811 = vmatpush1.bf16.msra.mxu0 %v6093_v42  ;;  %2852 = vmatpush1.bf16.msra.mxu1 %v6094_v22  ;;  %v2983_v42 = vld [vmem:[#allocation10 + $0xf8] sm:$0xff]  ;;  %v3324_v22 = vpack.c.bf16 %v2965_v30, %v2964_v60 }
 0xa08   :  { %2812 = vmatprep.subr.bf16.mxu0 %v6095_v44  ;;  %2853 = vmatprep.subr.bf16.mxu1 %v6096_v28  ;;  %v3326_v44 = vpack.c.bf16 %v2983_v42, %v2982_v27  ;;  %v2966_v28 = vld [vmem:[#allocation10 + $0x70] sm:$0xff] }
 0xa0b   :  { %2813 = vmatpush1.bf16.msra.mxu0 %v6097_v29  ;;  %2854 = vmatpush1.bf16.msra.mxu1 %v6098_v35  ;;  %v2967_v29 = vld [vmem:[#allocation10 + $0x78] sm:$0xff] }
 0xa0c   :  { %2814 = vmatprep.subr.bf16.mxu0 %v6099_v45  ;;  %2855 = vmatprep.subr.bf16.mxu1 %v6100_v46  ;;  %v3328_v35 = vpack.c.bf16 %v2967_v29, %v2966_v28 }
 0xa0f   :  { %2815 = vmatpush1.bf16.msra.mxu0 %v6101_v61  ;;  %2856 = vmatpush1.bf16.msra.mxu1 %v6102_v37 }
 0xa10   :  { %2816 = vmatprep.subr.bf16.mxu0 %v6103_v36  ;;  %2857 = vmatprep.subr.bf16.mxu1 %v6104_v51 }
 0xa13   :  { %2817 = vmatpush1.bf16.msra.mxu0 %v6105_v52  ;;  %2858 = vmatpush1.bf16.msra.mxu1 %v6106_v53 }
 0xa14   :  { %3299 = vmatprep.subr.bf16.mxu0 %v3298_v14 }
 0xa16   :  { %2819 = vmatmul.mubr.bf16.vlgmr.msra.gmra.mrb[60].mxu0 %v5017_v6  ;;  %2860 = vmatmul.mubr.bf16.vlgmr.msra.gmra.mrb[60].mxu1 %v5017_v6  ;;  %v3316_v6 = vpack.c.bf16 %v2961_v5, %v2960_v39 }
 0xa17   :  { %3301 = vmatpush3.bf16.msra.mxu0 %v3300_v17 }
 0xa18   :  { %3303 = vmatprep.subr.bf16.mxu0 %v3302_v32 }
 0xa1b   :  { %3305 = vmatpush3.bf16.msra.mxu0 %v3304_v16 }
 0xa1c   :  { %3307 = vmatprep.subr.bf16.mxu0 %v3306_v1 }
 0xa1f   :  { %3309 = vmatpush3.bf16.msra.mxu0 %v3308_v59 }
 0xa20   :  { %3311 = vmatprep.subr.bf16.mxu0 %v3310_v49  ;;  %v2690_v49 = vld [vmem:[%s2689_s1] sm:$0xff] }
 0xa23   :  { %3313 = vmatpush3.bf16.msra.mxu0 %v3312_v63 }
 0xa24   :  { %3315 = vmatprep.subr.bf16.mxu0 %v3314_v13 }
 0xa27   :  { %3317 = vmatpush3.bf16.msra.mxu0 %v3316_v6 }
 0xa28   :  { %3319 = vmatprep.subr.bf16.mxu0 %v3318_v34  ;;  %v2949_v34 = vstv %s2948_s30 }
 0xa29   :  { %vm2950_vm7 = vcmp.eq.s32.totalorder %v2949_v34, 1 }
 0xa2b   :  { %3321 = vmatpush3.bf16.msra.mxu0 %v3320_v23  ;;  %v2984_v23 = vld [vmem:[%s5122_s5] sm:$0x1]  ;;  %s3487_s5 = scalar_lea.vmem %s3087_s9, 16 }
 0xa2c   :  { %3323 = vmatprep.subr.bf16.mxu0 %v3322_v50  ;;  %p3488_p9 = scmp.ne.s32.totalorder %s3087_s9, %s3487_s5  ;;  %p3493_p11 = scmp.lt.s32.totalorder %s3491_s10, %s3487_s5 }
 0xa2e   :  { %p3494_p12 = por %p3493_p11, %p3492_p10 }
 0xa2f   :  { %3325 = vmatpush3.bf16.msra.mxu0 %v3324_v22 }
 0xa30   :  { %3327 = vmatprep.subr.bf16.mxu0 %v3326_v44  ;;  %p3495_p13 = pnand %p3494_p12, %p3488_p9 }
 0xa33   :  { %3329 = vmatpush3.bf16.msra.mxu0 %v3328_v35 }
 0xaa9   :  { %v2738_v45 = vpop.f32.mrb[56].mxu0  ;;  %v2779_v46 = vpop.f32.mrb[56].mxu1 }
 0xaaa   :  { %v2740_v61 = vpop.f32.mrb[57].mxu0  ;;  %v2781_v37 = vpop.f32.mrb[57].mxu1 }
 0xaab   :  { %v2876_v36 = vcombine.low %v2738_v45, %v2740_v61  ;;  %v2877_v51 = vcombine.low %v2779_v46, %v2781_v37  ;;  %v2742_v52 = vpop.f32.mrb[58].mxu0  ;;  %v2783_v53 = vpop.f32.mrb[58].mxu1 }
 0xaac   :  { %v2743_v54 = vpop.f32.mrb[59].mxu0  ;;  %v2784_v43 = vpop.f32.mrb[59].mxu1 }
 0xaad   :  { %v2886_v38 = vrot.slane %v2876_v36, %v4060_v25  ;;  %v2893_v14 = vrot.slane %v2877_v51, %v4060_v25 }
 0xaaf   :  { %v2908_v21 = vcombine.low %v2886_v38, %v2893_v14 }
 0xab1   :  { %v2916_v10 = vrot.slane %v2908_v21, %v4060_v25 }
 0xae9   :  { %v2820_v4 = vpop.f32.mrb[60].mxu0  ;;  %v2861_v9 = vpop.f32.mrb[60].mxu1 }
 0xaea   :  { %v2822_v17 = vpop.f32.mrb[61].mxu0  ;;  %v2863_v32 = vpop.f32.mrb[61].mxu1 }
 0xaeb   :  { %v2878_v31 = vcombine.low %v2820_v4, %v2822_v17  ;;  %v2879_v0 = vcombine.low %v2861_v9, %v2863_v32  ;;  %v2824_v56 = vpop.f32.mrb[62].mxu0  ;;  %v2865_v55 = vpop.f32.mrb[62].mxu1 }
 0xaec   :  { %v2825_v16 = vpop.f32.mrb[63].mxu0  ;;  %v2866_v1 = vpop.f32.mrb[63].mxu1 }
 0xaed   :  { %v2900_v26 = vrot.slane %v2878_v31, %v4060_v25  ;;  %v2907_v18 = vrot.slane %v2879_v0, %v4060_v25 }
 0xaef   :  { %v2909_v24 = vcombine.low %v2900_v26, %v2907_v18 }
 0xaf1   :  { %v2923_v59 = vrot.slane %v2909_v24, %v4060_v25 }
 0xaf3   :  { %v2924_v11 = vcombine.low %v2916_v10, %v2923_v59 }
 0xaf5   :  { %v2926_v33 = vadd.f32 %v2924_v11, %v2690_v49 }
 0xaf7   :  { %v3262_v2 = vmul.f32 -1.442695, %v2926_v33  ;;  %v2934_v13 = vrot.slane %v2926_v33, 6 }
 0xaf9   :  { %3397 = vpow2.f32 %v3262_v2 }
 0xb03   :  { %v3398_v15 = vpop.eup %3397 }
 0xb04   :  { %v2930_v63 = vadd.f32 1.0, %v3398_v15 }
 0xb06   :  { %3399 = vrcp.f32 %v2930_v63 }
 0xb07   :  { %3401 = vtanh.f32 %v2934_v13 }
 0xb10   :  { %v3400_v39 = vpop.eup %3399 }
 0xb11   :  { %v2938_v5 = vrot.slane %v3400_v39, 2  ;;  %v3402_v57 = vpop.eup %3401  ;;  %v2944_v7 = vrot.slane %v3400_v39, 4 }
 0xb12   :  { %v2941_v41 = vmul.f32 %v3402_v57, %v3400_v39 }
 0xb13   :  { %v2940_v25 = vmul.f32 %v2938_v5, %v2686_v58 }
 0xb15   :  { %v2942_v6 = vadd.f32 %v2941_v41, %v2940_v25 }
 0xb17   :  { %3403 = vtanh.f32 %v2942_v6 }
 0xb21   :  { %v3404_v48 = vpop.eup %3403 }
 0xb22   :  { %v2946_v62 = vmul.f32 %v3404_v48, %v2944_v7 }
 0xb24   :  { %v2951_v3 = vsel %vm2950_vm7, %v2946_v62, %v5011_v8 }
 0xb25   :  { %v2989_v19 = vrot.slane %v2951_v3, %v4075_v40  ;;  %v2993_v47 = vrot.slane %v2951_v3, %v4073_v12 }
 0xb27   :  { %3060 = vmatprep.mubr.f32.mxu0 %v2993_v47 }
 0xb28   :  { %3061 = vmatmul.mubr.f32.vlgmr.msra.gmra.mrb[64].mxu0 %v2989_v19 }
 0xbfb   :  { %v3295_v20 = vpop.f32.mrb[64].mxu0 }
 0xbfc   :  { %v3296_v58 = vpop.f32.mrb[65].mxu0 }
 0xbfd   :  { %v3297_v50 = vadd.f32 %v3296_v58, %v3295_v20 }
 0xbff   :  { %v3063_v60 = vadd.f32 %v3297_v50, %v2984_v23 }
 0xc01   :  { %v3067_v30 = vsel %vm3066_vm8, %v3063_v60, -inf }
 0xc02   :  { %3068 = vmax.xlane.f32.xlu0 %v3067_v30 }
 0xc8f   :  { %v3069_v27 = vpop.xlane.xlu0 %3068 }
 0xc90   :  { %v3070_v42 = vsub.f32 %v3063_v60, %v3069_v27 }
 0xc92   :  { %v3071_v8 = vmul.f32 1.442695, %v3070_v42 }
 0xc94   :  { %3405 = vpow2.f32 %v3071_v8 }
 0xc9e   :  { %v3406_v40 = vpop.eup %3405 }
 0xc9f   :  { %v3073_v22 = vsel %vm3066_vm8, %v3406_v40, 0.0 }
 0xca0   :  { %3074 = vadd.xlane.f32.xlu0 %v3073_v22 }
 0xd2d   :  { %v3075_v12 = vpop.xlane.xlu0 %3074 }
 0xd2e   :  { %3407 = vlog2.f32 %v3075_v12 }
 0xd38   :  { %v3408_v44 = vpop.eup %3407 }
 0xd39   :  { %v3077_v28 = vmul.f32 0.6931472, %v3408_v44 }
 0xd3b   :  { %v3078_v29 = vsub.f32 %v3070_v42, %v3077_v28 }
 0xd3d   :  { %3079 = vst [vmem:[#allocation11] sm:$0x1] %v3078_v29 }
 0xd3e   :  { %3498 = shalt.err (!%p3495_p13)
}
 0xd3f   :  { %s3499_s2 = scalar_lea.hbm %s5123_s6, 16 }
 0xd40   :  { %p3500_p0 = scmp.ne.s32.totalorder %s5123_s6, %s3499_s2  ;;  %p3503_p1 = scmp.lt.u32.totalorder %s3499_s2, %s5123_s6 }
 0xd42   :  { %p3505_p2 = pnand %p3503_p1, %p3500_p0 }
 0xd44   :  { %3508 = shalt.err (!%p3505_p2)
}
 0xd45   :  { %3089 = dma.vmem_to_hbm [thread:$0]  %s3087_s9, 16, %s5123_s6, [#allocation7]  }
 0xd46   :  { %3515 = dma.done.wait [#allocation7], 16  }
 0xd47   :  { %3516 = vsyncadd [#allocation7], 4294967280 }
 0xd48   :  { %3093 = vsyncpa [#allocation6], 1 }
 0xd49   :  { %3094 = vsyncpa [#allocation9], 1 }
 0xd4a   :  { %3095 = vsyncpa [#allocation7], 1 }

</bundles_post_ra>
